<compile_context>
chip_gen: v7x
topology: tpu7x:2x2x1
jax: 0.10.0
libtpu: 0.0.40
codegen_flags: <defaults>
</compile_context>

<pallas_src>
import functools

import numpy as np
import jax
import jax.numpy as jnp
from jax.experimental import pallas as pl


# --------------------------------------------------------------------------- #
# Fused kernel
# --------------------------------------------------------------------------- #
def _tdss_kernel(
    # data
    x_ref, xp_ref, eps1_ref, eps2_ref,
    # VAE layer 1 / 2 weights
    wm1_ref, bm1_ref, wv1_ref, bv1_ref, wd1_ref, bd1_ref,
    wm2_ref, bm2_ref, wv2_ref, bv2_ref, wd2_ref, bd2_ref,
    # spatial branch: conv1(1x1) + BN1, conv2(3x3) + BN2
    c1w_ref, c1b_ref, bn1g_ref, bn1b_ref,
    w2_ref, c2b_ref, bn2g_ref, bn2b_ref,
    # structural constants + lin1 + concat placement + classifier
    gat_ref, sel_ref, wl1_ref, bl1_ref,
    etop_ref, ebot_ref, cw_ref, cb_ref,
    # outputs
    h1_ref, xhat1_ref, kld1_ref, hss_ref, xhat2_ref, kld2_ref, out_ref,
    *, n_pos, kld1_denom, kld2_denom):

    f32 = jnp.float32

    def dot(a, b):
        return jnp.dot(a, b, preferred_element_type=f32)

    def bn_relu(y, gamma, beta):
        # Training-mode BatchNorm: batch statistics, biased variance, eps=1e-5.
        mu = jnp.mean(y, axis=0, keepdims=True)
        var = jnp.mean((y - mu) ** 2, axis=0, keepdims=True)
        return jnp.maximum((y - mu) * jax.lax.rsqrt(var + 1e-5) * gamma + beta, 0.0)

    def vae_layer(x, wm, bm, wv, bv, wd, bd, eps, denom):
        mean = dot(x, wm) + bm
        log_var = dot(x, wv) + bv
        hidden = mean + jnp.exp(0.5 * log_var) * eps          # reparameterization
        x_hat = jnp.tanh(dot(hidden, wd) + bd)
        kld = -0.5 * jnp.sum(1.0 + log_var - mean * mean - jnp.exp(log_var)) / denom
        return hidden, x_hat, kld

    # ----------------------- spectral (VAE) branch --------------------------
    h1, xhat1, kld1 = vae_layer(
        x_ref[...], wm1_ref[...], bm1_ref[...], wv1_ref[...], bv1_ref[...],
        wd1_ref[...], bd1_ref[...], eps1_ref[...], kld1_denom)
    h1_ref[...] = h1
    xhat1_ref[...] = xhat1
    kld1_ref[...] = kld1.reshape(1, 1)

    h2, xhat2, kld2 = vae_layer(
        h1, wm2_ref[...], bm2_ref[...], wv2_ref[...], bv2_ref[...],
        wd2_ref[...], bd2_ref[...], eps2_ref[...], kld2_denom)
    xhat2_ref[...] = xhat2
    kld2_ref[...] = kld2.reshape(1, 1)
    th2 = jax.nn.sigmoid(h2)                                   # (B, R)

    # ----------------------------- spatial branch ---------------------------
    # conv1 (1x1) == per-pixel matmul; BN1 + ReLU fused on the vreg-resident result.
    y1 = bn_relu(dot(xp_ref[...], c1w_ref[...]) + c1b_ref[...],
                 bn1g_ref[...], bn1b_ref[...])                 # (B*P*P, 30)

    # conv2 (3x3, valid): 9 accumulated matmuls — per tap, project channels with
    # W2[tap] then gather the shifted rows with a constant 0/1 matrix.  No HBM
    # im2col, no in-kernel reshape/transpose.
    acc = None
    for kk in range(9):
        t = dot(gat_ref[kk], dot(y1, w2_ref[kk]))              # (B*Q*Q, 10)
        acc = t if acc is None else acc + t
    y2 = bn_relu(acc + c2b_ref[...], bn2g_ref[...], bn2b_ref[...])   # (B*Q*Q, 10)

    # NCHW flatten + Linear + Sigmoid: the flatten order is folded into the
    # per-position weight stack at init; the per-sample row pick is again a
    # constant-matrix matmul.
    acc = None
    for pos in range(n_pos):
        t = dot(sel_ref[pos], dot(y2, wl1_ref[pos]))           # (B, R)
        acc = t if acc is None else acc + t
    sp = jax.nn.sigmoid(acc + bl1_ref[...])                    # (B, R)

    # concat([sigmoid(h2), spatial], axis=1) as two lane-placement matmuls so the
    # fused epilogue needs no unaligned lane writes.
    hss = dot(th2, etop_ref[...]) + dot(sp, ebot_ref[...])     # (B, 2R)
    hss_ref[...] = hss
    out_ref[...] = dot(hss, cw_ref[...]) + cb_ref[...]         # (B, class_num)


# --------------------------------------------------------------------------- #
# Trace-time structural constants (depend only on batch, patch_size, r)
# --------------------------------------------------------------------------- #
@functools.lru_cache(maxsize=None)
def _plan_constants(batch, patch, r):
    q = patch - 2
    # gat[kk]: picks row (b, i+kh, j+kw) of the (B*P*P, C) pixel matrix for each
    # output pixel (b, i, j); kk = kh*3 + kw.
    gat = np.zeros((9, batch * q * q, batch * patch * patch), np.float32)
    for kh in range(3):
        for kw in range(3):
            kk = kh * 3 + kw
            for b in range(batch):
                for i in range(q):
                    for j in range(q):
                        gat[kk,
                            b * q * q + i * q + j,
                            b * patch * patch + (i + kh) * patch + (j + kw)] = 1.0
    # sel[pos]: picks row (b, pos) of the (B*Q*Q, C) matrix for each sample b.
    sel = np.zeros((q * q, batch, batch * q * q), np.float32)
    for pos in range(q * q):
        for b in range(batch):
            sel[pos, b, b * q * q + pos] = 1.0
    # Lane-placement matrices implementing concat([a, b], axis=1).
    e_top = np.zeros((r, 2 * r), np.float32)
    e_bot = np.zeros((r, 2 * r), np.float32)
    e_top[:, :r] = np.eye(r, dtype=np.float32)
    e_bot[:, r:] = np.eye(r, dtype=np.float32)
    return gat, sel, e_top, e_bot


# --------------------------------------------------------------------------- #
# Forward wrapper: one pallas_call for the whole network
# --------------------------------------------------------------------------- #
@jax.jit
def tdss_forward(params, target_data, target_data_spatial, eps1, eps2):
    b, cin, p_sz, _ = target_data_spatial.shape
    q = p_sz - 2
    d = target_data.shape[1]
    h = params["wm1"].shape[1]
    r = params["wm2"].shape[1]
    n_cls = params["cls_w"].shape[1]

    # One-time layout change on the *input* only: NCHW -> (pixel rows, channels).
    xp = jnp.transpose(target_data_spatial, (0, 2, 3, 1)).reshape(b * p_sz * p_sz, cin)

    gat, sel, e_top, e_bot = _plan_constants(b, p_sz, r)

    kernel = functools.partial(
        _tdss_kernel, n_pos=q * q,
        kld1_denom=float(d * b), kld2_denom=float(h * b))

    out_shape = (
        jax.ShapeDtypeStruct((b, h), jnp.float32),      # target_hidden (h1)
        jax.ShapeDtypeStruct((b, d), jnp.float32),      # input_hat_1
        jax.ShapeDtypeStruct((1, 1), jnp.float32),      # kld_1
        jax.ShapeDtypeStruct((b, 2 * r), jnp.float32),  # hidden_spectral_spatial
        jax.ShapeDtypeStruct((b, h), jnp.float32),      # input_hat_2
        jax.ShapeDtypeStruct((1, 1), jnp.float32),      # kld_2
        jax.ShapeDtypeStruct((b, n_cls), jnp.float32),  # target_out
    )

    return pl.pallas_call(kernel, out_shape=out_shape)(
        target_data, xp, eps1, eps2,
        params["wm1"], params["bm1"], params["wv1"], params["bv1"],
        params["wd1"], params["bd1"],
        params["wm2"], params["bm2"], params["wv2"], params["bv2"],
        params["wd2"], params["bd2"],
        params["conv1_w"], params["conv1_b"], params["bn1_g"], params["bn1_b"],
        params["w2_stack"], params["conv2_b"], params["bn2_g"], params["bn2_b"],
        gat, sel, params["wl1_stack"], params["lin1_b"],
        e_top, e_bot, params["cls_w"], params["cls_b"])


# --------------------------------------------------------------------------- #
# Deterministic parameter init (PyTorch layouts folded into matmul form once)
# --------------------------------------------------------------------------- #
def init_params(key, target_input_dim, patch_size, hidden_dim, r, class_num):
    ks = jax.random.split(key, 10)
    q = patch_size - 2

    def lin(k, din, dout, std):
        return (jax.random.normal(k, (din, dout), jnp.float32) * std,
                jnp.zeros((1, dout), jnp.float32))

    p = {}
    # VAE linears: weights_init -> N(0, 0.002), bias = 0.
    p["wm1"], p["bm1"] = lin(ks[0], target_input_dim, hidden_dim, 0.002)
    p["wv1"], p["bv1"] = lin(ks[1], target_input_dim, hidden_dim, 0.002)
    p["wd1"], p["bd1"] = lin(ks[2], hidden_dim, target_input_dim, 0.002)
    p["wm2"], p["bm2"] = lin(ks[3], hidden_dim, r, 0.002)
    p["wv2"], p["bv2"] = lin(ks[4], hidden_dim, r, 0.002)
    p["wd2"], p["bd2"] = lin(ks[5], r, hidden_dim, 0.002)

    # conv1 1x1: PyTorch weight (30, Cin, 1, 1) -> matmul form (Cin, 30).
    w1 = jax.random.normal(ks[6], (30, target_input_dim, 1, 1), jnp.float32) * 0.05
    p["conv1_w"] = w1.reshape(30, target_input_dim).T
    p["conv1_b"] = jnp.zeros((1, 30), jnp.float32)
    p["bn1_g"] = jnp.ones((1, 30), jnp.float32)
    p["bn1_b"] = jnp.zeros((1, 30), jnp.float32)

    # conv2 3x3: PyTorch weight (10, 30, 3, 3) -> per-tap stack (9, 30, 10).
    w2 = jax.random.normal(ks[7], (10, 30, 3, 3), jnp.float32) * 0.05
    p["w2_stack"] = jnp.transpose(w2, (2, 3, 1, 0)).reshape(9, 30, 10)
    p["conv2_b"] = jnp.zeros((1, 10), jnp.float32)
    p["bn2_g"] = jnp.ones((1, 10), jnp.float32)
    p["bn2_b"] = jnp.zeros((1, 10), jnp.float32)

    # lin1 over PyTorch's NCHW flatten (row index = c*Q*Q + i*Q + j).  One-time
    # permutation into per-position (Q*Q, 10, R) so no intermediate transpose is
    # ever needed in the kernel.
    wl, p["lin1_b"] = lin(ks[8], q * q * 10, r, 0.05)
    p["wl1_stack"] = jnp.transpose(wl.reshape(10, q * q, r), (1, 0, 2))

    p["cls_w"], p["cls_b"] = lin(ks[9], 2 * r, class_num, 0.05)
    return p


# --------------------------------------------------------------------------- #
# Pure-JAX reference (for validation only)
# --------------------------------------------------------------------------- #
def _reference_forward(params, target_data, target_data_spatial, eps1, eps2):
    b, cin, p_sz, _ = target_data_spatial.shape
    q = p_sz - 2
    d = target_data.shape[1]
    h = params["wm1"].shape[1]
    r = params["wm2"].shape[1]

    def vae(x, wm, bm, wv, bv, wd, bd, eps, denom):
        mean = x @ wm + bm
        lv = x @ wv + bv
        hidden = mean + jnp.exp(0.5 * lv) * eps
        xhat = jnp.tanh(hidden @ wd + bd)
        kld = -0.5 * jnp.sum(1.0 + lv - mean ** 2 - jnp.exp(lv)) / denom
        return hidden, xhat, kld

    def bn_relu(y, g, bb):
        mu = jnp.mean(y, axis=0, keepdims=True)
        var = jnp.mean((y - mu) ** 2, axis=0, keepdims=True)
        return jnp.maximum((y - mu) / jnp.sqrt(var + 1e-5) * g + bb, 0.0)

    h1, xhat1, kld1 = vae(target_data, params["wm1"], params["bm1"], params["wv1"],
                          params["bv1"], params["wd1"], params["bd1"], eps1, d * b)
    h2, xhat2, kld2 = vae(h1, params["wm2"], params["bm2"], params["wv2"],
                          params["bv2"], params["wd2"], params["bd2"], eps2, h * b)
    th2 = jax.nn.sigmoid(h2)

    xp = jnp.transpose(target_data_spatial, (0, 2, 3, 1)).reshape(b * p_sz * p_sz, cin)
    y1 = bn_relu(xp @ params["conv1_w"] + params["conv1_b"],
                 params["bn1_g"], params["bn1_b"]).reshape(b, p_sz, p_sz, 30)
    acc = jnp.zeros((b, q, q, 10), jnp.float32)
    for kh in range(3):
        for kw in range(3):
            acc = acc + jnp.einsum("bijc,cd->bijd",
                                   y1[:, kh:kh + q, kw:kw + q, :],
                                   params["w2_stack"][kh * 3 + kw])
    y2 = bn_relu((acc + params["conv2_b"]).reshape(b * q * q, 10),
                 params["bn2_g"], params["bn2_b"])
    y2_flat = jnp.transpose(y2.reshape(b, q, q, 10), (0, 3, 1, 2)).reshape(b, 10 * q * q)
    wl = jnp.transpose(params["wl1_stack"], (1, 0, 2)).reshape(10 * q * q, r)
    sp = jax.nn.sigmoid(y2_flat @ wl + params["lin1_b"])
    hss = jnp.concatenate([th2, sp], axis=1)
    logits = hss @ params["cls_w"] + params["cls_b"]
    return (h1, xhat1, kld1.reshape(1, 1), hss, xhat2, kld2.reshape(1, 1), logits)


if __name__ == "__main__":
    key = jax.random.PRNGKey(0)
    B, D, P, H, R, CLS = 4, 16, 5, 32, 8, 4   # batch, spectral dim, patch, hidden, r, classes
    k1, k2, k3, k4, kp = jax.random.split(key, 5)

    target_data = jax.random.normal(k1, (B, D), jnp.float32)
    target_data_spatial = jax.random.normal(k2, (B, D, P, P), jnp.float32)  # NCHW
    eps1 = jax.random.normal(k3, (B, H), jnp.float32)   # reparameterization noise, layer 1
    eps2 = jax.random.normal(k4, (B, R), jnp.float32)   # reparameterization noise, layer 2

    params = init_params(kp, D, P, H, R, CLS)
    outs = tdss_forward(params, target_data, target_data_spatial, eps1, eps2)
    jax.block_until_ready(outs)

    h1, xhat1, kld1, hss, xhat2, kld2, logits = outs
    assert h1.shape == (B, H) and xhat1.shape == (B, D)
    assert hss.shape == (B, 2 * R) and xhat2.shape == (B, H)
    assert logits.shape == (B, CLS) and kld1.shape == (1, 1) and kld2.shape == (1, 1)

    # Validate against a pure-JAX reference (loose tol covers MXU vs XLA matmul precision).
    ref = _reference_forward(params, target_data, target_data_spatial, eps1, eps2)
    for got, exp in zip(outs, ref):
        assert got.shape == exp.shape
        assert jnp.allclose(got, exp, rtol=1e-2, atol=1e-2)

    print("KERNEL_OK")
</pallas_src>

<mosaic_0001>
module attributes {stable_mosaic.version = 11 : i64} {
  func.func @_tdss_kernel(%arg0: memref<4x16xf32, #tpu.memory_space<vmem>>, %arg1: memref<100x16xf32, #tpu.memory_space<vmem>>, %arg2: memref<4x32xf32, #tpu.memory_space<vmem>>, %arg3: memref<4x8xf32, #tpu.memory_space<vmem>>, %arg4: memref<16x32xf32, #tpu.memory_space<vmem>>, %arg5: memref<1x32xf32, #tpu.memory_space<vmem>>, %arg6: memref<16x32xf32, #tpu.memory_space<vmem>>, %arg7: memref<1x32xf32, #tpu.memory_space<vmem>>, %arg8: memref<32x16xf32, #tpu.memory_space<vmem>>, %arg9: memref<1x16xf32, #tpu.memory_space<vmem>>, %arg10: memref<32x8xf32, #tpu.memory_space<vmem>>, %arg11: memref<1x8xf32, #tpu.memory_space<vmem>>, %arg12: memref<32x8xf32, #tpu.memory_space<vmem>>, %arg13: memref<1x8xf32, #tpu.memory_space<vmem>>, %arg14: memref<8x32xf32, #tpu.memory_space<vmem>>, %arg15: memref<1x32xf32, #tpu.memory_space<vmem>>, %arg16: memref<16x30xf32, #tpu.memory_space<vmem>>, %arg17: memref<1x30xf32, #tpu.memory_space<vmem>>, %arg18: memref<1x30xf32, #tpu.memory_space<vmem>>, %arg19: memref<1x30xf32, #tpu.memory_space<vmem>>, %arg20: memref<9x30x10xf32, #tpu.memory_space<vmem>>, %arg21: memref<1x10xf32, #tpu.memory_space<vmem>>, %arg22: memref<1x10xf32, #tpu.memory_space<vmem>>, %arg23: memref<1x10xf32, #tpu.memory_space<vmem>>, %arg24: memref<9x36x100xf32, #tpu.memory_space<vmem>>, %arg25: memref<9x4x36xf32, #tpu.memory_space<vmem>>, %arg26: memref<9x10x8xf32, #tpu.memory_space<vmem>>, %arg27: memref<1x8xf32, #tpu.memory_space<vmem>>, %arg28: memref<8x16xf32, #tpu.memory_space<vmem>>, %arg29: memref<8x16xf32, #tpu.memory_space<vmem>>, %arg30: memref<16x4xf32, #tpu.memory_space<vmem>>, %arg31: memref<1x4xf32, #tpu.memory_space<vmem>>, %arg32: memref<4x32xf32, #tpu.memory_space<vmem>>, %arg33: memref<4x16xf32, #tpu.memory_space<vmem>>, %arg34: memref<1x1xf32, #tpu.memory_space<vmem>>, %arg35: memref<4x16xf32, #tpu.memory_space<vmem>>, %arg36: memref<4x32xf32, #tpu.memory_space<vmem>>, %arg37: memref<1x1xf32, #tpu.memory_space<vmem>>, %arg38: memref<4x4xf32, #tpu.memory_space<vmem>>) attributes {dimension_semantics = [], scalar_prefetch = 0 : i64, scratch_operands = 0 : i64, tpu.core_type = #tpu.core_type<tc>} {
    %c0 = arith.constant 0 : index
    %c0_0 = arith.constant 0 : index
    %0 = vector.load %arg0[%c0, %c0_0] : memref<4x16xf32, #tpu.memory_space<vmem>>, vector<4x16xf32>
    %c0_1 = arith.constant 0 : index
    %c0_2 = arith.constant 0 : index
    %1 = vector.load %arg4[%c0_1, %c0_2] : memref<16x32xf32, #tpu.memory_space<vmem>>, vector<16x32xf32>
    %c0_3 = arith.constant 0 : index
    %c0_4 = arith.constant 0 : index
    %2 = vector.load %arg5[%c0_3, %c0_4] : memref<1x32xf32, #tpu.memory_space<vmem>>, vector<1x32xf32>
    %c0_5 = arith.constant 0 : index
    %c0_6 = arith.constant 0 : index
    %3 = vector.load %arg6[%c0_5, %c0_6] : memref<16x32xf32, #tpu.memory_space<vmem>>, vector<16x32xf32>
    %c0_7 = arith.constant 0 : index
    %c0_8 = arith.constant 0 : index
    %4 = vector.load %arg7[%c0_7, %c0_8] : memref<1x32xf32, #tpu.memory_space<vmem>>, vector<1x32xf32>
    %c0_9 = arith.constant 0 : index
    %c0_10 = arith.constant 0 : index
    %5 = vector.load %arg8[%c0_9, %c0_10] : memref<32x16xf32, #tpu.memory_space<vmem>>, vector<32x16xf32>
    %c0_11 = arith.constant 0 : index
    %c0_12 = arith.constant 0 : index
    %6 = vector.load %arg9[%c0_11, %c0_12] : memref<1x16xf32, #tpu.memory_space<vmem>>, vector<1x16xf32>
    %c0_13 = arith.constant 0 : index
    %c0_14 = arith.constant 0 : index
    %7 = vector.load %arg2[%c0_13, %c0_14] : memref<4x32xf32, #tpu.memory_space<vmem>>, vector<4x32xf32>
    %cst = arith.constant dense<0.000000e+00> : vector<4x32xf32>
    %8 = tpu.matmul %0, %1, %cst {dimension_numbers = #tpu.dot_dimension_numbers<[1], [0], [0], [1], [0, 0, 1, 1], [], []>} : vector<4x16xf32>, vector<16x32xf32>, vector<4x32xf32> -> vector<4x32xf32>
    %9 = vector.broadcast %2 : vector<1x32xf32> to vector<4x32xf32>
    %10 = arith.addf %8, %9 : vector<4x32xf32>
    %cst_15 = arith.constant dense<0.000000e+00> : vector<4x32xf32>
    %11 = tpu.matmul %0, %3, %cst_15 {dimension_numbers = #tpu.dot_dimension_numbers<[1], [0], [0], [1], [0, 0, 1, 1], [], []>} : vector<4x16xf32>, vector<16x32xf32>, vector<4x32xf32> -> vector<4x32xf32>
    %12 = vector.broadcast %4 : vector<1x32xf32> to vector<4x32xf32>
    %13 = arith.addf %11, %12 : vector<4x32xf32>
    %cst_16 = arith.constant 5.000000e-01 : f32
    %14 = vector.broadcast %cst_16 : f32 to vector<4x32xf32>
    %15 = arith.mulf %14, %13 : vector<4x32xf32>
    %16 = math.exp %15 : vector<4x32xf32>
    %17 = arith.mulf %16, %7 : vector<4x32xf32>
    %18 = arith.addf %10, %17 : vector<4x32xf32>
    %cst_17 = arith.constant dense<0.000000e+00> : vector<4x16xf32>
    %19 = tpu.matmul %18, %5, %cst_17 {dimension_numbers = #tpu.dot_dimension_numbers<[1], [0], [0], [1], [0, 0, 1, 1], [], []>} : vector<4x32xf32>, vector<32x16xf32>, vector<4x16xf32> -> vector<4x16xf32>
    %20 = vector.broadcast %6 : vector<1x16xf32> to vector<4x16xf32>
    %21 = arith.addf %19, %20 : vector<4x16xf32>
    %22 = math.tanh %21 : vector<4x16xf32>
    %cst_18 = arith.constant 1.000000e+00 : f32
    %23 = vector.broadcast %cst_18 : f32 to vector<4x32xf32>
    %24 = arith.addf %23, %13 : vector<4x32xf32>
    %25 = arith.mulf %10, %10 : vector<4x32xf32>
    %26 = arith.subf %24, %25 : vector<4x32xf32>
    %27 = math.exp %13 : vector<4x32xf32>
    %28 = arith.subf %26, %27 : vector<4x32xf32>
    %29 = vector.shape_cast %28 : vector<4x32xf32> to vector<1x4x32xf32>
    %cst_19 = arith.constant dense<0.000000e+00> : vector<1xf32>
    %30 = vector.multi_reduction <add>, %29, %cst_19 [1, 2] : vector<1x4x32xf32> to vector<1xf32>
    %31 = vector.shape_cast %30 : vector<1xf32> to vector<1x1x1xf32>
    %32 = vector.extract %31[0, 0, 0] : f32 from vector<1x1x1xf32>
    %cst_20 = arith.constant -5.000000e-01 : f32
    %33 = arith.mulf %cst_20, %32 : f32
    %cst_21 = arith.constant 6.400000e+01 : f32
    %34 = arith.divf %33, %cst_21 : f32
    %c0_22 = arith.constant 0 : index
    %c0_23 = arith.constant 0 : index
    %35 = vector.load %arg32[%c0_22, %c0_23] : memref<4x32xf32, #tpu.memory_space<vmem>>, vector<4x32xf32>
    tpu.vector_store %arg32[%c0_22, %c0_23], %18 {strides = array<i32>} : memref<4x32xf32, #tpu.memory_space<vmem>>, vector<4x32xf32>,
    %c0_24 = arith.constant 0 : index
    %c0_25 = arith.constant 0 : index
    %36 = vector.load %arg33[%c0_24, %c0_25] : memref<4x16xf32, #tpu.memory_space<vmem>>, vector<4x16xf32>
    tpu.vector_store %arg33[%c0_24, %c0_25], %22 {strides = array<i32>} : memref<4x16xf32, #tpu.memory_space<vmem>>, vector<4x16xf32>,
    %37 = vector.broadcast %34 : f32 to vector<1x1xf32>
    %c0_26 = arith.constant 0 : index
    %c0_27 = arith.constant 0 : index
    %38 = vector.load %arg34[%c0_26, %c0_27] : memref<1x1xf32, #tpu.memory_space<vmem>>, vector<1x1xf32>
    tpu.vector_store %arg34[%c0_26, %c0_27], %37 {strides = array<i32>} : memref<1x1xf32, #tpu.memory_space<vmem>>, vector<1x1xf32>,
    %c0_28 = arith.constant 0 : index
    %c0_29 = arith.constant 0 : index
    %39 = vector.load %arg10[%c0_28, %c0_29] : memref<32x8xf32, #tpu.memory_space<vmem>>, vector<32x8xf32>
    %c0_30 = arith.constant 0 : index
    %c0_31 = arith.constant 0 : index
    %40 = vector.load %arg11[%c0_30, %c0_31] : memref<1x8xf32, #tpu.memory_space<vmem>>, vector<1x8xf32>
    %c0_32 = arith.constant 0 : index
    %c0_33 = arith.constant 0 : index
    %41 = vector.load %arg12[%c0_32, %c0_33] : memref<32x8xf32, #tpu.memory_space<vmem>>, vector<32x8xf32>
    %c0_34 = arith.constant 0 : index
    %c0_35 = arith.constant 0 : index
    %42 = vector.load %arg13[%c0_34, %c0_35] : memref<1x8xf32, #tpu.memory_space<vmem>>, vector<1x8xf32>
    %c0_36 = arith.constant 0 : index
    %c0_37 = arith.constant 0 : index
    %43 = vector.load %arg14[%c0_36, %c0_37] : memref<8x32xf32, #tpu.memory_space<vmem>>, vector<8x32xf32>
    %c0_38 = arith.constant 0 : index
    %c0_39 = arith.constant 0 : index
    %44 = vector.load %arg15[%c0_38, %c0_39] : memref<1x32xf32, #tpu.memory_space<vmem>>, vector<1x32xf32>
    %c0_40 = arith.constant 0 : index
    %c0_41 = arith.constant 0 : index
    %45 = vector.load %arg3[%c0_40, %c0_41] : memref<4x8xf32, #tpu.memory_space<vmem>>, vector<4x8xf32>
    %cst_42 = arith.constant dense<0.000000e+00> : vector<4x8xf32>
    %46 = tpu.matmul %18, %39, %cst_42 {dimension_numbers = #tpu.dot_dimension_numbers<[1], [0], [0], [1], [0, 0, 1, 1], [], []>} : vector<4x32xf32>, vector<32x8xf32>, vector<4x8xf32> -> vector<4x8xf32>
    %47 = vector.broadcast %40 : vector<1x8xf32> to vector<4x8xf32>
    %48 = arith.addf %46, %47 : vector<4x8xf32>
    %cst_43 = arith.constant dense<0.000000e+00> : vector<4x8xf32>
    %49 = tpu.matmul %18, %41, %cst_43 {dimension_numbers = #tpu.dot_dimension_numbers<[1], [0], [0], [1], [0, 0, 1, 1], [], []>} : vector<4x32xf32>, vector<32x8xf32>, vector<4x8xf32> -> vector<4x8xf32>
    %50 = vector.broadcast %42 : vector<1x8xf32> to vector<4x8xf32>
    %51 = arith.addf %49, %50 : vector<4x8xf32>
    %cst_44 = arith.constant 5.000000e-01 : f32
    %52 = vector.broadcast %cst_44 : f32 to vector<4x8xf32>
    %53 = arith.mulf %52, %51 : vector<4x8xf32>
    %54 = math.exp %53 : vector<4x8xf32>
    %55 = arith.mulf %54, %45 : vector<4x8xf32>
    %56 = arith.addf %48, %55 : vector<4x8xf32>
    %cst_45 = arith.constant dense<0.000000e+00> : vector<4x32xf32>
    %57 = tpu.matmul %56, %43, %cst_45 {dimension_numbers = #tpu.dot_dimension_numbers<[1], [0], [0], [1], [0, 0, 1, 1], [], []>} : vector<4x8xf32>, vector<8x32xf32>, vector<4x32xf32> -> vector<4x32xf32>
    %58 = vector.broadcast %44 : vector<1x32xf32> to vector<4x32xf32>
    %59 = arith.addf %57, %58 : vector<4x32xf32>
    %60 = math.tanh %59 : vector<4x32xf32>
    %cst_46 = arith.constant 1.000000e+00 : f32
    %61 = vector.broadcast %cst_46 : f32 to vector<4x8xf32>
    %62 = arith.addf %61, %51 : vector<4x8xf32>
    %63 = arith.mulf %48, %48 : vector<4x8xf32>
    %64 = arith.subf %62, %63 : vector<4x8xf32>
    %65 = math.exp %51 : vector<4x8xf32>
    %66 = arith.subf %64, %65 : vector<4x8xf32>
    %67 = vector.shape_cast %66 : vector<4x8xf32> to vector<1x4x8xf32>
    %cst_47 = arith.constant dense<0.000000e+00> : vector<1xf32>
    %68 = vector.multi_reduction <add>, %67, %cst_47 [1, 2] : vector<1x4x8xf32> to vector<1xf32>
    %69 = vector.shape_cast %68 : vector<1xf32> to vector<1x1x1xf32>
    %70 = vector.extract %69[0, 0, 0] : f32 from vector<1x1x1xf32>
    %cst_48 = arith.constant -5.000000e-01 : f32
    %71 = arith.mulf %cst_48, %70 : f32
    %cst_49 = arith.constant 1.280000e+02 : f32
    %72 = arith.divf %71, %cst_49 : f32
    %c0_50 = arith.constant 0 : index
    %c0_51 = arith.constant 0 : index
    %73 = vector.load %arg36[%c0_50, %c0_51] : memref<4x32xf32, #tpu.memory_space<vmem>>, vector<4x32xf32>
    tpu.vector_store %arg36[%c0_50, %c0_51], %60 {strides = array<i32>} : memref<4x32xf32, #tpu.memory_space<vmem>>, vector<4x32xf32>,
    %74 = vector.broadcast %72 : f32 to vector<1x1xf32>
    %c0_52 = arith.constant 0 : index
    %c0_53 = arith.constant 0 : index
    %75 = vector.load %arg37[%c0_52, %c0_53] : memref<1x1xf32, #tpu.memory_space<vmem>>, vector<1x1xf32>
    tpu.vector_store %arg37[%c0_52, %c0_53], %74 {strides = array<i32>} : memref<1x1xf32, #tpu.memory_space<vmem>>, vector<1x1xf32>,
    %76 = arith.negf %56 : vector<4x8xf32>
    %77 = math.exp %76 : vector<4x8xf32>
    %cst_54 = arith.constant 1.000000e+00 : f32
    %78 = vector.broadcast %cst_54 : f32 to vector<4x8xf32>
    %79 = arith.addf %78, %77 : vector<4x8xf32>
    %80 = arith.divf %78, %79 : vector<4x8xf32>
    %c0_55 = arith.constant 0 : index
    %c0_56 = arith.constant 0 : index
    %81 = vector.load %arg1[%c0_55, %c0_56] : memref<100x16xf32, #tpu.memory_space<vmem>>, vector<100x16xf32>
    %c0_57 = arith.constant 0 : index
    %c0_58 = arith.constant 0 : index
    %82 = vector.load %arg16[%c0_57, %c0_58] : memref<16x30xf32, #tpu.memory_space<vmem>>, vector<16x30xf32>
    %cst_59 = arith.constant dense<0.000000e+00> : vector<100x30xf32>
    %83 = tpu.matmul %81, %82, %cst_59 {dimension_numbers = #tpu.dot_dimension_numbers<[1], [0], [0], [1], [0, 0, 1, 1], [], []>} : vector<100x16xf32>, vector<16x30xf32>, vector<100x30xf32> -> vector<100x30xf32>
    %c0_60 = arith.constant 0 : index
    %c0_61 = arith.constant 0 : index
    %84 = vector.load %arg17[%c0_60, %c0_61] : memref<1x30xf32, #tpu.memory_space<vmem>>, vector<1x30xf32>
    %85 = vector.broadcast %84 : vector<1x30xf32> to vector<100x30xf32>
    %86 = arith.addf %83, %85 : vector<100x30xf32>
    %c0_62 = arith.constant 0 : index
    %c0_63 = arith.constant 0 : index
    %87 = vector.load %arg18[%c0_62, %c0_63] : memref<1x30xf32, #tpu.memory_space<vmem>>, vector<1x30xf32>
    %c0_64 = arith.constant 0 : index
    %c0_65 = arith.constant 0 : index
    %88 = vector.load %arg19[%c0_64, %c0_65] : memref<1x30xf32, #tpu.memory_space<vmem>>, vector<1x30xf32>
    %cst_66 = arith.constant dense<0.000000e+00> : vector<30xf32>
    %89 = vector.multi_reduction <add>, %86, %cst_66 [0] : vector<100x30xf32> to vector<30xf32>
    %90 = vector.shape_cast %89 : vector<30xf32> to vector<1x30xf32>
    %cst_67 = arith.constant 1.000000e+02 : f32
    %91 = vector.broadcast %cst_67 : f32 to vector<1x30xf32>
    %92 = arith.divf %90, %91 : vector<1x30xf32>
    %93 = vector.broadcast %92 : vector<1x30xf32> to vector<100x30xf32>
    %94 = arith.subf %86, %93 : vector<100x30xf32>
    %95 = arith.mulf %94, %94 : vector<100x30xf32>
    %cst_68 = arith.constant dense<0.000000e+00> : vector<30xf32>
    %96 = vector.multi_reduction <add>, %95, %cst_68 [0] : vector<100x30xf32> to vector<30xf32>
    %97 = vector.shape_cast %96 : vector<30xf32> to vector<1x30xf32>
    %cst_69 = arith.constant 1.000000e+02 : f32
    %98 = vector.broadcast %cst_69 : f32 to vector<1x30xf32>
    %99 = arith.divf %97, %98 : vector<1x30xf32>
    %100 = vector.broadcast %92 : vector<1x30xf32> to vector<100x30xf32>
    %101 = arith.subf %86, %100 : vector<100x30xf32>
    %cst_70 = arith.constant 9.99999974E-6 : f32
    %102 = vector.broadcast %cst_70 : f32 to vector<1x30xf32>
    %103 = arith.addf %99, %102 : vector<1x30xf32>
    %104 = math.rsqrt %103 : vector<1x30xf32>
    %105 = vector.broadcast %104 : vector<1x30xf32> to vector<100x30xf32>
    %106 = arith.mulf %101, %105 : vector<100x30xf32>
    %107 = vector.broadcast %87 : vector<1x30xf32> to vector<100x30xf32>
    %108 = arith.mulf %106, %107 : vector<100x30xf32>
    %109 = vector.broadcast %88 : vector<1x30xf32> to vector<100x30xf32>
    %110 = arith.addf %108, %109 : vector<100x30xf32>
    %cst_71 = arith.constant 0.000000e+00 : f32
    %111 = vector.broadcast %cst_71 : f32 to vector<100x30xf32>
    %112 = arith.maximumf %110, %111 : vector<100x30xf32>
    %c0_72 = arith.constant 0 : index
    %c0_73 = arith.constant 0 : index
    %c0_74 = arith.constant 0 : index
    %113 = vector.load %arg24[%c0_72, %c0_73, %c0_74] : memref<9x36x100xf32, #tpu.memory_space<vmem>>, vector<1x36x100xf32>
    %114 = vector.shape_cast %113 : vector<1x36x100xf32> to vector<36x100xf32>
    %c0_75 = arith.constant 0 : index
    %c0_76 = arith.constant 0 : index
    %c0_77 = arith.constant 0 : index
    %115 = vector.load %arg20[%c0_75, %c0_76, %c0_77] : memref<9x30x10xf32, #tpu.memory_space<vmem>>, vector<1x30x10xf32>
    %116 = vector.shape_cast %115 : vector<1x30x10xf32> to vector<30x10xf32>
    %cst_78 = arith.constant dense<0.000000e+00> : vector<100x10xf32>
    %117 = tpu.matmul %112, %116, %cst_78 {dimension_numbers = #tpu.dot_dimension_numbers<[1], [0], [0], [1], [0, 0, 1, 1], [], []>} : vector<100x30xf32>, vector<30x10xf32>, vector<100x10xf32> -> vector<100x10xf32>
    %cst_79 = arith.constant dense<0.000000e+00> : vector<36x10xf32>
    %118 = tpu.matmul %114, %117, %cst_79 {dimension_numbers = #tpu.dot_dimension_numbers<[1], [0], [0], [1], [0, 0, 1, 1], [], []>} : vector<36x100xf32>, vector<100x10xf32>, vector<36x10xf32> -> vector<36x10xf32>
    %c1 = arith.constant 1 : index
    %c0_80 = arith.constant 0 : index
    %c0_81 = arith.constant 0 : index
    %119 = vector.load %arg24[%c1, %c0_80, %c0_81] : memref<9x36x100xf32, #tpu.memory_space<vmem>>, vector<1x36x100xf32>
    %120 = vector.shape_cast %119 : vector<1x36x100xf32> to vector<36x100xf32>
    %c1_82 = arith.constant 1 : index
    %c0_83 = arith.constant 0 : index
    %c0_84 = arith.constant 0 : index
    %121 = vector.load %arg20[%c1_82, %c0_83, %c0_84] : memref<9x30x10xf32, #tpu.memory_space<vmem>>, vector<1x30x10xf32>
    %122 = vector.shape_cast %121 : vector<1x30x10xf32> to vector<30x10xf32>
    %cst_85 = arith.constant dense<0.000000e+00> : vector<100x10xf32>
    %123 = tpu.matmul %112, %122, %cst_85 {dimension_numbers = #tpu.dot_dimension_numbers<[1], [0], [0], [1], [0, 0, 1, 1], [], []>} : vector<100x30xf32>, vector<30x10xf32>, vector<100x10xf32> -> vector<100x10xf32>
    %cst_86 = arith.constant dense<0.000000e+00> : vector<36x10xf32>
    %124 = tpu.matmul %120, %123, %cst_86 {dimension_numbers = #tpu.dot_dimension_numbers<[1], [0], [0], [1], [0, 0, 1, 1], [], []>} : vector<36x100xf32>, vector<100x10xf32>, vector<36x10xf32> -> vector<36x10xf32>
    %125 = arith.addf %118, %124 : vector<36x10xf32>
    %c2 = arith.constant 2 : index
    %c0_87 = arith.constant 0 : index
    %c0_88 = arith.constant 0 : index
    %126 = vector.load %arg24[%c2, %c0_87, %c0_88] : memref<9x36x100xf32, #tpu.memory_space<vmem>>, vector<1x36x100xf32>
    %127 = vector.shape_cast %126 : vector<1x36x100xf32> to vector<36x100xf32>
    %c2_89 = arith.constant 2 : index
    %c0_90 = arith.constant 0 : index
    %c0_91 = arith.constant 0 : index
    %128 = vector.load %arg20[%c2_89, %c0_90, %c0_91] : memref<9x30x10xf32, #tpu.memory_space<vmem>>, vector<1x30x10xf32>
    %129 = vector.shape_cast %128 : vector<1x30x10xf32> to vector<30x10xf32>
    %cst_92 = arith.constant dense<0.000000e+00> : vector<100x10xf32>
    %130 = tpu.matmul %112, %129, %cst_92 {dimension_numbers = #tpu.dot_dimension_numbers<[1], [0], [0], [1], [0, 0, 1, 1], [], []>} : vector<100x30xf32>, vector<30x10xf32>, vector<100x10xf32> -> vector<100x10xf32>
    %cst_93 = arith.constant dense<0.000000e+00> : vector<36x10xf32>
    %131 = tpu.matmul %127, %130, %cst_93 {dimension_numbers = #tpu.dot_dimension_numbers<[1], [0], [0], [1], [0, 0, 1, 1], [], []>} : vector<36x100xf32>, vector<100x10xf32>, vector<36x10xf32> -> vector<36x10xf32>
    %132 = arith.addf %125, %131 : vector<36x10xf32>
    %c3 = arith.constant 3 : index
    %c0_94 = arith.constant 0 : index
    %c0_95 = arith.constant 0 : index
    %133 = vector.load %arg24[%c3, %c0_94, %c0_95] : memref<9x36x100xf32, #tpu.memory_space<vmem>>, vector<1x36x100xf32>
    %134 = vector.shape_cast %133 : vector<1x36x100xf32> to vector<36x100xf32>
    %c3_96 = arith.constant 3 : index
    %c0_97 = arith.constant 0 : index
    %c0_98 = arith.constant 0 : index
    %135 = vector.load %arg20[%c3_96, %c0_97, %c0_98] : memref<9x30x10xf32, #tpu.memory_space<vmem>>, vector<1x30x10xf32>
    %136 = vector.shape_cast %135 : vector<1x30x10xf32> to vector<30x10xf32>
    %cst_99 = arith.constant dense<0.000000e+00> : vector<100x10xf32>
    %137 = tpu.matmul %112, %136, %cst_99 {dimension_numbers = #tpu.dot_dimension_numbers<[1], [0], [0], [1], [0, 0, 1, 1], [], []>} : vector<100x30xf32>, vector<30x10xf32>, vector<100x10xf32> -> vector<100x10xf32>
    %cst_100 = arith.constant dense<0.000000e+00> : vector<36x10xf32>
    %138 = tpu.matmul %134, %137, %cst_100 {dimension_numbers = #tpu.dot_dimension_numbers<[1], [0], [0], [1], [0, 0, 1, 1], [], []>} : vector<36x100xf32>, vector<100x10xf32>, vector<36x10xf32> -> vector<36x10xf32>
    %139 = arith.addf %132, %138 : vector<36x10xf32>
    %c4 = arith.constant 4 : index
    %c0_101 = arith.constant 0 : index
    %c0_102 = arith.constant 0 : index
    %140 = vector.load %arg24[%c4, %c0_101, %c0_102] : memref<9x36x100xf32, #tpu.memory_space<vmem>>, vector<1x36x100xf32>
    %141 = vector.shape_cast %140 : vector<1x36x100xf32> to vector<36x100xf32>
    %c4_103 = arith.constant 4 : index
    %c0_104 = arith.constant 0 : index
    %c0_105 = arith.constant 0 : index
    %142 = vector.load %arg20[%c4_103, %c0_104, %c0_105] : memref<9x30x10xf32, #tpu.memory_space<vmem>>, vector<1x30x10xf32>
    %143 = vector.shape_cast %142 : vector<1x30x10xf32> to vector<30x10xf32>
    %cst_106 = arith.constant dense<0.000000e+00> : vector<100x10xf32>
    %144 = tpu.matmul %112, %143, %cst_106 {dimension_numbers = #tpu.dot_dimension_numbers<[1], [0], [0], [1], [0, 0, 1, 1], [], []>} : vector<100x30xf32>, vector<30x10xf32>, vector<100x10xf32> -> vector<100x10xf32>
    %cst_107 = arith.constant dense<0.000000e+00> : vector<36x10xf32>
    %145 = tpu.matmul %141, %144, %cst_107 {dimension_numbers = #tpu.dot_dimension_numbers<[1], [0], [0], [1], [0, 0, 1, 1], [], []>} : vector<36x100xf32>, vector<100x10xf32>, vector<36x10xf32> -> vector<36x10xf32>
    %146 = arith.addf %139, %145 : vector<36x10xf32>
    %c5 = arith.constant 5 : index
    %c0_108 = arith.constant 0 : index
    %c0_109 = arith.constant 0 : index
    %147 = vector.load %arg24[%c5, %c0_108, %c0_109] : memref<9x36x100xf32, #tpu.memory_space<vmem>>, vector<1x36x100xf32>
    %148 = vector.shape_cast %147 : vector<1x36x100xf32> to vector<36x100xf32>
    %c5_110 = arith.constant 5 : index
    %c0_111 = arith.constant 0 : index
    %c0_112 = arith.constant 0 : index
    %149 = vector.load %arg20[%c5_110, %c0_111, %c0_112] : memref<9x30x10xf32, #tpu.memory_space<vmem>>, vector<1x30x10xf32>
    %150 = vector.shape_cast %149 : vector<1x30x10xf32> to vector<30x10xf32>
    %cst_113 = arith.constant dense<0.000000e+00> : vector<100x10xf32>
    %151 = tpu.matmul %112, %150, %cst_113 {dimension_numbers = #tpu.dot_dimension_numbers<[1], [0], [0], [1], [0, 0, 1, 1], [], []>} : vector<100x30xf32>, vector<30x10xf32>, vector<100x10xf32> -> vector<100x10xf32>
    %cst_114 = arith.constant dense<0.000000e+00> : vector<36x10xf32>
    %152 = tpu.matmul %148, %151, %cst_114 {dimension_numbers = #tpu.dot_dimension_numbers<[1], [0], [0], [1], [0, 0, 1, 1], [], []>} : vector<36x100xf32>, vector<100x10xf32>, vector<36x10xf32> -> vector<36x10xf32>
    %153 = arith.addf %146, %152 : vector<36x10xf32>
    %c6 = arith.constant 6 : index
    %c0_115 = arith.constant 0 : index
    %c0_116 = arith.constant 0 : index
    %154 = vector.load %arg24[%c6, %c0_115, %c0_116] : memref<9x36x100xf32, #tpu.memory_space<vmem>>, vector<1x36x100xf32>
    %155 = vector.shape_cast %154 : vector<1x36x100xf32> to vector<36x100xf32>
    %c6_117 = arith.constant 6 : index
    %c0_118 = arith.constant 0 : index
    %c0_119 = arith.constant 0 : index
    %156 = vector.load %arg20[%c6_117, %c0_118, %c0_119] : memref<9x30x10xf32, #tpu.memory_space<vmem>>, vector<1x30x10xf32>
    %157 = vector.shape_cast %156 : vector<1x30x10xf32> to vector<30x10xf32>
    %cst_120 = arith.constant dense<0.000000e+00> : vector<100x10xf32>
    %158 = tpu.matmul %112, %157, %cst_120 {dimension_numbers = #tpu.dot_dimension_numbers<[1], [0], [0], [1], [0, 0, 1, 1], [], []>} : vector<100x30xf32>, vector<30x10xf32>, vector<100x10xf32> -> vector<100x10xf32>
    %cst_121 = arith.constant dense<0.000000e+00> : vector<36x10xf32>
    %159 = tpu.matmul %155, %158, %cst_121 {dimension_numbers = #tpu.dot_dimension_numbers<[1], [0], [0], [1], [0, 0, 1, 1], [], []>} : vector<36x100xf32>, vector<100x10xf32>, vector<36x10xf32> -> vector<36x10xf32>
    %160 = arith.addf %153, %159 : vector<36x10xf32>
    %c7 = arith.constant 7 : index
    %c0_122 = arith.constant 0 : index
    %c0_123 = arith.constant 0 : index
    %161 = vector.load %arg24[%c7, %c0_122, %c0_123] : memref<9x36x100xf32, #tpu.memory_space<vmem>>, vector<1x36x100xf32>
    %162 = vector.shape_cast %161 : vector<1x36x100xf32> to vector<36x100xf32>
    %c7_124 = arith.constant 7 : index
    %c0_125 = arith.constant 0 : index
    %c0_126 = arith.constant 0 : index
    %163 = vector.load %arg20[%c7_124, %c0_125, %c0_126] : memref<9x30x10xf32, #tpu.memory_space<vmem>>, vector<1x30x10xf32>
    %164 = vector.shape_cast %163 : vector<1x30x10xf32> to vector<30x10xf32>
    %cst_127 = arith.constant dense<0.000000e+00> : vector<100x10xf32>
    %165 = tpu.matmul %112, %164, %cst_127 {dimension_numbers = #tpu.dot_dimension_numbers<[1], [0], [0], [1], [0, 0, 1, 1], [], []>} : vector<100x30xf32>, vector<30x10xf32>, vector<100x10xf32> -> vector<100x10xf32>
    %cst_128 = arith.constant dense<0.000000e+00> : vector<36x10xf32>
    %166 = tpu.matmul %162, %165, %cst_128 {dimension_numbers = #tpu.dot_dimension_numbers<[1], [0], [0], [1], [0, 0, 1, 1], [], []>} : vector<36x100xf32>, vector<100x10xf32>, vector<36x10xf32> -> vector<36x10xf32>
    %167 = arith.addf %160, %166 : vector<36x10xf32>
    %c8 = arith.constant 8 : index
    %c0_129 = arith.constant 0 : index
    %c0_130 = arith.constant 0 : index
    %168 = vector.load %arg24[%c8, %c0_129, %c0_130] : memref<9x36x100xf32, #tpu.memory_space<vmem>>, vector<1x36x100xf32>
    %169 = vector.shape_cast %168 : vector<1x36x100xf32> to vector<36x100xf32>
    %c8_131 = arith.constant 8 : index
    %c0_132 = arith.constant 0 : index
    %c0_133 = arith.constant 0 : index
    %170 = vector.load %arg20[%c8_131, %c0_132, %c0_133] : memref<9x30x10xf32, #tpu.memory_space<vmem>>, vector<1x30x10xf32>
    %171 = vector.shape_cast %170 : vector<1x30x10xf32> to vector<30x10xf32>
    %cst_134 = arith.constant dense<0.000000e+00> : vector<100x10xf32>
    %172 = tpu.matmul %112, %171, %cst_134 {dimension_numbers = #tpu.dot_dimension_numbers<[1], [0], [0], [1], [0, 0, 1, 1], [], []>} : vector<100x30xf32>, vector<30x10xf32>, vector<100x10xf32> -> vector<100x10xf32>
    %cst_135 = arith.constant dense<0.000000e+00> : vector<36x10xf32>
    %173 = tpu.matmul %169, %172, %cst_135 {dimension_numbers = #tpu.dot_dimension_numbers<[1], [0], [0], [1], [0, 0, 1, 1], [], []>} : vector<36x100xf32>, vector<100x10xf32>, vector<36x10xf32> -> vector<36x10xf32>
    %174 = arith.addf %167, %173 : vector<36x10xf32>
    %c0_136 = arith.constant 0 : index
    %c0_137 = arith.constant 0 : index
    %175 = vector.load %arg21[%c0_136, %c0_137] : memref<1x10xf32, #tpu.memory_space<vmem>>, vector<1x10xf32>
    %176 = vector.broadcast %175 : vector<1x10xf32> to vector<36x10xf32>
    %177 = arith.addf %174, %176 : vector<36x10xf32>
    %c0_138 = arith.constant 0 : index
    %c0_139 = arith.constant 0 : index
    %178 = vector.load %arg22[%c0_138, %c0_139] : memref<1x10xf32, #tpu.memory_space<vmem>>, vector<1x10xf32>
    %c0_140 = arith.constant 0 : index
    %c0_141 = arith.constant 0 : index
    %179 = vector.load %arg23[%c0_140, %c0_141] : memref<1x10xf32, #tpu.memory_space<vmem>>, vector<1x10xf32>
    %cst_142 = arith.constant dense<0.000000e+00> : vector<10xf32>
    %180 = vector.multi_reduction <add>, %177, %cst_142 [0] : vector<36x10xf32> to vector<10xf32>
    %181 = vector.shape_cast %180 : vector<10xf32> to vector<1x10xf32>
    %cst_143 = arith.constant 3.600000e+01 : f32
    %182 = vector.broadcast %cst_143 : f32 to vector<1x10xf32>
    %183 = arith.divf %181, %182 : vector<1x10xf32>
    %184 = vector.broadcast %183 : vector<1x10xf32> to vector<36x10xf32>
    %185 = arith.subf %177, %184 : vector<36x10xf32>
    %186 = arith.mulf %185, %185 : vector<36x10xf32>
    %cst_144 = arith.constant dense<0.000000e+00> : vector<10xf32>
    %187 = vector.multi_reduction <add>, %186, %cst_144 [0] : vector<36x10xf32> to vector<10xf32>
    %188 = vector.shape_cast %187 : vector<10xf32> to vector<1x10xf32>
    %cst_145 = arith.constant 3.600000e+01 : f32
    %189 = vector.broadcast %cst_145 : f32 to vector<1x10xf32>
    %190 = arith.divf %188, %189 : vector<1x10xf32>
    %191 = vector.broadcast %183 : vector<1x10xf32> to vector<36x10xf32>
    %192 = arith.subf %177, %191 : vector<36x10xf32>
    %cst_146 = arith.constant 9.99999974E-6 : f32
    %193 = vector.broadcast %cst_146 : f32 to vector<1x10xf32>
    %194 = arith.addf %190, %193 : vector<1x10xf32>
    %195 = math.rsqrt %194 : vector<1x10xf32>
    %196 = vector.broadcast %195 : vector<1x10xf32> to vector<36x10xf32>
    %197 = arith.mulf %192, %196 : vector<36x10xf32>
    %198 = vector.broadcast %178 : vector<1x10xf32> to vector<36x10xf32>
    %199 = arith.mulf %197, %198 : vector<36x10xf32>
    %200 = vector.broadcast %179 : vector<1x10xf32> to vector<36x10xf32>
    %201 = arith.addf %199, %200 : vector<36x10xf32>
    %cst_147 = arith.constant 0.000000e+00 : f32
    %202 = vector.broadcast %cst_147 : f32 to vector<36x10xf32>
    %203 = arith.maximumf %201, %202 : vector<36x10xf32>
    %c0_148 = arith.constant 0 : index
    %c0_149 = arith.constant 0 : index
    %c0_150 = arith.constant 0 : index
    %204 = vector.load %arg25[%c0_148, %c0_149, %c0_150] : memref<9x4x36xf32, #tpu.memory_space<vmem>>, vector<1x4x36xf32>
    %205 = vector.shape_cast %204 : vector<1x4x36xf32> to vector<4x36xf32>
    %c0_151 = arith.constant 0 : index
    %c0_152 = arith.constant 0 : index
    %c0_153 = arith.constant 0 : index
    %206 = vector.load %arg26[%c0_151, %c0_152, %c0_153] : memref<9x10x8xf32, #tpu.memory_space<vmem>>, vector<1x10x8xf32>
    %207 = vector.shape_cast %206 : vector<1x10x8xf32> to vector<10x8xf32>
    %cst_154 = arith.constant dense<0.000000e+00> : vector<36x8xf32>
    %208 = tpu.matmul %203, %207, %cst_154 {dimension_numbers = #tpu.dot_dimension_numbers<[1], [0], [0], [1], [0, 0, 1, 1], [], []>} : vector<36x10xf32>, vector<10x8xf32>, vector<36x8xf32> -> vector<36x8xf32>
    %cst_155 = arith.constant dense<0.000000e+00> : vector<4x8xf32>
    %209 = tpu.matmul %205, %208, %cst_155 {dimension_numbers = #tpu.dot_dimension_numbers<[1], [0], [0], [1], [0, 0, 1, 1], [], []>} : vector<4x36xf32>, vector<36x8xf32>, vector<4x8xf32> -> vector<4x8xf32>
    %c1_156 = arith.constant 1 : index
    %c0_157 = arith.constant 0 : index
    %c0_158 = arith.constant 0 : index
    %210 = vector.load %arg25[%c1_156, %c0_157, %c0_158] : memref<9x4x36xf32, #tpu.memory_space<vmem>>, vector<1x4x36xf32>
    %211 = vector.shape_cast %210 : vector<1x4x36xf32> to vector<4x36xf32>
    %c1_159 = arith.constant 1 : index
    %c0_160 = arith.constant 0 : index
    %c0_161 = arith.constant 0 : index
    %212 = vector.load %arg26[%c1_159, %c0_160, %c0_161] : memref<9x10x8xf32, #tpu.memory_space<vmem>>, vector<1x10x8xf32>
    %213 = vector.shape_cast %212 : vector<1x10x8xf32> to vector<10x8xf32>
    %cst_162 = arith.constant dense<0.000000e+00> : vector<36x8xf32>
    %214 = tpu.matmul %203, %213, %cst_162 {dimension_numbers = #tpu.dot_dimension_numbers<[1], [0], [0], [1], [0, 0, 1, 1], [], []>} : vector<36x10xf32>, vector<10x8xf32>, vector<36x8xf32> -> vector<36x8xf32>
    %cst_163 = arith.constant dense<0.000000e+00> : vector<4x8xf32>
    %215 = tpu.matmul %211, %214, %cst_163 {dimension_numbers = #tpu.dot_dimension_numbers<[1], [0], [0], [1], [0, 0, 1, 1], [], []>} : vector<4x36xf32>, vector<36x8xf32>, vector<4x8xf32> -> vector<4x8xf32>
    %216 = arith.addf %209, %215 : vector<4x8xf32>
    %c2_164 = arith.constant 2 : index
    %c0_165 = arith.constant 0 : index
    %c0_166 = arith.constant 0 : index
    %217 = vector.load %arg25[%c2_164, %c0_165, %c0_166] : memref<9x4x36xf32, #tpu.memory_space<vmem>>, vector<1x4x36xf32>
    %218 = vector.shape_cast %217 : vector<1x4x36xf32> to vector<4x36xf32>
    %c2_167 = arith.constant 2 : index
    %c0_168 = arith.constant 0 : index
    %c0_169 = arith.constant 0 : index
    %219 = vector.load %arg26[%c2_167, %c0_168, %c0_169] : memref<9x10x8xf32, #tpu.memory_space<vmem>>, vector<1x10x8xf32>
    %220 = vector.shape_cast %219 : vector<1x10x8xf32> to vector<10x8xf32>
    %cst_170 = arith.constant dense<0.000000e+00> : vector<36x8xf32>
    %221 = tpu.matmul %203, %220, %cst_170 {dimension_numbers = #tpu.dot_dimension_numbers<[1], [0], [0], [1], [0, 0, 1, 1], [], []>} : vector<36x10xf32>, vector<10x8xf32>, vector<36x8xf32> -> vector<36x8xf32>
    %cst_171 = arith.constant dense<0.000000e+00> : vector<4x8xf32>
    %222 = tpu.matmul %218, %221, %cst_171 {dimension_numbers = #tpu.dot_dimension_numbers<[1], [0], [0], [1], [0, 0, 1, 1], [], []>} : vector<4x36xf32>, vector<36x8xf32>, vector<4x8xf32> -> vector<4x8xf32>
    %223 = arith.addf %216, %222 : vector<4x8xf32>
    %c3_172 = arith.constant 3 : index
    %c0_173 = arith.constant 0 : index
    %c0_174 = arith.constant 0 : index
    %224 = vector.load %arg25[%c3_172, %c0_173, %c0_174] : memref<9x4x36xf32, #tpu.memory_space<vmem>>, vector<1x4x36xf32>
    %225 = vector.shape_cast %224 : vector<1x4x36xf32> to vector<4x36xf32>
    %c3_175 = arith.constant 3 : index
    %c0_176 = arith.constant 0 : index
    %c0_177 = arith.constant 0 : index
    %226 = vector.load %arg26[%c3_175, %c0_176, %c0_177] : memref<9x10x8xf32, #tpu.memory_space<vmem>>, vector<1x10x8xf32>
    %227 = vector.shape_cast %226 : vector<1x10x8xf32> to vector<10x8xf32>
    %cst_178 = arith.constant dense<0.000000e+00> : vector<36x8xf32>
    %228 = tpu.matmul %203, %227, %cst_178 {dimension_numbers = #tpu.dot_dimension_numbers<[1], [0], [0], [1], [0, 0, 1, 1], [], []>} : vector<36x10xf32>, vector<10x8xf32>, vector<36x8xf32> -> vector<36x8xf32>
    %cst_179 = arith.constant dense<0.000000e+00> : vector<4x8xf32>
    %229 = tpu.matmul %225, %228, %cst_179 {dimension_numbers = #tpu.dot_dimension_numbers<[1], [0], [0], [1], [0, 0, 1, 1], [], []>} : vector<4x36xf32>, vector<36x8xf32>, vector<4x8xf32> -> vector<4x8xf32>
    %230 = arith.addf %223, %229 : vector<4x8xf32>
    %c4_180 = arith.constant 4 : index
    %c0_181 = arith.constant 0 : index
    %c0_182 = arith.constant 0 : index
    %231 = vector.load %arg25[%c4_180, %c0_181, %c0_182] : memref<9x4x36xf32, #tpu.memory_space<vmem>>, vector<1x4x36xf32>
    %232 = vector.shape_cast %231 : vector<1x4x36xf32> to vector<4x36xf32>
    %c4_183 = arith.constant 4 : index
    %c0_184 = arith.constant 0 : index
    %c0_185 = arith.constant 0 : index
    %233 = vector.load %arg26[%c4_183, %c0_184, %c0_185] : memref<9x10x8xf32, #tpu.memory_space<vmem>>, vector<1x10x8xf32>
    %234 = vector.shape_cast %233 : vector<1x10x8xf32> to vector<10x8xf32>
    %cst_186 = arith.constant dense<0.000000e+00> : vector<36x8xf32>
    %235 = tpu.matmul %203, %234, %cst_186 {dimension_numbers = #tpu.dot_dimension_numbers<[1], [0], [0], [1], [0, 0, 1, 1], [], []>} : vector<36x10xf32>, vector<10x8xf32>, vector<36x8xf32> -> vector<36x8xf32>
    %cst_187 = arith.constant dense<0.000000e+00> : vector<4x8xf32>
    %236 = tpu.matmul %232, %235, %cst_187 {dimension_numbers = #tpu.dot_dimension_numbers<[1], [0], [0], [1], [0, 0, 1, 1], [], []>} : vector<4x36xf32>, vector<36x8xf32>, vector<4x8xf32> -> vector<4x8xf32>
    %237 = arith.addf %230, %236 : vector<4x8xf32>
    %c5_188 = arith.constant 5 : index
    %c0_189 = arith.constant 0 : index
    %c0_190 = arith.constant 0 : index
    %238 = vector.load %arg25[%c5_188, %c0_189, %c0_190] : memref<9x4x36xf32, #tpu.memory_space<vmem>>, vector<1x4x36xf32>
    %239 = vector.shape_cast %238 : vector<1x4x36xf32> to vector<4x36xf32>
    %c5_191 = arith.constant 5 : index
    %c0_192 = arith.constant 0 : index
    %c0_193 = arith.constant 0 : index
    %240 = vector.load %arg26[%c5_191, %c0_192, %c0_193] : memref<9x10x8xf32, #tpu.memory_space<vmem>>, vector<1x10x8xf32>
    %241 = vector.shape_cast %240 : vector<1x10x8xf32> to vector<10x8xf32>
    %cst_194 = arith.constant dense<0.000000e+00> : vector<36x8xf32>
    %242 = tpu.matmul %203, %241, %cst_194 {dimension_numbers = #tpu.dot_dimension_numbers<[1], [0], [0], [1], [0, 0, 1, 1], [], []>} : vector<36x10xf32>, vector<10x8xf32>, vector<36x8xf32> -> vector<36x8xf32>
    %cst_195 = arith.constant dense<0.000000e+00> : vector<4x8xf32>
    %243 = tpu.matmul %239, %242, %cst_195 {dimension_numbers = #tpu.dot_dimension_numbers<[1], [0], [0], [1], [0, 0, 1, 1], [], []>} : vector<4x36xf32>, vector<36x8xf32>, vector<4x8xf32> -> vector<4x8xf32>
    %244 = arith.addf %237, %243 : vector<4x8xf32>
    %c6_196 = arith.constant 6 : index
    %c0_197 = arith.constant 0 : index
    %c0_198 = arith.constant 0 : index
    %245 = vector.load %arg25[%c6_196, %c0_197, %c0_198] : memref<9x4x36xf32, #tpu.memory_space<vmem>>, vector<1x4x36xf32>
    %246 = vector.shape_cast %245 : vector<1x4x36xf32> to vector<4x36xf32>
    %c6_199 = arith.constant 6 : index
    %c0_200 = arith.constant 0 : index
    %c0_201 = arith.constant 0 : index
    %247 = vector.load %arg26[%c6_199, %c0_200, %c0_201] : memref<9x10x8xf32, #tpu.memory_space<vmem>>, vector<1x10x8xf32>
    %248 = vector.shape_cast %247 : vector<1x10x8xf32> to vector<10x8xf32>
    %cst_202 = arith.constant dense<0.000000e+00> : vector<36x8xf32>
    %249 = tpu.matmul %203, %248, %cst_202 {dimension_numbers = #tpu.dot_dimension_numbers<[1], [0], [0], [1], [0, 0, 1, 1], [], []>} : vector<36x10xf32>, vector<10x8xf32>, vector<36x8xf32> -> vector<36x8xf32>
    %cst_203 = arith.constant dense<0.000000e+00> : vector<4x8xf32>
    %250 = tpu.matmul %246, %249, %cst_203 {dimension_numbers = #tpu.dot_dimension_numbers<[1], [0], [0], [1], [0, 0, 1, 1], [], []>} : vector<4x36xf32>, vector<36x8xf32>, vector<4x8xf32> -> vector<4x8xf32>
    %251 = arith.addf %244, %250 : vector<4x8xf32>
    %c7_204 = arith.constant 7 : index
    %c0_205 = arith.constant 0 : index
    %c0_206 = arith.constant 0 : index
    %252 = vector.load %arg25[%c7_204, %c0_205, %c0_206] : memref<9x4x36xf32, #tpu.memory_space<vmem>>, vector<1x4x36xf32>
    %253 = vector.shape_cast %252 : vector<1x4x36xf32> to vector<4x36xf32>
    %c7_207 = arith.constant 7 : index
    %c0_208 = arith.constant 0 : index
    %c0_209 = arith.constant 0 : index
    %254 = vector.load %arg26[%c7_207, %c0_208, %c0_209] : memref<9x10x8xf32, #tpu.memory_space<vmem>>, vector<1x10x8xf32>
    %255 = vector.shape_cast %254 : vector<1x10x8xf32> to vector<10x8xf32>
    %cst_210 = arith.constant dense<0.000000e+00> : vector<36x8xf32>
    %256 = tpu.matmul %203, %255, %cst_210 {dimension_numbers = #tpu.dot_dimension_numbers<[1], [0], [0], [1], [0, 0, 1, 1], [], []>} : vector<36x10xf32>, vector<10x8xf32>, vector<36x8xf32> -> vector<36x8xf32>
    %cst_211 = arith.constant dense<0.000000e+00> : vector<4x8xf32>
    %257 = tpu.matmul %253, %256, %cst_211 {dimension_numbers = #tpu.dot_dimension_numbers<[1], [0], [0], [1], [0, 0, 1, 1], [], []>} : vector<4x36xf32>, vector<36x8xf32>, vector<4x8xf32> -> vector<4x8xf32>
    %258 = arith.addf %251, %257 : vector<4x8xf32>
    %c8_212 = arith.constant 8 : index
    %c0_213 = arith.constant 0 : index
    %c0_214 = arith.constant 0 : index
    %259 = vector.load %arg25[%c8_212, %c0_213, %c0_214] : memref<9x4x36xf32, #tpu.memory_space<vmem>>, vector<1x4x36xf32>
    %260 = vector.shape_cast %259 : vector<1x4x36xf32> to vector<4x36xf32>
    %c8_215 = arith.constant 8 : index
    %c0_216 = arith.constant 0 : index
    %c0_217 = arith.constant 0 : index
    %261 = vector.load %arg26[%c8_215, %c0_216, %c0_217] : memref<9x10x8xf32, #tpu.memory_space<vmem>>, vector<1x10x8xf32>
    %262 = vector.shape_cast %261 : vector<1x10x8xf32> to vector<10x8xf32>
    %cst_218 = arith.constant dense<0.000000e+00> : vector<36x8xf32>
    %263 = tpu.matmul %203, %262, %cst_218 {dimension_numbers = #tpu.dot_dimension_numbers<[1], [0], [0], [1], [0, 0, 1, 1], [], []>} : vector<36x10xf32>, vector<10x8xf32>, vector<36x8xf32> -> vector<36x8xf32>
    %cst_219 = arith.constant dense<0.000000e+00> : vector<4x8xf32>
    %264 = tpu.matmul %260, %263, %cst_219 {dimension_numbers = #tpu.dot_dimension_numbers<[1], [0], [0], [1], [0, 0, 1, 1], [], []>} : vector<4x36xf32>, vector<36x8xf32>, vector<4x8xf32> -> vector<4x8xf32>
    %265 = arith.addf %258, %264 : vector<4x8xf32>
    %c0_220 = arith.constant 0 : index
    %c0_221 = arith.constant 0 : index
    %266 = vector.load %arg27[%c0_220, %c0_221] : memref<1x8xf32, #tpu.memory_space<vmem>>, vector<1x8xf32>
    %267 = vector.broadcast %266 : vector<1x8xf32> to vector<4x8xf32>
    %268 = arith.addf %265, %267 : vector<4x8xf32>
    %269 = arith.negf %268 : vector<4x8xf32>
    %270 = math.exp %269 : vector<4x8xf32>
    %cst_222 = arith.constant 1.000000e+00 : f32
    %271 = vector.broadcast %cst_222 : f32 to vector<4x8xf32>
    %272 = arith.addf %271, %270 : vector<4x8xf32>
    %273 = arith.divf %271, %272 : vector<4x8xf32>
    %c0_223 = arith.constant 0 : index
    %c0_224 = arith.constant 0 : index
    %274 = vector.load %arg28[%c0_223, %c0_224] : memref<8x16xf32, #tpu.memory_space<vmem>>, vector<8x16xf32>
    %cst_225 = arith.constant dense<0.000000e+00> : vector<4x16xf32>
    %275 = tpu.matmul %80, %274, %cst_225 {dimension_numbers = #tpu.dot_dimension_numbers<[1], [0], [0], [1], [0, 0, 1, 1], [], []>} : vector<4x8xf32>, vector<8x16xf32>, vector<4x16xf32> -> vector<4x16xf32>
    %c0_226 = arith.constant 0 : index
    %c0_227 = arith.constant 0 : index
    %276 = vector.load %arg29[%c0_226, %c0_227] : memref<8x16xf32, #tpu.memory_space<vmem>>, vector<8x16xf32>
    %cst_228 = arith.constant dense<0.000000e+00> : vector<4x16xf32>
    %277 = tpu.matmul %273, %276, %cst_228 {dimension_numbers = #tpu.dot_dimension_numbers<[1], [0], [0], [1], [0, 0, 1, 1], [], []>} : vector<4x8xf32>, vector<8x16xf32>, vector<4x16xf32> -> vector<4x16xf32>
    %278 = arith.addf %275, %277 : vector<4x16xf32>
    %c0_229 = arith.constant 0 : index
    %c0_230 = arith.constant 0 : index
    %279 = vector.load %arg35[%c0_229, %c0_230] : memref<4x16xf32, #tpu.memory_space<vmem>>, vector<4x16xf32>
    tpu.vector_store %arg35[%c0_229, %c0_230], %278 {strides = array<i32>} : memref<4x16xf32, #tpu.memory_space<vmem>>, vector<4x16xf32>,
    %c0_231 = arith.constant 0 : index
    %c0_232 = arith.constant 0 : index
    %280 = vector.load %arg30[%c0_231, %c0_232] : memref<16x4xf32, #tpu.memory_space<vmem>>, vector<16x4xf32>
    %cst_233 = arith.constant dense<0.000000e+00> : vector<4x4xf32>
    %281 = tpu.matmul %278, %280, %cst_233 {dimension_numbers = #tpu.dot_dimension_numbers<[1], [0], [0], [1], [0, 0, 1, 1], [], []>} : vector<4x16xf32>, vector<16x4xf32>, vector<4x4xf32> -> vector<4x4xf32>
    %c0_234 = arith.constant 0 : index
    %c0_235 = arith.constant 0 : index
    %282 = vector.load %arg31[%c0_234, %c0_235] : memref<1x4xf32, #tpu.memory_space<vmem>>, vector<1x4xf32>
    %283 = vector.broadcast %282 : vector<1x4xf32> to vector<4x4xf32>
    %284 = arith.addf %281, %283 : vector<4x4xf32>
    %c0_236 = arith.constant 0 : index
    %c0_237 = arith.constant 0 : index
    %285 = vector.load %arg38[%c0_236, %c0_237] : memref<4x4xf32, #tpu.memory_space<vmem>>, vector<4x4xf32>
    tpu.vector_store %arg38[%c0_236, %c0_237], %284 {strides = array<i32>} : memref<4x4xf32, #tpu.memory_space<vmem>>, vector<4x4xf32>,
    return
  }
}

</mosaic_0001>

<bundles_post_ra>
// kernel: tdss_forward.1
= control target key start
LH: loop header
LB: loop body
LE: loop exit
PB: predicated region body
PF: predicated region fallthrough
CT: control target
= control target key end

     0   :  { %s8111_s6 = smov 1   ;;  %s8112_s10 = smov 2   ;;  %s9902_s0 = inlined_call_operand.smem [shape: u32[39], index: -1, kind: input, shape index: {}] }
   0x1   :  { %s8168_s5 = sld [smem:[%s9902_s0]]   ;;  %s8113_s14 = smov 3  }
   0x2   :  { %s8173_s9 = sld [smem:[%s9902_s0 + %s8111_s6]]   ;;  %s8114_s18 = smov 4  }
   0x3   :  { %s8178_s13 = sld [smem:[%s9902_s0 + %s8112_s10]]   ;;  %s8115_s22 = smov 5  }
   0x4   :  { %s8183_s17 = sld [smem:[%s9902_s0 + %s8113_s14]]   ;;  %s8116_s26 = smov 6  }
   0x5   :  { %s8188_s21 = sld [smem:[%s9902_s0 + %s8114_s18]]   ;;  %s8117_s30 = smov 7  }
   0x6   :  { %s8193_s25 = sld [smem:[%s9902_s0 + %s8115_s22]]   ;;  %s8118_s4 = smov 8  }
   0x7   :  { %s8198_s29 = sld [smem:[%s9902_s0 + %s8116_s26]]   ;;  %s8119_s10 = smov 9  }
   0x8   :  { %9913 = sst [smem:[#allocation17_spill]] %s8173_s9  ;;  %s8120_s15 = smov 10  }
   0x9   :  { %s8203_s3 = sld [smem:[%s9902_s0 + %s8117_s30]]   ;;  %s8121_s20 = smov 11  }
   0xa   :  { %s8208_s8 = sld [smem:[%s9902_s0 + %s8118_s4]]   ;;  %s8122_s26 = smov 12  }
   0xb   :  { %s8213_s14 = sld [smem:[%s9902_s0 + %s8119_s10]]   ;;  %s8123_s1 = smov 13  }
   0xc   :  { %s8218_s19 = sld [smem:[%s9902_s0 + %s8120_s15]]   ;;  %s8124_s7 = smov 14  }
   0xd   :  { %s8223_s24 = sld [smem:[%s9902_s0 + %s8121_s20]]   ;;  %s8125_s15 = smov 15  }
   0xe   :  { %s8228_s30 = sld [smem:[%s9902_s0 + %s8122_s26]]   ;;  %s8126_s22 = smov 16  }
   0xf   :  { %s8233_s6 = sld [smem:[%s9902_s0 + %s8123_s1]]   ;;  %s8127_s28 = smov 17  }
  0x10   :  { %s8238_s12 = sld [smem:[%s9902_s0 + %s8124_s7]]   ;;  %s8128_s7 = smov 18  }
  0x11   :  { %s8243_s20 = sld [smem:[%s9902_s0 + %s8125_s15]]   ;;  %s8129_s15 = smov 19  }
  0x12   :  { %s8248_s27 = sld [smem:[%s9902_s0 + %s8126_s22]]   ;;  %s8130_s22 = smov 20  }
  0x13   :  { %s8253_s4 = sld [smem:[%s9902_s0 + %s8127_s28]]   ;;  %s8131_s28 = smov 21  }
  0x14   :  { %s8258_s9 = sld [smem:[%s9902_s0 + %s8128_s7]]   ;;  %s8132_s7 = smov 22  }
  0x17   :  { %9914 = sst [smem:[#allocation18_spill]] %s8243_s20 }
  0x18   :  { %9915 = sst [smem:[#allocation19_spill]] %s8248_s27 }
  0x19   :  { %9916 = sst [smem:[#allocation20_spill]] %s8253_s4 }
  0x1a   :  { %9917 = sst [smem:[#allocation21_spill]] %s8258_s9 }
  0x1b   :  { %s8263_s20 = sld [smem:[%s9902_s0 + %s8129_s15]]   ;;  %s8133_s15 = smov 23  }
  0x1c   :  { %s8268_s27 = sld [smem:[%s9902_s0 + %s8130_s22]]   ;;  %s8134_s22 = smov 24  }
  0x1d   :  { %s8273_s4 = sld [smem:[%s9902_s0 + %s8131_s28]]   ;;  %s8135_s28 = smov 25  }
  0x1e   :  { %s8278_s9 = sld [smem:[%s9902_s0 + %s8132_s7]]   ;;  %s8136_s7 = smov 26  }
  0x21   :  { %9918 = sst [smem:[#allocation22_spill]] %s8263_s20 }
  0x22   :  { %9919 = sst [smem:[#allocation23_spill]] %s8268_s27 }
  0x23   :  { %9920 = sst [smem:[#allocation24_spill]] %s8273_s4 }
  0x24   :  { %9921 = sst [smem:[#allocation25_spill]] %s8278_s9 }
  0x25   :  { %s8283_s20 = sld [smem:[%s9902_s0 + %s8133_s15]]   ;;  %s8137_s15 = smov 27  }
  0x26   :  { %s8288_s27 = sld [smem:[%s9902_s0 + %s8134_s22]]   ;;  %s8138_s22 = smov 28  }
  0x27   :  { %s8293_s4 = sld [smem:[%s9902_s0 + %s8135_s28]]   ;;  %s8139_s28 = smov 29  }
  0x28   :  { %s8298_s9 = sld [smem:[%s9902_s0 + %s8136_s7]]   ;;  %s8140_s7 = smov 30  }
  0x2b   :  { %9922 = sst [smem:[#allocation26_spill]] %s8283_s20 }
  0x2c   :  { %9923 = sst [smem:[#allocation27_spill]] %s8288_s27 }
  0x2d   :  { %9924 = sst [smem:[#allocation28_spill]] %s8293_s4 }
  0x2e   :  { %9925 = sst [smem:[#allocation29_spill]] %s8298_s9 }
  0x2f   :  { %s8303_s20 = sld [smem:[%s9902_s0 + %s8137_s15]]   ;;  %s8141_s15 = smov 31  }
  0x30   :  { %s8308_s27 = sld [smem:[%s9902_s0 + %s8138_s22]]   ;;  %s8142_s22 = smov 32  }
  0x31   :  { %s8313_s4 = sld [smem:[%s9902_s0 + %s8139_s28]]   ;;  %s8143_s28 = smov 33  }
  0x32   :  { %s8318_s9 = sld [smem:[%s9902_s0 + %s8140_s7]]   ;;  %s8144_s7 = smov 34  }
  0x35   :  { %9926 = sst [smem:[#allocation30_spill]] %s8303_s20 }
  0x36   :  { %9927 = sst [smem:[#allocation31_spill]] %s8308_s27 }
  0x37   :  { %9928 = sst [smem:[#allocation32_spill]] %s8313_s4 }
  0x38   :  { %9929 = sst [smem:[#allocation33_spill]] %s8318_s9 }
  0x39   :  { %s8323_s20 = sld [smem:[%s9902_s0 + %s8141_s15]]   ;;  %s8145_s15 = smov 35  }
  0x3a   :  { %s8328_s27 = sld [smem:[%s9902_s0 + %s8142_s22]]   ;;  %s8146_s22 = smov 36  }
  0x3b   :  { %s8333_s4 = sld [smem:[%s9902_s0 + %s8143_s28]]   ;;  %s8147_s28 = smov 37  }
  0x3c   :  { %s8338_s9 = sld [smem:[%s9902_s0 + %s8144_s7]]   ;;  %s8148_s7 = smov 38  }
  0x3f   :  { %9930 = sst [smem:[#allocation34_spill]] %s8323_s20 }
  0x40   :  { %9931 = sst [smem:[#allocation35_spill]] %s8328_s27 }
  0x41   :  { %9932 = sst [smem:[#allocation36_spill]] %s8333_s4 }
  0x42   :  { %9933 = sst [smem:[#allocation37_spill]] %s8338_s9 }
  0x43   :  { %s8343_s20 = sld [smem:[%s9902_s0 + %s8145_s15]]  }
  0x44   :  { %s8348_s27 = sld [smem:[%s9902_s0 + %s8146_s22]]  }
  0x45   :  { %s8353_s4 = sld [smem:[%s9902_s0 + %s8147_s28]]  }
  0x46   :  { %s8358_s9 = sld [smem:[%s9902_s0 + %s8148_s7]]  }
  0x47   :  { %83 = vsyncpa [#allocation3], 0 }
  0x48   :  { %84 = vsyncpa [#allocation5], 0 }
  0x49   :  { %85 = vsyncpa [#allocation8], 0  ;;  %v152_v0 = vld [vmem:[%s8188_s21] sm:$0xff]  ;;  %v153_v1 = vld [vmem:[%s8188_s21 + $0x8] sm:$0xff]  ;;  %v8149_v3 = vmov 0.0|0.0   ;;  %vm8150_vm0 = vmmov 0  }
  0x4a   :  { %v155_v2 = vld [vmem:[%s8198_s29] sm:$0xff]  ;;  %7525 = vmatprep.subr.bf16.mxu0 %v8149_v3  ;;  %7528 = vmatprep.subr.bf16.mxu1 %v8149_v3  ;;  %v7526_v4 = vpack.c.bf16 %v153_v1, %v152_v0  ;;  %v156_v5 = vld [vmem:[%s8198_s29 + $0x8] sm:$0xff]  ;;  %v8151_v7 = vmov 0.0  }
  0x4b   :  { %v7529_v6 = vpack.c.bf16 %v156_v5, %v155_v2  ;;  %6337 = vmatprep.mubr.msk.f32.mxu0 %vm8150_vm0, %v8151_v7  ;;  %6344 = vmatprep.mubr.msk.f32.mxu1 %vm8150_vm0, %v8151_v7 }
  0x4c   :  { %86 = vsyncpa [#allocation11], 0  ;;  %7527 = vmatpush3.bf16.msra.mxu0 %v7526_v4  ;;  %v151_v8 = vld [vmem:[%s8168_s5] sm:$0xf]  ;;  %vm170_vm1 = vcmask 130048   ;;  %v159_v10 = vld [vmem:[%s8208_s8 + $0x8] sm:$0xff] }
  0x4d   :  { %7530 = vmatpush3.bf16.msra.mxu1 %v7529_v6  ;;  %7531 = vmatprep.subr.bf16.mxu0 %v8149_v3  ;;  %v158_v9 = vld [vmem:[%s8208_s8] sm:$0xff]  ;;  %v434_v13 = vld [vmem:[%s8218_s19 + $0x8] sm:$0xff]  ;;  %v160_v14 = vld [vmem:[%s8208_s8 + $0x10] sm:$0xff]  ;;  %vm412_vm2 = vcmask 257024   ;;  %vm331_vm3 = vcmask 261120   ;;  %vm431_vm4 = vcmask 0  }
  0x4e   :  { %7537 = vmatprep.subr.bf16.mxu1 %v8149_v3  ;;  %v433_v11 = vld [vmem:[%s8218_s19] sm:$0xff]  ;;  %v7532_v12 = vpack.c.bf16 %v159_v10, %v158_v9  ;;  %v161_v15 = vld [vmem:[%s8208_s8 + $0x18] sm:$0xff]  ;;  %v435_v17 = vld [vmem:[%s8218_s19 + $0x10] sm:$0xff]  ;;  %s9934_s21 = sld [smem:[#allocation19_spill]]  ;;  %vm428_vm5 = vcmask 125952   ;;  %vm690_vm6 = vcmask 60416  }
  0x4f   :  { %6338 = vmatmul.mubr.msk.f32.vlgmr.msra.gmra.mrb[0].mxu0 %vm170_vm1, %v151_v8  ;;  %v7538_v16 = vpack.c.bf16 %v434_v13, %v433_v11  ;;  %v436_v18 = vld [vmem:[%s8218_s19 + $0x18] sm:$0xff]  ;;  %v7535_v19 = vpack.c.bf16 %v161_v15, %v160_v14  ;;  %v5470_v21 = vld [vmem:[%s8193_s25] ss:$0 sm:$0xff]  ;;  %v439_v39 = vld [vmem:[%s8228_s30 + $0x8] sm:$0xff]  ;;  %s9935_s25 = sld [smem:[#allocation17_spill]]  ;;  %vm609_vm7 = vcmask 64512  }
  0x50   :  { %6345 = vmatmul.mubr.msk.f32.vlgmr.msra.gmra.mrb[0].mxu1 %vm170_vm1, %v151_v8  ;;  %6355 = vmatprep.mubr.msk.f32.mxu0 %vm8150_vm0, %v8151_v7  ;;  %v7541_v20 = vpack.c.bf16 %v436_v18, %v435_v17  ;;  %v5472_v22 = vld [vmem:[%s8203_s3] ss:$0 sm:$0xff]  ;;  %v440_v45 = vld [vmem:[%s8228_s30 + $0x10] sm:$0xff]  ;;  %v441_v46 = vld [vmem:[%s8228_s30 + $0x18] sm:$0xff]  ;;  %s9937_s29 = sld [smem:[#allocation20_spill]]  ;;  %s9938_s3 = sld [smem:[#allocation23_spill]] }
  0x51   :  { %6366 = vmatprep.mubr.msk.f32.mxu1 %vm8150_vm0, %v8151_v7  ;;  %7533 = vmatpush3.bf16.msra.mxu0 %v7532_v12  ;;  %v163_v36 = vld [vmem:[%s8178_s13] sm:$0xf]  ;;  %v7547_v47 = vpack.c.bf16 %v441_v46, %v440_v45  ;;  %vm907_vm8 = vcmask 244736   ;;  %vm1114_vm9 = vcmask 1045504   ;;  %vm8152_vm10 = vmmov 1   ;;  %s9945_s15 = sld [smem:[#allocation24_spill]] }
  0x52   :  { %7539 = vmatpush3.bf16.msra.mxu1 %v7538_v16  ;;  %7534 = vmatprep.subr.bf16.mxu0 %v8149_v3  ;;  %v438_v38 = vld [vmem:[%s8228_s30] sm:$0xff]  ;;  %vm8503_vm11 = vmpackc.low %vm1114_vm9, %vm8152_vm10  ;;  %vm931_vm12 = vcmask 240640   ;;  %s9942_s30 = sld [smem:[#allocation22_spill]]  ;;  %vm1408_vm13 = vcmask 1043456   ;;  %vm1392_vm14 = vcmask 818176   ;;  %vm3520_vm15 = vcmask 1041408  }
  0x53   :  { %7540 = vmatprep.subr.bf16.mxu1 %v8149_v3  ;;  %v7544_v43 = vpack.c.bf16 %v439_v39, %v438_v38  ;;  %v443_v48 = vld [vmem:[%s8238_s12] sm:$0xff]  ;;  %s9944_s12 = sld [smem:[#allocation29_spill]]  ;;  %s9948_s16 = sld [smem:[#allocation25_spill]] }
  0x54   :  { %v5474_v57 = vld [vmem:[%s8213_s14] ss:$0 sm:$0xff]  ;;  %v728_v18 = vld [vmem:[%s9934_s21 + $0x8] sm:$0xff]  ;;  %s9949_s18 = sld [smem:[#allocation26_spill]]  ;;  %s9950_s22 = sld [smem:[#allocation28_spill]] }
  0x55   :  { %7536 = vmatpush3.bf16.msra.mxu0 %v7535_v19  ;;  %v5476_v63 = vld [vmem:[%s8223_s24] ss:$0 sm:$0xff]  ;;  %s9941_s24 = sld [smem:[#allocation21_spill]]  ;;  %s9951_s23 = sld [smem:[#allocation32_spill]] }
  0x56   :  { %7542 = vmatpush3.bf16.msra.mxu1 %v7541_v20  ;;  %7543 = vmatprep.subr.bf16.mxu0 %v8149_v3  ;;  %v5478_v0 = vld [vmem:[%s8233_s6] ss:$0 sm:$0xff]  ;;  %s9943_s6 = sld [smem:[#allocation27_spill]]  ;;  %s9952_s26 = sld [smem:[#allocation30_spill]] }
  0x57   :  { %6380 = vmatprep.subr.mxu1 %v8151_v7  ;;  %v445_v15 = vld [vmem:[%s8183_s17] sm:$0xf]  ;;  %s9936_s17 = sld [smem:[#allocation18_spill]]  ;;  %s9953_s28 = sld [smem:[#allocation31_spill]] }
  0x58   :  { %v727_v17 = vld [vmem:[%s9934_s21] sm:$0xff]  ;;  %s9954_s1 = sld [smem:[#allocation33_spill]]  ;;  %s8153_s2 = smov [#allocation4]  }
  0x59   :  { %s5353_s7 = sshll.u32 %s8153_s2, 4  ;;  %s8154_s10 = smov [#allocation7]   ;;  %s5354_s7 = int_to_ptr.vmem [resolvable:$true] %s5353_s7 }
  0x5a   :  { %s5373_s11 = sshll.u32 %s8154_s10, 4  ;;  %p7954_p1 = scmp.lt.s32.totalorder %s5354_s7, %s5354_s7  ;;  %s5374_s11 = int_to_ptr.vmem [resolvable:$true] %s5373_s11 }
  0x5d   :  { %v5480_v45 = vld [vmem:[%s9936_s17] ss:$0 sm:$0xff] }
 0x122   :  { %v240_v23 = vpop.f32.mrb[0].mxu0 }
 0x123   :  { %v241_v24 = vadd.f32 %v5470_v21, %v240_v23  ;;  %v316_v25 = vpop.f32.mrb[0].mxu1  ;;  %v6339_v26 = vpop.f32.mrb[1].mxu0 }
 0x124   :  { %v317_v27 = vadd.f32 %v5472_v22, %v316_v25  ;;  %v6346_v28 = vpop.f32.mrb[1].mxu1  ;;  %v7550_v22 = vpack.c.bf16 %v728_v18, %v727_v17  ;;  %v715_v25 = vld [vmem:[%s9935_s25 + $0x8] sm:$0xff]  ;;  %v716_v26 = vld [vmem:[%s9935_s25 + $0x10] sm:$0xff] }
 0x125   :  { %v407_v29 = vmul.f32 %v241_v24, %v241_v24  ;;  %v718_v28 = vld [vmem:[%s9935_s25 + $0x20] sm:$0xff] }
 0x126   :  { %v320_v30 = vmul.f32 0.5, %v317_v27  ;;  %v406_v31 = vadd.f32 1.0, %v317_v27  ;;  %v409_v32 = vmul.f32 1.442695, %v317_v27  ;;  %v717_v27 = vld [vmem:[%s9935_s25 + $0x18] sm:$0xff] }
 0x128   :  { %v321_v33 = vmul.f32 1.442695, %v320_v30  ;;  %7925 = vpow2.f32 %v409_v32  ;;  %v408_v34 = vsub.f32 %v406_v31, %v407_v29  ;;  %v719_v29 = vld [vmem:[%s9935_s25 + $0x28] sm:$0xff]  ;;  %v720_v30 = vld [vmem:[%s9935_s25 + $0x30] sm:$0xff]  ;;  %v721_v31 = vld [vmem:[%s9935_s25 + $0x38] sm:$0xff] }
 0x129   :  { %v722_v32 = vld [vmem:[%s9935_s25 + $0x40] sm:$0xff] }
 0x12a   :  { %7927 = vpow2.f32 %v321_v33  ;;  %v723_v33 = vld [vmem:[%s9935_s25 + $0x48] sm:$0xff] }
 0x132   :  { %v7926_v35 = vpop.eup %7925 }
 0x133   :  { %v411_v37 = vsub.f32 %v408_v34, %v7926_v35  ;;  %v724_v34 = vld [vmem:[%s9935_s25 + $0x50] sm:$0xff]  ;;  %v725_v35 = vld [vmem:[%s9935_s25 + $0x58] sm:$0xff] }
 0x134   :  { %v7928_v40 = vpop.eup %7927 }
 0x135   :  { %v413_v41 = vsel %vm412_vm2, %v411_v37, 0.0  ;;  %v323_v42 = vmul.f32 %v7928_v40, %v163_v36  ;;  %v726_v36 = vld [vmem:[%s9935_s25 + $0x60] sm:$0xf] }
 0x136   :  { %414 = vadd.xlane.f32.xlu0 %v413_v41 }
 0x137   :  { %v324_v44 = vadd.f32 %v323_v42, %v241_v24  ;;  %v714_v24 = vld [vmem:[%s9935_s25] sm:$0xff] }
 0x139   :  { %6356 = vmatmul.mubr.msk.f32.vlgmr.msra.gmra.mrb[2].mxu0 %vm331_vm3, %v324_v44  ;;  %427 = vst.msk [vmem:[#allocation2] sm:$0xf] %vm412_vm2, %v324_v44  ;;  %6367 = vmatmul.mubr.msk.f32.vlgmr.msra.gmra.mrb[2].mxu1 %vm331_vm3, %v324_v44 }
 0x13a   :  { %7545 = vmatpush3.bf16.msra.mxu0 %v7544_v43  ;;  %6377 = vmatprep.mubr.msk.f32.mxu0 %vm8150_vm0, %v8151_v7 }
 0x13b   :  { %7546 = vmatprep.subr.bf16.mxu0 %v8149_v3  ;;  %6382 = vmatprep.mubr.msk.f32.mxu1 %vm8150_vm0, %v8151_v7 }
 0x13c   :  { %6381 = vmatpush3.msra.mxu1 %v443_v48 }
 0x13d   :  { %7549 = vmatprep.subr.bf16.mxu1 %v8149_v3 }
 0x13e   :  { %7548 = vmatpush3.bf16.msra.mxu0 %v7547_v47 }
 0x13f   :  { %7552 = vmatprep.subr.bf16.mxu0 %v8149_v3 }
 0x141   :  { %6378 = vmatmul.mubr.msk.f32.vlgmr.msra.gmra.mrb[4].mxu0 %vm331_vm3, %v324_v44  ;;  %vm3423_vm3 = vcmask 80896  }
 0x142   :  { %6436 = vmatprep.mubr.msk.f32.mxu0 %vm8150_vm0, %v8151_v7 }
 0x1c3   :  { %v415_v49 = vpop.xlane.xlu0 %414 }
 0x1c4   :  { %v416_v50 = vrot.slane %v415_v49, 4 }
 0x1c6   :  { %v417_v51 = vadd.f32 %v416_v50, %v415_v49  ;;  %v8480_v49 = vld [vmem:[%s9937_s29] ss:$0 sm:$0xff] }
 0x1c8   :  { %v418_v52 = vrot.slane %v417_v51, 2 }
 0x1ca   :  { %v419_v53 = vadd.f32 %v418_v52, %v417_v51 }
 0x1cc   :  { %v420_v54 = vrot.slane %v419_v53, 1 }
 0x1ce   :  { %v421_v55 = vadd.f32 %v420_v54, %v419_v53  ;;  %v5518_v53 = vld [vmem:[%s9938_s3 + $0x20] sm:$0xff]  ;;  %v5519_v54 = vld [vmem:[%s9938_s3 + $0x28] sm:$0xff] }
 0x1d0   :  { %7872 = vpush %v421_v55  ;;  %v1071_v55 = vld [vmem:[%s9938_s3] sm:$0xff] }
 0x201   :  { %s7873_s0 = spop %7872 }
 0x202   :  { %s423_s5 = smul.f32 -0.5, %s7873_s0  ;;  %s7949_s0 = scalar_lea.vmem %s5354_s7, 64 }
 0x203   :  { %p7950_p0 = scmp.ne.s32.totalorder %s5354_s7, %s7949_s0  ;;  %p7955_p2 = scmp.lt.s32.totalorder %s7949_s0, %s7949_s0 }
 0x204   :  { %s426_s13 = smul.f32 0.015625, %s423_s5 }
 0x205   :  { %p7956_p3 = por %p7955_p2, %p7954_p1 }
 0x206   :  { %v430_v56 = vstv %s426_s13 }
 0x207   :  { %432 = vst.msk [vmem:[#allocation6] sm:$0x1] %vm431_vm4, %v430_v56  ;;  %v7560_v56 = vpack.c.bf16 %v5519_v54, %v5518_v53  ;;  %p7957_p4 = pnand %p7956_p3, %p7950_p0 }
 0x20c   :  { %v401_v58 = vpop.f32.mrb[2].mxu0  ;;  %v518_v59 = vpop.f32.mrb[2].mxu1 }
 0x20d   :  { %v402_v60 = vadd.f32 %v5474_v57, %v401_v58  ;;  %v6357_v61 = vpop.f32.mrb[3].mxu0  ;;  %v6368_v62 = vpop.f32.mrb[3].mxu1  ;;  %v519_v1 = vadd.f32 %v5476_v63, %v518_v59  ;;  %v1072_v57 = vld [vmem:[%s9938_s3 + $0x8] sm:$0xff]  ;;  %v1073_v63 = vld [vmem:[%s9938_s3 + $0x10] sm:$0xff] }
 0x20e   :  { %v7553_v59 = vpack.c.bf16 %v1072_v57, %v1071_v55 }
 0x20f   :  { %7929 = vtanh.f32 %v402_v60  ;;  %v685_v6 = vmul.f32 %v519_v1, %v519_v1 }
 0x210   :  { %7554 = vmatpush3.bf16.msra.mxu0 %v7553_v59 }
 0x211   :  { %7555 = vmatprep.subr.bf16.mxu0 %v8149_v3 }
 0x214   :  { %v594_v2 = vpop.f32.mrb[4].mxu0 }
 0x215   :  { %v595_v4 = vadd.f32 %v5478_v0, %v594_v2  ;;  %v6379_v5 = vpop.f32.mrb[5].mxu0  ;;  %v1074_v0 = vld [vmem:[%s9938_s3 + $0x18] sm:$0x3f] }
 0x216   :  { %v5521_v5 = vld [vmem:[%s9938_s3 + $0x38] sm:$0x3f] }
 0x217   :  { %v598_v8 = vmul.f32 0.5, %v595_v4  ;;  %v684_v9 = vadd.f32 1.0, %v595_v4  ;;  %v687_v10 = vmul.f32 1.442695, %v595_v4  ;;  %v7556_v4 = vpack.c.bf16 %v1074_v0, %v1073_v63 }
 0x219   :  { %v7930_v11 = vpop.eup %7929  ;;  %v599_v12 = vmul.f32 1.442695, %v598_v8  ;;  %7931 = vpow2.f32 %v687_v10  ;;  %v686_v13 = vsub.f32 %v684_v9, %v685_v6  ;;  %7558 = vmatpush3.bf16.msk.msra.mxu0 %vm8503_vm11, %v7556_v4 }
 0x21a   :  { %429 = vst.msk [vmem:[#allocation4] sm:$0xf] %vm428_vm5, %v7930_v11  ;;  %7566 = vmatprep.subr.bf16.mxu0 %v8149_v3 }
 0x21b   :  { %7933 = vpow2.f32 %v599_v12 }
 0x223   :  { %v7932_v14 = vpop.eup %7931 }
 0x224   :  { %v689_v16 = vsub.f32 %v686_v13, %v7932_v14 }
 0x225   :  { %v7934_v19 = vpop.eup %7933 }
 0x226   :  { %v691_v20 = vsel %vm690_vm6, %v689_v16, 0.0  ;;  %v601_v21 = vmul.f32 %v7934_v19, %v445_v15  ;;  %vm3712_vm6 = vcmask 293888  }
 0x227   :  { %692 = vadd.xlane.f32.xlu0 %v691_v20 }
 0x228   :  { %v8418_v23 = vadd.f32 %v601_v21, %v519_v1  ;;  %v5520_v1 = vld [vmem:[%s9938_s3 + $0x30] sm:$0xff] }
 0x229   :  { %v7563_v10 = vpack.c.bf16 %v5521_v5, %v5520_v1 }
 0x22a   :  { %6383 = vmatmul.mubr.msk.f32.vlgmr.msra.gmra.mrb[4].mxu1 %vm609_vm7, %v8418_v23 }
 0x22b   :  { %7551 = vmatpush3.bf16.msra.mxu1 %v7550_v22  ;;  %6389 = vmatprep.mubr.msk.f32.mxu1 %vm8150_vm0, %v8151_v7 }
 0x22c   :  { %7559 = vmatprep.subr.bf16.mxu1 %v8149_v3 }
 0x22e   :  { %6390 = vmatmul.mubr.msk.f32.vlgmr.msra.gmra.mrb[6].mxu1 %vm170_vm1, %v714_v24 }
 0x22f   :  { %6392 = vmatprep.mubr.msk.f32.mxu1 %vm8150_vm0, %v8151_v7  ;;  %7561 = vmatpush3.bf16.msra.mxu1 %v7560_v56 }
 0x230   :  { %7562 = vmatprep.subr.bf16.mxu1 %v8149_v3 }
 0x232   :  { %6393 = vmatmul.mubr.msk.f32.gmra.mrb[8].mxu1 %vm170_vm1, %v715_v25 }
 0x233   :  { %6395 = vmatprep.mubr.msk.f32.mxu1 %vm8150_vm0, %v8151_v7  ;;  %7565 = vmatpush3.bf16.msk.msra.mxu1 %vm8503_vm11, %v7563_v10 }
 0x234   :  { %7602 = vmatprep.subr.bf16.mxu1 %v8149_v3 }
 0x236   :  { %6396 = vmatmul.mubr.msk.f32.gmra.mrb[10].mxu1 %vm170_vm1, %v716_v26 }
 0x237   :  { %6398 = vmatprep.mubr.msk.f32.mxu1 %vm8150_vm0, %v8151_v7 }
 0x23a   :  { %6399 = vmatmul.mubr.msk.f32.gmra.mrb[12].mxu1 %vm170_vm1, %v717_v27 }
 0x23b   :  { %6401 = vmatprep.mubr.msk.f32.mxu1 %vm8150_vm0, %v8151_v7 }
 0x23e   :  { %6402 = vmatmul.mubr.msk.f32.gmra.mrb[14].mxu1 %vm170_vm1, %v718_v28 }
 0x23f   :  { %6404 = vmatprep.mubr.msk.f32.mxu1 %vm8150_vm0, %v8151_v7 }
 0x242   :  { %6405 = vmatmul.mubr.msk.f32.gmra.mrb[16].mxu1 %vm170_vm1, %v719_v29 }
 0x243   :  { %6407 = vmatprep.mubr.msk.f32.mxu1 %vm8150_vm0, %v8151_v7 }
 0x246   :  { %6408 = vmatmul.mubr.msk.f32.gmra.mrb[18].mxu1 %vm170_vm1, %v720_v30 }
 0x247   :  { %6410 = vmatprep.mubr.msk.f32.mxu1 %vm8150_vm0, %v8151_v7 }
 0x24a   :  { %6411 = vmatmul.mubr.msk.f32.gmra.mrb[20].mxu1 %vm170_vm1, %v721_v31 }
 0x24b   :  { %6413 = vmatprep.mubr.msk.f32.mxu1 %vm8150_vm0, %v8151_v7 }
 0x24e   :  { %6414 = vmatmul.mubr.msk.f32.gmra.mrb[22].mxu1 %vm170_vm1, %v722_v32 }
 0x24f   :  { %6416 = vmatprep.mubr.msk.f32.mxu1 %vm8150_vm0, %v8151_v7 }
 0x252   :  { %6417 = vmatmul.mubr.msk.f32.gmra.mrb[24].mxu1 %vm170_vm1, %v723_v33 }
 0x253   :  { %6419 = vmatprep.mubr.msk.f32.mxu1 %vm8150_vm0, %v8151_v7 }
 0x256   :  { %6420 = vmatmul.mubr.msk.f32.gmra.mrb[26].mxu1 %vm170_vm1, %v724_v34 }
 0x257   :  { %6422 = vmatprep.mubr.msk.f32.mxu1 %vm8150_vm0, %v8151_v7 }
 0x25a   :  { %6423 = vmatmul.mubr.msk.f32.gmra.mrb[28].mxu1 %vm170_vm1, %v725_v35 }
 0x25b   :  { %6425 = vmatprep.mubr.msk.f32.mxu1 %vm8150_vm0, %v8151_v7 }
 0x25e   :  { %6426 = vmatmul.mubr.msk.f32.gmra.mrb[30].mxu1 %vm170_vm1, %v726_v36 }
 0x25f   :  { %6483 = vmatprep.mubr.msk.f32.mxu1 %vm8150_vm0, %v8151_v7 }
 0x2b4   :  { %v693_v37 = vpop.xlane.xlu0 %692 }
 0x2b5   :  { %v694_v38 = vrot.slane %v693_v37, 4 }
 0x2b7   :  { %v695_v39 = vadd.f32 %v694_v38, %v693_v37 }
 0x2b9   :  { %v696_v40 = vrot.slane %v695_v39, 2 }
 0x2bb   :  { %v697_v41 = vadd.f32 %v696_v40, %v695_v39 }
 0x2bd   :  { %v698_v42 = vrot.slane %v697_v41, 1 }
 0x2bf   :  { %v699_v43 = vadd.f32 %v698_v42, %v697_v41 }
 0x2c1   :  { %7874 = vpush %v699_v43 }
 0x2f2   :  { %s7875_s8 = spop %7874 }
 0x2f3   :  { %s701_s14 = smul.f32 -0.5, %s7875_s8 }
 0x2f5   :  { %s704_s19 = smul.f32 0.0078125, %s701_s14 }
 0x2f7   :  { %v706_v44 = vstv %s704_s19 }
 0x2f8   :  { %707 = vst.msk [vmem:[#allocation10] sm:$0x1] %vm431_vm4, %v706_v44  ;;  %vm3431_vm4 = vcmask 76800  }
 0x2fd   :  { %v679_v46 = vpop.f32.mrb[4].mxu1 }
 0x2fe   :  { %v680_v47 = vadd.f32 %v5480_v45, %v679_v46  ;;  %v6384_v48 = vpop.f32.mrb[5].mxu1 }
 0x300   :  { %7935 = vtanh.f32 %v680_v47 }
 0x301   :  { %v841_v50 = vpop.f32.mrb[6].mxu1 }
 0x302   :  { %v6391_v51 = vpop.f32.mrb[7].mxu1  ;;  %v8483_v52 = vadd.f32 %v8480_v49, %v841_v50 }
 0x304   :  { %v908_v62 = vsel %vm907_vm8, %v8483_v52, 0.0 }
 0x305   :  { %v846_v58 = vpop.f32.mrb[8].mxu1 }
 0x306   :  { %v8490_v60 = vadd.f32 %v8480_v49, %v846_v58  ;;  %v6394_v61 = vpop.f32.mrb[9].mxu1 }
 0x308   :  { %v909_v2 = vsel %vm907_vm8, %v8490_v60, 0.0 }
 0x309   :  { %v910_v6 = vadd.f32 %v909_v2, %v908_v62  ;;  %v851_v8 = vpop.f32.mrb[10].mxu1 }
 0x30a   :  { %v7936_v11 = vpop.eup %7935  ;;  %v8508_v12 = vadd.f32 %v8480_v49, %v851_v8  ;;  %v6397_v13 = vpop.f32.mrb[11].mxu1 }
 0x30b   :  { %705 = vst.msk [vmem:[#allocation9] sm:$0xf] %vm412_vm2, %v7936_v11  ;;  %vm9533_vm2 = vmpackc.low %vm3520_vm15, %vm8152_vm10 }
 0x30c   :  { %v911_v14 = vsel %vm907_vm8, %v8508_v12, 0.0 }
 0x30d   :  { %v912_v15 = vadd.f32 %v911_v14, %v910_v6  ;;  %v856_v16 = vpop.f32.mrb[12].mxu1 }
 0x30e   :  { %v857_v17 = vadd.f32 %v8480_v49, %v856_v16  ;;  %v6400_v18 = vpop.f32.mrb[13].mxu1 }
 0x310   :  { %v913_v19 = vsel %vm907_vm8, %v857_v17, 0.0 }
 0x311   :  { %v914_v20 = vadd.f32 %v913_v19, %v912_v15  ;;  %v861_v21 = vpop.f32.mrb[14].mxu1 }
 0x312   :  { %v862_v22 = vadd.f32 %v8480_v49, %v861_v21  ;;  %v6403_v24 = vpop.f32.mrb[15].mxu1 }
 0x314   :  { %v915_v25 = vsel %vm907_vm8, %v862_v22, 0.0 }
 0x315   :  { %v916_v26 = vadd.f32 %v915_v25, %v914_v20  ;;  %v866_v27 = vpop.f32.mrb[16].mxu1 }
 0x316   :  { %v867_v28 = vadd.f32 %v8480_v49, %v866_v27  ;;  %v6406_v29 = vpop.f32.mrb[17].mxu1 }
 0x318   :  { %v917_v30 = vsel %vm907_vm8, %v867_v28, 0.0 }
 0x319   :  { %v918_v31 = vadd.f32 %v917_v30, %v916_v26  ;;  %v871_v32 = vpop.f32.mrb[18].mxu1 }
 0x31a   :  { %v872_v33 = vadd.f32 %v8480_v49, %v871_v32  ;;  %v6409_v34 = vpop.f32.mrb[19].mxu1 }
 0x31c   :  { %v919_v35 = vsel %vm907_vm8, %v872_v33, 0.0 }
 0x31d   :  { %v920_v36 = vadd.f32 %v919_v35, %v918_v31  ;;  %v876_v37 = vpop.f32.mrb[20].mxu1 }
 0x31e   :  { %v877_v38 = vadd.f32 %v8480_v49, %v876_v37  ;;  %v6412_v39 = vpop.f32.mrb[21].mxu1 }
 0x320   :  { %v921_v40 = vsel %vm907_vm8, %v877_v38, 0.0 }
 0x321   :  { %v922_v41 = vadd.f32 %v921_v40, %v920_v36  ;;  %v881_v42 = vpop.f32.mrb[22].mxu1 }
 0x322   :  { %v882_v43 = vadd.f32 %v8480_v49, %v881_v42  ;;  %v6415_v44 = vpop.f32.mrb[23].mxu1 }
 0x324   :  { %v923_v45 = vsel %vm907_vm8, %v882_v43, 0.0 }
 0x325   :  { %v924_v46 = vadd.f32 %v923_v45, %v922_v41  ;;  %v886_v47 = vpop.f32.mrb[24].mxu1 }
 0x326   :  { %v887_v48 = vadd.f32 %v8480_v49, %v886_v47  ;;  %v6418_v50 = vpop.f32.mrb[25].mxu1 }
 0x328   :  { %v925_v51 = vsel %vm907_vm8, %v887_v48, 0.0 }
 0x329   :  { %v926_v53 = vadd.f32 %v925_v51, %v924_v46  ;;  %v891_v54 = vpop.f32.mrb[26].mxu1 }
 0x32a   :  { %v892_v55 = vadd.f32 %v8480_v49, %v891_v54  ;;  %v6421_v56 = vpop.f32.mrb[27].mxu1 }
 0x32c   :  { %v927_v57 = vsel %vm907_vm8, %v892_v55, 0.0 }
 0x32d   :  { %v928_v58 = vadd.f32 %v927_v57, %v926_v53  ;;  %v896_v59 = vpop.f32.mrb[28].mxu1 }
 0x32e   :  { %v897_v61 = vadd.f32 %v8480_v49, %v896_v59  ;;  %v6424_v62 = vpop.f32.mrb[29].mxu1 }
 0x330   :  { %v929_v63 = vsel %vm907_vm8, %v897_v61, 0.0 }
 0x331   :  { %v930_v0 = vadd.f32 %v929_v63, %v928_v58  ;;  %v901_v1 = vpop.f32.mrb[30].mxu1 }
 0x332   :  { %v902_v2 = vadd.f32 %v8480_v49, %v901_v1  ;;  %v6427_v4 = vpop.f32.mrb[31].mxu1 }
 0x334   :  { %v932_v5 = vsel %vm931_vm12, %v902_v2, 0.0 }
 0x335   :  { %v933_v6 = vadd.f32 %v932_v5, %v930_v0 }
 0x337   :  { %v934_v8 = vrot.slane %v933_v6, 4 }
 0x339   :  { %v935_v10 = vadd.f32 %v934_v8, %v933_v6 }
 0x33b   :  { %v936_v11 = vrot.slane %v935_v10, 2 }
 0x33d   :  { %v937_v13 = vadd.f32 %v936_v11, %v935_v10 }
 0x33f   :  { %v938_v14 = vrot.slane %v937_v13, 1 }
 0x341   :  { %v939_v15 = vadd.f32 %v938_v14, %v937_v13 }
 0x343   :  { %v941_v16 = vmul.f32 0.01, %v939_v15 }
 0x345   :  { %v942_v18 = vsub.f32 %v8483_v52, %v941_v16  ;;  %v943_v19 = vsub.f32 %v8490_v60, %v941_v16  ;;  %v944_v20 = vsub.f32 %v8508_v12, %v941_v16  ;;  %v945_v21 = vsub.f32 %v857_v17, %v941_v16 }
 0x346   :  { %v946_v24 = vsub.f32 %v862_v22, %v941_v16  ;;  %v947_v49 = vsub.f32 %v867_v28, %v941_v16  ;;  %v948_v25 = vsub.f32 %v872_v33, %v941_v16  ;;  %v949_v26 = vsub.f32 %v877_v38, %v941_v16 }
 0x347   :  { %v950_v27 = vsub.f32 %v882_v43, %v941_v16  ;;  %v951_v29 = vsub.f32 %v887_v48, %v941_v16  ;;  %v952_v30 = vsub.f32 %v892_v55, %v941_v16  ;;  %v953_v31 = vsub.f32 %v897_v61, %v941_v16 }
 0x348   :  { %v8542_v32 = vsub.f32 %v902_v2, %v941_v16  ;;  %v955_v34 = vmul.f32 %v942_v18, %v942_v18  ;;  %v956_v35 = vmul.f32 %v943_v19, %v943_v19  ;;  %v957_v36 = vmul.f32 %v944_v20, %v944_v20 }
 0x349   :  { %v958_v37 = vmul.f32 %v945_v21, %v945_v21  ;;  %v959_v17 = vmul.f32 %v946_v24, %v946_v24  ;;  %v960_v33 = vmul.f32 %v947_v49, %v947_v49  ;;  %v961_v40 = vmul.f32 %v948_v25, %v948_v25 }
 0x34a   :  { %v968_v52 = vsel %vm907_vm8, %v955_v34, 0.0  ;;  %v969_v60 = vsel %vm907_vm8, %v956_v35, 0.0  ;;  %v971_v22 = vsel %vm907_vm8, %v957_v36, 0.0  ;;  %v962_v43 = vmul.f32 %v949_v26, %v949_v26  ;;  %v8560_v34 = vld [vmem:[%s9941_s24] ss:$0 sm:$0xff] }
 0x34b   :  { %v970_v12 = vadd.f32 %v969_v60, %v968_v52  ;;  %v973_v38 = vsel %vm907_vm8, %v958_v37, 0.0  ;;  %v975_v41 = vsel %vm907_vm8, %v959_v17, 0.0  ;;  %v977_v44 = vsel %vm907_vm8, %v960_v33, 0.0 }
 0x34c   :  { %v963_v46 = vmul.f32 %v950_v27, %v950_v27  ;;  %v979_v47 = vsel %vm907_vm8, %v961_v40, 0.0  ;;  %v964_v50 = vmul.f32 %v951_v29, %v951_v29  ;;  %v981_v51 = vsel %vm907_vm8, %v962_v43, 0.0  ;;  %v8569_v40 = vld [vmem:[%s9942_s30] ss:$0 sm:$0xff] }
 0x34d   :  { %v972_v28 = vadd.f32 %v971_v22, %v970_v12  ;;  %v965_v54 = vmul.f32 %v952_v30, %v952_v30  ;;  %v966_v57 = vmul.f32 %v953_v31, %v953_v31  ;;  %v967_v61 = vmul.f32 %v8542_v32, %v8542_v32 }
 0x34e   :  { %v983_v55 = vsel %vm907_vm8, %v963_v46, 0.0  ;;  %v985_v58 = vsel %vm907_vm8, %v964_v50, 0.0 }
 0x34f   :  { %v974_v39 = vadd.f32 %v973_v38, %v972_v28  ;;  %v987_v62 = vsel %vm907_vm8, %v965_v54, 0.0  ;;  %v989_v0 = vsel %vm907_vm8, %v966_v57, 0.0  ;;  %v991_v2 = vsel %vm931_vm12, %v967_v61, 0.0 }
 0x351   :  { %v976_v42 = vadd.f32 %v975_v41, %v974_v39 }
 0x353   :  { %v978_v45 = vadd.f32 %v977_v44, %v976_v42 }
 0x355   :  { %v980_v48 = vadd.f32 %v979_v47, %v978_v45 }
 0x357   :  { %v982_v53 = vadd.f32 %v981_v51, %v980_v48 }
 0x359   :  { %v984_v56 = vadd.f32 %v983_v55, %v982_v53 }
 0x35b   :  { %v986_v59 = vadd.f32 %v985_v58, %v984_v56 }
 0x35d   :  { %v988_v63 = vadd.f32 %v987_v62, %v986_v59 }
 0x35f   :  { %v990_v1 = vadd.f32 %v989_v0, %v988_v63 }
 0x361   :  { %v992_v4 = vadd.f32 %v991_v2, %v990_v1 }
 0x363   :  { %v993_v5 = vrot.slane %v992_v4, 4 }
 0x365   :  { %v994_v6 = vadd.f32 %v993_v5, %v992_v4 }
 0x367   :  { %v995_v8 = vrot.slane %v994_v6, 2 }
 0x369   :  { %v996_v10 = vadd.f32 %v995_v8, %v994_v6 }
 0x36b   :  { %v997_v11 = vrot.slane %v996_v10, 1 }
 0x36d   :  { %v998_v13 = vadd.f32 %v997_v11, %v996_v10 }
 0x36f   :  { %v999_v14 = vmul.f32 0.01, %v998_v13 }
 0x371   :  { %v1000_v15 = vadd.f32 1e-05, %v999_v14 }
 0x373   :  { %7937 = vrsqrt.f32 %v1000_v15 }
 0x37d   :  { %v7938_v16 = vpop.eup %7937 }
 0x37e   :  { %v1002_v35 = vmul.f32 %v7938_v16, %v942_v18  ;;  %v1003_v36 = vmul.f32 %v7938_v16, %v943_v19  ;;  %v1004_v37 = vmul.f32 %v7938_v16, %v944_v20  ;;  %v1005_v52 = vmul.f32 %v7938_v16, %v945_v21 }
 0x37f   :  { %v1006_v60 = vmul.f32 %v7938_v16, %v946_v24  ;;  %v1007_v12 = vmul.f32 %v7938_v16, %v947_v49  ;;  %v1008_v17 = vmul.f32 %v7938_v16, %v948_v25  ;;  %v1009_v22 = vmul.f32 %v7938_v16, %v949_v26  ;;  %v5553_v24 = vld [vmem:[%s9938_s3 + $0x40] sm:$0xff]  ;;  %v5554_v49 = vld [vmem:[%s9938_s3 + $0x48] sm:$0xff] }
 0x380   :  { %v1010_v28 = vmul.f32 %v7938_v16, %v950_v27  ;;  %v8562_v33 = vmul.f32 %v7938_v16, %v951_v29  ;;  %v8564_v38 = vmul.f32 %v7938_v16, %v952_v30  ;;  %v8566_v39 = vmul.f32 %v7938_v16, %v953_v31  ;;  %v5555_v30 = vld [vmem:[%s9938_s3 + $0x50] sm:$0xff]  ;;  %v5556_v31 = vld [vmem:[%s9938_s3 + $0x58] sm:$0x3f] }
 0x381   :  { %v8572_v18 = vmul.f32 %v7938_v16, %v8542_v32  ;;  %v1021_v19 = vmul.f32 %v8560_v34, %v1002_v35  ;;  %v1022_v20 = vmul.f32 %v8560_v34, %v1003_v36  ;;  %v1023_v25 = vmul.f32 %v8560_v34, %v1004_v37 }
 0x382   :  { %v7603_v29 = vpack.c.bf16 %v5554_v49, %v5553_v24  ;;  %v1024_v32 = vmul.f32 %v8560_v34, %v1005_v52  ;;  %v7606_v43 = vpack.c.bf16 %v5556_v31, %v5555_v30  ;;  %v1025_v44 = vmul.f32 %v8560_v34, %v1006_v60 }
 0x383   :  { %v1040_v21 = vadd.f32 %v8569_v40, %v1021_v19  ;;  %v1041_v26 = vadd.f32 %v8569_v40, %v1022_v20  ;;  %v1042_v41 = vadd.f32 %v8569_v40, %v1023_v25  ;;  %v1026_v47 = vmul.f32 %v8560_v34, %v1007_v12 }
 0x384   :  { %v1043_v45 = vadd.f32 %v8569_v40, %v1024_v32  ;;  %v1044_v48 = vadd.f32 %v8569_v40, %v1025_v44  ;;  %v1027_v51 = vmul.f32 %v8560_v34, %v1008_v17  ;;  %v1028_v55 = vmul.f32 %v8560_v34, %v1009_v22 }
 0x385   :  { %v8581_v27 = vmax.f32 %v1040_v21, 0.0  ;;  %v8595_v42 = vmax.f32 %v1041_v26, 0.0  ;;  %v8608_v46 = vmax.f32 %v1042_v41, 0.0  ;;  %v1045_v53 = vadd.f32 %v8569_v40, %v1026_v47 }
 0x386   :  { %v8623_v50 = vmax.f32 %v1043_v45, 0.0  ;;  %v8635_v54 = vmax.f32 %v1044_v48, 0.0  ;;  %v1046_v56 = vadd.f32 %v8569_v40, %v1027_v51  ;;  %v1029_v58 = vmul.f32 %v8560_v34, %v1010_v28 }
 0x387   :  { %6437 = vmatmul.mubr.msk.f32.vlgmr.msra.gmra.mrb[6].mxu0 %vm907_vm8, %v8581_v27  ;;  %6484 = vmatmul.mubr.msk.f32.vlgmr.msra.gmra.mrb[32].mxu1 %vm907_vm8, %v8581_v27  ;;  %v8647_v57 = vmax.f32 %v1045_v53, 0.0  ;;  %v1047_v59 = vadd.f32 %v8569_v40, %v1028_v55  ;;  %v1030_v62 = vmul.f32 %v8560_v34, %v8562_v33  ;;  %v1031_v1 = vmul.f32 %v8560_v34, %v8564_v38 }
 0x388   :  { %6439 = vmatprep.mubr.msk.f32.mxu0 %vm8150_vm0, %v8151_v7  ;;  %6486 = vmatprep.mubr.msk.f32.mxu1 %vm8150_vm0, %v8151_v7  ;;  %v8659_v61 = vmax.f32 %v1046_v56, 0.0  ;;  %v1048_v63 = vadd.f32 %v8569_v40, %v1029_v58  ;;  %v1032_v5 = vmul.f32 %v8560_v34, %v8566_v39  ;;  %v1033_v10 = vmul.f32 %v8560_v34, %v8572_v18 }
 0x389   :  { %7604 = vmatpush3.bf16.msra.mxu1 %v7603_v29  ;;  %v8672_v0 = vmax.f32 %v1047_v59, 0.0  ;;  %v1049_v2 = vadd.f32 %v8569_v40, %v1030_v62  ;;  %v1050_v6 = vadd.f32 %v8569_v40, %v1031_v1 }
 0x38a   :  { %7605 = vmatprep.subr.bf16.mxu1 %v8149_v3  ;;  %v8685_v4 = vmax.f32 %v1048_v63, 0.0  ;;  %v1051_v11 = vadd.f32 %v8569_v40, %v1032_v5  ;;  %v1052_v14 = vadd.f32 %v8569_v40, %v1033_v10 }
 0x38b   :  { %6440 = vmatmul.mubr.msk.f32.gmra.mrb[8].mxu0 %vm907_vm8, %v8595_v42  ;;  %6487 = vmatmul.mubr.msk.f32.gmra.mrb[34].mxu1 %vm907_vm8, %v8595_v42  ;;  %v8698_v8 = vmax.f32 %v1049_v2, 0.0  ;;  %v8711_v13 = vmax.f32 %v1050_v6, 0.0 }
 0x38c   :  { %6442 = vmatprep.mubr.msk.f32.mxu0 %vm8150_vm0, %v8151_v7  ;;  %6489 = vmatprep.mubr.msk.f32.mxu1 %vm8150_vm0, %v8151_v7  ;;  %v8722_v15 = vmax.f32 %v1051_v11, 0.0  ;;  %v8732_v16 = vmax.f32 %v1052_v14, 0.0 }
 0x38d   :  { %7608 = vmatpush3.bf16.msk.msra.mxu1 %vm8503_vm11, %v7606_v43 }
 0x38e   :  { %7634 = vmatprep.subr.bf16.mxu1 %v8149_v3 }
 0x38f   :  { %6443 = vmatmul.mubr.msk.f32.gmra.mrb[10].mxu0 %vm907_vm8, %v8608_v46  ;;  %6490 = vmatmul.mubr.msk.f32.gmra.mrb[36].mxu1 %vm907_vm8, %v8608_v46 }
 0x390   :  { %6445 = vmatprep.mubr.msk.f32.mxu0 %vm8150_vm0, %v8151_v7  ;;  %6492 = vmatprep.mubr.msk.f32.mxu1 %vm8150_vm0, %v8151_v7 }
 0x393   :  { %6446 = vmatmul.mubr.msk.f32.gmra.mrb[12].mxu0 %vm907_vm8, %v8623_v50  ;;  %6493 = vmatmul.mubr.msk.f32.gmra.mrb[38].mxu1 %vm907_vm8, %v8623_v50 }
 0x394   :  { %6448 = vmatprep.mubr.msk.f32.mxu0 %vm8150_vm0, %v8151_v7  ;;  %6495 = vmatprep.mubr.msk.f32.mxu1 %vm8150_vm0, %v8151_v7 }
 0x397   :  { %6449 = vmatmul.mubr.msk.f32.gmra.mrb[14].mxu0 %vm907_vm8, %v8635_v54  ;;  %6496 = vmatmul.mubr.msk.f32.gmra.mrb[40].mxu1 %vm907_vm8, %v8635_v54 }
 0x398   :  { %6451 = vmatprep.mubr.msk.f32.mxu0 %vm8150_vm0, %v8151_v7  ;;  %6498 = vmatprep.mubr.msk.f32.mxu1 %vm8150_vm0, %v8151_v7 }
 0x39b   :  { %6452 = vmatmul.mubr.msk.f32.gmra.mrb[16].mxu0 %vm907_vm8, %v8647_v57  ;;  %6499 = vmatmul.mubr.msk.f32.gmra.mrb[42].mxu1 %vm907_vm8, %v8647_v57 }
 0x39c   :  { %6454 = vmatprep.mubr.msk.f32.mxu0 %vm8150_vm0, %v8151_v7  ;;  %6501 = vmatprep.mubr.msk.f32.mxu1 %vm8150_vm0, %v8151_v7 }
 0x39f   :  { %6455 = vmatmul.mubr.msk.f32.gmra.mrb[18].mxu0 %vm907_vm8, %v8659_v61  ;;  %6502 = vmatmul.mubr.msk.f32.gmra.mrb[44].mxu1 %vm907_vm8, %v8659_v61 }
 0x3a0   :  { %6457 = vmatprep.mubr.msk.f32.mxu0 %vm8150_vm0, %v8151_v7  ;;  %6504 = vmatprep.mubr.msk.f32.mxu1 %vm8150_vm0, %v8151_v7 }
 0x3a3   :  { %6458 = vmatmul.mubr.msk.f32.gmra.mrb[20].mxu0 %vm907_vm8, %v8672_v0  ;;  %6505 = vmatmul.mubr.msk.f32.gmra.mrb[46].mxu1 %vm907_vm8, %v8672_v0 }
 0x3a4   :  { %6460 = vmatprep.mubr.msk.f32.mxu0 %vm8150_vm0, %v8151_v7  ;;  %6507 = vmatprep.mubr.msk.f32.mxu1 %vm8150_vm0, %v8151_v7 }
 0x3a7   :  { %6461 = vmatmul.mubr.msk.f32.gmra.mrb[22].mxu0 %vm907_vm8, %v8685_v4  ;;  %6508 = vmatmul.mubr.msk.f32.gmra.mrb[48].mxu1 %vm907_vm8, %v8685_v4 }
 0x3a8   :  { %6463 = vmatprep.mubr.msk.f32.mxu0 %vm8150_vm0, %v8151_v7  ;;  %6510 = vmatprep.mubr.msk.f32.mxu1 %vm8150_vm0, %v8151_v7 }
 0x3ab   :  { %6464 = vmatmul.mubr.msk.f32.gmra.mrb[24].mxu0 %vm907_vm8, %v8698_v8  ;;  %6511 = vmatmul.mubr.msk.f32.gmra.mrb[50].mxu1 %vm907_vm8, %v8698_v8 }
 0x3ac   :  { %6466 = vmatprep.mubr.msk.f32.mxu0 %vm8150_vm0, %v8151_v7  ;;  %6513 = vmatprep.mubr.msk.f32.mxu1 %vm8150_vm0, %v8151_v7 }
 0x3af   :  { %6467 = vmatmul.mubr.msk.f32.gmra.mrb[26].mxu0 %vm907_vm8, %v8711_v13  ;;  %6514 = vmatmul.mubr.msk.f32.gmra.mrb[52].mxu1 %vm907_vm8, %v8711_v13 }
 0x3b0   :  { %6469 = vmatprep.mubr.msk.f32.mxu0 %vm8150_vm0, %v8151_v7  ;;  %6516 = vmatprep.mubr.msk.f32.mxu1 %vm8150_vm0, %v8151_v7 }
 0x3b3   :  { %6470 = vmatmul.mubr.msk.f32.gmra.mrb[28].mxu0 %vm907_vm8, %v8722_v15  ;;  %6517 = vmatmul.mubr.msk.f32.gmra.mrb[54].mxu1 %vm907_vm8, %v8722_v15 }
 0x3b4   :  { %6472 = vmatprep.mubr.msk.f32.mxu0 %vm8150_vm0, %v8151_v7  ;;  %6519 = vmatprep.mubr.msk.f32.mxu1 %vm8150_vm0, %v8151_v7 }
 0x3b7   :  { %6473 = vmatmul.mubr.msk.f32.gmra.mrb[30].mxu0 %vm907_vm8, %v8732_v16  ;;  %6520 = vmatmul.mubr.msk.f32.gmra.mrb[56].mxu1 %vm907_vm8, %v8732_v16 }
 0x3b8   :  { %6612 = vmatprep.mubr.msk.f32.mxu1 %vm8150_vm0, %v8151_v7  ;;  %6548 = vmatprep.mubr.msk.f32.mxu0 %vm8150_vm0, %v8151_v7 }
 0x3bb   :  { %6613 = vmatmul.mubr.msk.f32.vlgmr.msra.gmra.mrb[58].mxu1 %vm907_vm8, %v8581_v27 }
 0x3bc   :  { %6615 = vmatprep.mubr.msk.f32.mxu1 %vm8150_vm0, %v8151_v7 }
 0x3bf   :  { %6616 = vmatmul.mubr.msk.f32.gmra.mrb[60].mxu1 %vm907_vm8, %v8595_v42 }
 0x3c0   :  { %6618 = vmatprep.mubr.msk.f32.mxu1 %vm8150_vm0, %v8151_v7 }
 0x3c3   :  { %6619 = vmatmul.mubr.msk.f32.gmra.mrb[62].mxu1 %vm907_vm8, %v8608_v46 }
 0x3c4   :  { %6621 = vmatprep.mubr.msk.f32.mxu1 %vm8150_vm0, %v8151_v7 }
 0x3c7   :  { %6622 = vmatmul.mubr.msk.f32.gmra.mrb[64].mxu1 %vm907_vm8, %v8623_v50 }
 0x3c8   :  { %6624 = vmatprep.mubr.msk.f32.mxu1 %vm8150_vm0, %v8151_v7 }
 0x3cb   :  { %6625 = vmatmul.mubr.msk.f32.gmra.mrb[66].mxu1 %vm907_vm8, %v8635_v54 }
 0x3cc   :  { %6627 = vmatprep.mubr.msk.f32.mxu1 %vm8150_vm0, %v8151_v7 }
 0x3cf   :  { %6628 = vmatmul.mubr.msk.f32.gmra.mrb[68].mxu1 %vm907_vm8, %v8647_v57 }
 0x3d0   :  { %6630 = vmatprep.mubr.msk.f32.mxu1 %vm8150_vm0, %v8151_v7 }
 0x3d3   :  { %6631 = vmatmul.mubr.msk.f32.gmra.mrb[70].mxu1 %vm907_vm8, %v8659_v61 }
 0x3d4   :  { %6633 = vmatprep.mubr.msk.f32.mxu1 %vm8150_vm0, %v8151_v7 }
 0x3d7   :  { %6634 = vmatmul.mubr.msk.f32.gmra.mrb[72].mxu1 %vm907_vm8, %v8672_v0 }
 0x3d8   :  { %6636 = vmatprep.mubr.msk.f32.mxu1 %vm8150_vm0, %v8151_v7 }
 0x3db   :  { %6637 = vmatmul.mubr.msk.f32.gmra.mrb[74].mxu1 %vm907_vm8, %v8685_v4 }
 0x3dc   :  { %6639 = vmatprep.mubr.msk.f32.mxu1 %vm8150_vm0, %v8151_v7 }
 0x3df   :  { %6640 = vmatmul.mubr.msk.f32.gmra.mrb[76].mxu1 %vm907_vm8, %v8698_v8 }
 0x3e0   :  { %6642 = vmatprep.mubr.msk.f32.mxu1 %vm8150_vm0, %v8151_v7 }
 0x3e3   :  { %6643 = vmatmul.mubr.msk.f32.gmra.mrb[78].mxu1 %vm907_vm8, %v8711_v13 }
 0x3e4   :  { %6645 = vmatprep.mubr.msk.f32.mxu1 %vm8150_vm0, %v8151_v7 }
 0x3e7   :  { %6646 = vmatmul.mubr.msk.f32.gmra.mrb[80].mxu1 %vm907_vm8, %v8722_v15 }
 0x3e8   :  { %6648 = vmatprep.mubr.msk.f32.mxu1 %vm8150_vm0, %v8151_v7 }
 0x3eb   :  { %6649 = vmatmul.mubr.msk.f32.gmra.mrb[82].mxu1 %vm907_vm8, %v8732_v16 }
 0x3ec   :  { %6765 = vmatprep.mubr.msk.f32.mxu1 %vm8150_vm0, %v8151_v7 }
 0x45a   :  { %v8794_v34 = vpop.f32.mrb[6].mxu0  ;;  %v1328_v35 = vpop.f32.mrb[32].mxu1 }
 0x45b   :  { %v6438_v36 = vpop.f32.mrb[7].mxu0  ;;  %v6485_v37 = vpop.f32.mrb[33].mxu1 }
 0x45e   :  { %v8796_v52 = vpop.f32.mrb[8].mxu0  ;;  %v1333_v60 = vpop.f32.mrb[34].mxu1 }
 0x45f   :  { %v7585_v12 = vpack.c.bf16 %v8796_v52, %v8794_v34  ;;  %v7567_v17 = vpack.c.bf16 %v1333_v60, %v1328_v35  ;;  %v6441_v22 = vpop.f32.mrb[9].mxu0  ;;  %v6488_v28 = vpop.f32.mrb[35].mxu1  ;;  %v5515_v34 = vld [vmem:[%s9943_s6 + $0x38] sm:$0xff] }
 0x461   :  { %7568 = vmatpush3.bf16.msra.mxu0 %v7567_v17 }
 0x462   :  { %v8800_v33 = vpop.f32.mrb[10].mxu0  ;;  %v1338_v38 = vpop.f32.mrb[36].mxu1  ;;  %7569 = vmatprep.subr.bf16.mxu0 %v8149_v3 }
 0x463   :  { %v6444_v39 = vpop.f32.mrb[11].mxu0  ;;  %v6491_v40 = vpop.f32.mrb[37].mxu1 }
 0x466   :  { %v8803_v18 = vpop.f32.mrb[12].mxu0  ;;  %v1343_v19 = vpop.f32.mrb[38].mxu1 }
 0x467   :  { %v7588_v20 = vpack.c.bf16 %v8803_v18, %v8800_v33  ;;  %v7570_v21 = vpack.c.bf16 %v1343_v19, %v1338_v38  ;;  %v6447_v24 = vpop.f32.mrb[13].mxu0  ;;  %v6494_v49 = vpop.f32.mrb[39].mxu1  ;;  %v5516_v33 = vld [vmem:[%s9943_s6 + $0x40] sm:$0xff] }
 0x469   :  { %7571 = vmatpush3.bf16.msra.mxu0 %v7570_v21 }
 0x46a   :  { %v8807_v25 = vpop.f32.mrb[14].mxu0  ;;  %v1348_v26 = vpop.f32.mrb[40].mxu1  ;;  %7572 = vmatprep.subr.bf16.mxu0 %v8149_v3 }
 0x46b   :  { %v6450_v29 = vpop.f32.mrb[15].mxu0  ;;  %v6497_v30 = vpop.f32.mrb[41].mxu1 }
 0x46e   :  { %v8810_v31 = vpop.f32.mrb[16].mxu0  ;;  %v1353_v32 = vpop.f32.mrb[42].mxu1 }
 0x46f   :  { %v7591_v41 = vpack.c.bf16 %v8810_v31, %v8807_v25  ;;  %v7573_v43 = vpack.c.bf16 %v1353_v32, %v1348_v26  ;;  %v6453_v44 = vpop.f32.mrb[17].mxu0  ;;  %v6500_v45 = vpop.f32.mrb[43].mxu1  ;;  %v5513_v32 = vld [vmem:[%s9943_s6 + $0x28] sm:$0xff] }
 0x470   :  { %v5514_v45 = vld [vmem:[%s9943_s6 + $0x30] sm:$0xff]  ;;  %v5517_v25 = vld [vmem:[%s9943_s6 + $0x48] sm:$0xf] }
 0x471   :  { %7574 = vmatpush3.bf16.msra.mxu0 %v7573_v43 }
 0x472   :  { %v8814_v47 = vpop.f32.mrb[18].mxu0  ;;  %v1358_v48 = vpop.f32.mrb[44].mxu1  ;;  %7575 = vmatprep.subr.bf16.mxu0 %v8149_v3 }
 0x473   :  { %v6456_v51 = vpop.f32.mrb[19].mxu0  ;;  %v6503_v53 = vpop.f32.mrb[45].mxu1 }
 0x476   :  { %v8817_v55 = vpop.f32.mrb[20].mxu0  ;;  %v1363_v56 = vpop.f32.mrb[46].mxu1 }
 0x477   :  { %v7594_v58 = vpack.c.bf16 %v8817_v55, %v8814_v47  ;;  %v7576_v59 = vpack.c.bf16 %v1363_v56, %v1358_v48  ;;  %v6459_v62 = vpop.f32.mrb[21].mxu0  ;;  %v6506_v63 = vpop.f32.mrb[47].mxu1 }
 0x479   :  { %7577 = vmatpush3.bf16.msra.mxu0 %v7576_v59  ;;  %v1066_v59 = vld [vmem:[%s9943_s6] sm:$0xff] }
 0x47a   :  { %v8821_v1 = vpop.f32.mrb[22].mxu0  ;;  %v1368_v2 = vpop.f32.mrb[48].mxu1  ;;  %7578 = vmatprep.subr.bf16.mxu0 %v8149_v3 }
 0x47b   :  { %v6462_v5 = vpop.f32.mrb[23].mxu0  ;;  %v6509_v6 = vpop.f32.mrb[49].mxu1 }
 0x47e   :  { %v1229_v10 = vpop.f32.mrb[24].mxu0  ;;  %v1373_v11 = vpop.f32.mrb[50].mxu1 }
 0x47f   :  { %v7597_v14 = vpack.c.bf16 %v1229_v10, %v8821_v1  ;;  %v7579_v35 = vpack.c.bf16 %v1373_v11, %v1368_v2  ;;  %v6465_v36 = vpop.f32.mrb[25].mxu0  ;;  %v6512_v37 = vpop.f32.mrb[51].mxu1  ;;  %v1067_v1 = vld [vmem:[%s9943_s6 + $0x8] sm:$0xff]  ;;  %v1068_v10 = vld [vmem:[%s9943_s6 + $0x10] sm:$0xff] }
 0x481   :  { %7580 = vmatpush3.bf16.msra.mxu0 %v7579_v35  ;;  %v1069_v35 = vld [vmem:[%s9943_s6 + $0x18] sm:$0xff] }
 0x482   :  { %v1234_v60 = vpop.f32.mrb[26].mxu0  ;;  %v1378_v17 = vpop.f32.mrb[52].mxu1  ;;  %7581 = vmatprep.subr.bf16.mxu0 %v8149_v3 }
 0x483   :  { %v6468_v22 = vpop.f32.mrb[27].mxu0  ;;  %v6515_v28 = vpop.f32.mrb[53].mxu1 }
 0x486   :  { %v1239_v38 = vpop.f32.mrb[28].mxu0  ;;  %v1383_v39 = vpop.f32.mrb[54].mxu1 }
 0x487   :  { %v7600_v40 = vpack.c.bf16 %v1239_v38, %v1234_v60  ;;  %v7582_v19 = vpack.c.bf16 %v1383_v39, %v1378_v17  ;;  %v6471_v21 = vpop.f32.mrb[29].mxu0  ;;  %v6518_v24 = vpop.f32.mrb[55].mxu1  ;;  %v1070_v17 = vld [vmem:[%s9943_s6 + $0x20] sm:$0xf] }
 0x488   :  { %v5583_v21 = vld [vmem:[%s9938_s3 + $0x68] sm:$0xff] }
 0x489   :  { %7583 = vmatpush3.bf16.msra.mxu0 %v7582_v19  ;;  %v5582_v19 = vld [vmem:[%s9938_s3 + $0x60] sm:$0xff] }
 0x48a   :  { %v1244_v49 = vpop.f32.mrb[30].mxu0  ;;  %v1388_v26 = vpop.f32.mrb[56].mxu1  ;;  %6546 = vmatprep.subr.mxu0 %v8151_v7 }
 0x48b   :  { %v6474_v29 = vpop.f32.mrb[31].mxu0  ;;  %v6521_v30 = vpop.f32.mrb[57].mxu1 }
 0x48c   :  { %v7628_v29 = vpack.c.bf16 %v5583_v21, %v5582_v19  ;;  %v5584_v30 = vld [vmem:[%s9938_s3 + $0x70] sm:$0xff] }
 0x48d   :  { %6547 = vmatpush3.msk.msra.mxu0 %vm1408_vm13, %v1388_v26  ;;  %v5548_v26 = vld [vmem:[%s9943_s6 + $0x50] sm:$0xff] }
 0x48e   :  { %6549 = vmatmul.mubr.msk.f32.vlgmr.msra.gmra.mrb[32].mxu0 %vm1392_vm14, %v5513_v32  ;;  %7584 = vmatprep.subr.bf16.mxu0 %v8149_v3  ;;  %v1690_v43 = vpop.f32.mrb[58].mxu1  ;;  %v5585_v32 = vld [vmem:[%s9938_s3 + $0x78] sm:$0x3f] }
 0x48f   :  { %7586 = vmatpush3.bf16.msra.mxu0 %v7585_v12  ;;  %v6614_v44 = vpop.f32.mrb[59].mxu1  ;;  %6551 = vmatprep.mubr.msk.f32.mxu0 %vm8150_vm0, %v8151_v7 }
 0x490   :  { %7587 = vmatprep.subr.bf16.mxu0 %v8149_v3  ;;  %v7631_v44 = vpack.c.bf16 %v5585_v32, %v5584_v30 }
 0x492   :  { %v1695_v48 = vpop.f32.mrb[60].mxu1  ;;  %6552 = vmatmul.mubr.msk.f32.gmra.mrb[34].mxu0 %vm1392_vm14, %v5514_v45  ;;  %v5550_v45 = vld [vmem:[%s9943_s6 + $0x60] sm:$0xff] }
 0x493   :  { %v7610_v51 = vpack.c.bf16 %v1695_v48, %v1690_v43  ;;  %7589 = vmatpush3.bf16.msra.mxu0 %v7588_v20  ;;  %v6617_v53 = vpop.f32.mrb[61].mxu1  ;;  %6554 = vmatprep.mubr.msk.f32.mxu0 %vm8150_vm0, %v8151_v7  ;;  %v5549_v43 = vld [vmem:[%s9943_s6 + $0x58] sm:$0xff]  ;;  %v5551_v48 = vld [vmem:[%s9943_s6 + $0x68] sm:$0xff] }
 0x494   :  { %7590 = vmatprep.subr.bf16.mxu0 %v8149_v3 }
 0x496   :  { %v1700_v52 = vpop.f32.mrb[62].mxu1  ;;  %6555 = vmatmul.mubr.msk.f32.gmra.mrb[36].mxu0 %vm1392_vm14, %v5515_v34 }
 0x497   :  { %7592 = vmatpush3.bf16.msra.mxu0 %v7591_v41  ;;  %v6620_v12 = vpop.f32.mrb[63].mxu1  ;;  %6557 = vmatprep.mubr.msk.f32.mxu0 %vm8150_vm0, %v8151_v7 }
 0x498   :  { %7593 = vmatprep.subr.bf16.mxu0 %v8149_v3 }
 0x49a   :  { %v1705_v18 = vpop.f32.mrb[64].mxu1  ;;  %6558 = vmatmul.mubr.msk.f32.gmra.mrb[38].mxu0 %vm1392_vm14, %v5516_v33 }
 0x49b   :  { %v7613_v20 = vpack.c.bf16 %v1705_v18, %v1700_v52  ;;  %7595 = vmatpush3.bf16.msra.mxu0 %v7594_v58  ;;  %v6623_v56 = vpop.f32.mrb[65].mxu1  ;;  %6560 = vmatprep.mubr.msk.f32.mxu0 %vm8150_vm0, %v8151_v7 }
 0x49c   :  { %7596 = vmatprep.subr.bf16.mxu0 %v8149_v3 }
 0x49e   :  { %v1710_v31 = vpop.f32.mrb[66].mxu1  ;;  %6561 = vmatmul.mubr.msk.f32.gmra.mrb[40].mxu0 %vm1392_vm14, %v5517_v25 }
 0x49f   :  { %7598 = vmatpush3.bf16.msra.mxu0 %v7597_v14  ;;  %v6626_v41 = vpop.f32.mrb[67].mxu1  ;;  %6589 = vmatprep.mubr.msk.f32.mxu0 %vm8150_vm0, %v8151_v7 }
 0x4a0   :  { %7599 = vmatprep.subr.bf16.mxu0 %v8149_v3 }
 0x4a2   :  { %v1715_v47 = vpop.f32.mrb[68].mxu1 }
 0x4a3   :  { %v7616_v55 = vpack.c.bf16 %v1715_v47, %v1710_v31  ;;  %7601 = vmatpush3.bf16.msra.mxu0 %v7600_v40  ;;  %v6629_v58 = vpop.f32.mrb[69].mxu1 }
 0x4a4   :  { %6587 = vmatprep.subr.mxu0 %v8151_v7 }
 0x4a6   :  { %v1720_v62 = vpop.f32.mrb[70].mxu1 }
 0x4a7   :  { %6588 = vmatpush3.msk.msra.mxu0 %vm1408_vm13, %v1244_v49  ;;  %v6632_v63 = vpop.f32.mrb[71].mxu1 }
 0x4a8   :  { %6590 = vmatmul.mubr.msk.f32.vlgmr.msra.gmra.mrb[42].mxu0 %vm1392_vm14, %v1066_v59  ;;  %7609 = vmatprep.subr.bf16.mxu0 %v8149_v3 }
 0x4a9   :  { %7611 = vmatpush3.bf16.msra.mxu0 %v7610_v51  ;;  %6592 = vmatprep.mubr.msk.f32.mxu0 %vm8150_vm0, %v8151_v7  ;;  %v5552_v51 = vld [vmem:[%s9943_s6 + $0x70] sm:$0xf] }
 0x4aa   :  { %v1725_v2 = vpop.f32.mrb[72].mxu1  ;;  %7612 = vmatprep.subr.bf16.mxu0 %v8149_v3 }
 0x4ab   :  { %v7619_v5 = vpack.c.bf16 %v1725_v2, %v1720_v62  ;;  %v6635_v6 = vpop.f32.mrb[73].mxu1 }
 0x4ac   :  { %6593 = vmatmul.mubr.msk.f32.gmra.mrb[44].mxu0 %vm1392_vm14, %v1067_v1 }
 0x4ad   :  { %7614 = vmatpush3.bf16.msra.mxu0 %v7613_v20  ;;  %6595 = vmatprep.mubr.msk.f32.mxu0 %vm8150_vm0, %v8151_v7 }
 0x4ae   :  { %v1730_v11 = vpop.f32.mrb[74].mxu1  ;;  %7615 = vmatprep.subr.bf16.mxu0 %v8149_v3 }
 0x4af   :  { %v6638_v14 = vpop.f32.mrb[75].mxu1 }
 0x4b0   :  { %6596 = vmatmul.mubr.msk.f32.gmra.mrb[46].mxu0 %vm1392_vm14, %v1068_v10 }
 0x4b1   :  { %7617 = vmatpush3.bf16.msra.mxu0 %v7616_v55  ;;  %6598 = vmatprep.mubr.msk.f32.mxu0 %vm8150_vm0, %v8151_v7 }
 0x4b2   :  { %v1735_v36 = vpop.f32.mrb[76].mxu1  ;;  %7618 = vmatprep.subr.bf16.mxu0 %v8149_v3 }
 0x4b3   :  { %v7622_v37 = vpack.c.bf16 %v1735_v36, %v1730_v11  ;;  %v6641_v60 = vpop.f32.mrb[77].mxu1 }
 0x4b4   :  { %6599 = vmatmul.mubr.msk.f32.gmra.mrb[48].mxu0 %vm1392_vm14, %v1069_v35 }
 0x4b5   :  { %7620 = vmatpush3.bf16.msra.mxu0 %v7619_v5  ;;  %6601 = vmatprep.mubr.msk.f32.mxu0 %vm8150_vm0, %v8151_v7 }
 0x4b6   :  { %v1740_v22 = vpop.f32.mrb[78].mxu1  ;;  %7621 = vmatprep.subr.bf16.mxu0 %v8149_v3 }
 0x4b7   :  { %v6644_v28 = vpop.f32.mrb[79].mxu1 }
 0x4b8   :  { %6602 = vmatmul.mubr.msk.f32.gmra.mrb[50].mxu0 %vm1392_vm14, %v1070_v17 }
 0x4b9   :  { %7623 = vmatpush3.bf16.msra.mxu0 %v7622_v37  ;;  %6677 = vmatprep.mubr.msk.f32.mxu0 %vm8150_vm0, %v8151_v7 }
 0x4ba   :  { %v1745_v38 = vpop.f32.mrb[80].mxu1  ;;  %7624 = vmatprep.subr.bf16.mxu0 %v8149_v3 }
 0x4bb   :  { %v7625_v39 = vpack.c.bf16 %v1745_v38, %v1740_v22  ;;  %v6647_v40 = vpop.f32.mrb[81].mxu1 }
 0x4bd   :  { %7626 = vmatpush3.bf16.msra.mxu0 %v7625_v39 }
 0x4be   :  { %v1750_v24 = vpop.f32.mrb[82].mxu1  ;;  %6675 = vmatprep.subr.mxu0 %v8151_v7 }
 0x4bf   :  { %v6650_v49 = vpop.f32.mrb[83].mxu1 }
 0x4c1   :  { %6676 = vmatpush3.msk.msra.mxu0 %vm1408_vm13, %v1750_v24 }
 0x4c2   :  { %6678 = vmatmul.mubr.msk.f32.vlgmr.msra.gmra.mrb[52].mxu0 %vm1392_vm14, %v5548_v26  ;;  %7627 = vmatprep.subr.bf16.mxu0 %v8149_v3 }
 0x4c3   :  { %6680 = vmatprep.mubr.msk.f32.mxu0 %vm8150_vm0, %v8151_v7  ;;  %7629 = vmatpush3.bf16.msra.mxu0 %v7628_v29 }
 0x4c4   :  { %7630 = vmatprep.subr.bf16.mxu0 %v8149_v3 }
 0x4c6   :  { %6681 = vmatmul.mubr.msk.f32.gmra.mrb[54].mxu0 %vm1392_vm14, %v5549_v43 }
 0x4c7   :  { %6683 = vmatprep.mubr.msk.f32.mxu0 %vm8150_vm0, %v8151_v7  ;;  %7633 = vmatpush3.bf16.msk.msra.mxu0 %vm8503_vm11, %v7631_v44 }
 0x4c8   :  { %7659 = vmatprep.subr.bf16.mxu0 %v8149_v3 }
 0x4ca   :  { %6684 = vmatmul.mubr.msk.f32.gmra.mrb[56].mxu0 %vm1392_vm14, %v5550_v45 }
 0x4cb   :  { %6686 = vmatprep.mubr.msk.f32.mxu0 %vm8150_vm0, %v8151_v7 }
 0x4ce   :  { %6687 = vmatmul.mubr.msk.f32.gmra.mrb[58].mxu0 %vm1392_vm14, %v5551_v48 }
 0x4cf   :  { %6689 = vmatprep.mubr.msk.f32.mxu0 %vm8150_vm0, %v8151_v7 }
 0x4d2   :  { %6690 = vmatmul.mubr.msk.f32.gmra.mrb[60].mxu0 %vm1392_vm14, %v5552_v51 }
 0x4d3   :  { %6700 = vmatprep.mubr.msk.f32.mxu0 %vm8150_vm0, %v8151_v7 }
 0x4d6   :  { %6701 = vmatmul.mubr.msk.f32.vlgmr.msra.gmra.mrb[62].mxu0 %vm907_vm8, %v8581_v27 }
 0x4d7   :  { %6703 = vmatprep.mubr.msk.f32.mxu0 %vm8150_vm0, %v8151_v7 }
 0x4da   :  { %6704 = vmatmul.mubr.msk.f32.gmra.mrb[64].mxu0 %vm907_vm8, %v8595_v42 }
 0x4db   :  { %6706 = vmatprep.mubr.msk.f32.mxu0 %vm8150_vm0, %v8151_v7 }
 0x4de   :  { %6707 = vmatmul.mubr.msk.f32.gmra.mrb[66].mxu0 %vm907_vm8, %v8608_v46 }
 0x4df   :  { %6709 = vmatprep.mubr.msk.f32.mxu0 %vm8150_vm0, %v8151_v7 }
 0x4e2   :  { %6710 = vmatmul.mubr.msk.f32.gmra.mrb[68].mxu0 %vm907_vm8, %v8623_v50 }
 0x4e3   :  { %6712 = vmatprep.mubr.msk.f32.mxu0 %vm8150_vm0, %v8151_v7 }
 0x4e6   :  { %6713 = vmatmul.mubr.msk.f32.gmra.mrb[70].mxu0 %vm907_vm8, %v8635_v54 }
 0x4e7   :  { %6715 = vmatprep.mubr.msk.f32.mxu0 %vm8150_vm0, %v8151_v7 }
 0x4ea   :  { %6716 = vmatmul.mubr.msk.f32.gmra.mrb[72].mxu0 %vm907_vm8, %v8647_v57 }
 0x4eb   :  { %6718 = vmatprep.mubr.msk.f32.mxu0 %vm8150_vm0, %v8151_v7 }
 0x4ee   :  { %6719 = vmatmul.mubr.msk.f32.gmra.mrb[74].mxu0 %vm907_vm8, %v8659_v61 }
 0x4ef   :  { %6721 = vmatprep.mubr.msk.f32.mxu0 %vm8150_vm0, %v8151_v7 }
 0x4f2   :  { %6722 = vmatmul.mubr.msk.f32.gmra.mrb[76].mxu0 %vm907_vm8, %v8672_v0 }
 0x4f3   :  { %6724 = vmatprep.mubr.msk.f32.mxu0 %vm8150_vm0, %v8151_v7 }
 0x4f6   :  { %6725 = vmatmul.mubr.msk.f32.gmra.mrb[78].mxu0 %vm907_vm8, %v8685_v4 }
 0x4f7   :  { %6727 = vmatprep.mubr.msk.f32.mxu0 %vm8150_vm0, %v8151_v7 }
 0x4fa   :  { %6728 = vmatmul.mubr.msk.f32.gmra.mrb[80].mxu0 %vm907_vm8, %v8698_v8 }
 0x4fb   :  { %6730 = vmatprep.mubr.msk.f32.mxu0 %vm8150_vm0, %v8151_v7 }
 0x4fe   :  { %6731 = vmatmul.mubr.msk.f32.gmra.mrb[82].mxu0 %vm907_vm8, %v8711_v13 }
 0x4ff   :  { %6733 = vmatprep.mubr.msk.f32.mxu0 %vm8150_vm0, %v8151_v7 }
 0x502   :  { %6734 = vmatmul.mubr.msk.f32.gmra.mrb[84].mxu0 %vm907_vm8, %v8722_v15 }
 0x503   :  { %6736 = vmatprep.mubr.msk.f32.mxu0 %vm8150_vm0, %v8151_v7 }
 0x506   :  { %6737 = vmatmul.mubr.msk.f32.gmra.mrb[86].mxu0 %vm907_vm8, %v8732_v16 }
 0x507   :  { %6853 = vmatprep.mubr.msk.f32.mxu0 %vm8150_vm0, %v8151_v7 }
 0x561   :  { %v1478_v53 = vpop.f32.mrb[32].mxu0 }
 0x562   :  { %v6550_v34 = vpop.f32.mrb[33].mxu0 }
 0x565   :  { %v1483_v52 = vpop.f32.mrb[34].mxu0 }
 0x566   :  { %v6553_v12 = vpop.f32.mrb[35].mxu0 }
 0x569   :  { %v1488_v33 = vpop.f32.mrb[36].mxu0 }
 0x56a   :  { %v6556_v18 = vpop.f32.mrb[37].mxu0 }
 0x56d   :  { %v1493_v20 = vpop.f32.mrb[38].mxu0 }
 0x56e   :  { %v6559_v56 = vpop.f32.mrb[39].mxu0 }
 0x571   :  { %v1498_v25 = vpop.f32.mrb[40].mxu0 }
 0x572   :  { %v6562_v31 = vpop.f32.mrb[41].mxu0 }
 0x57b   :  { %v1586_v41 = vpop.f32.mrb[42].mxu0 }
 0x57c   :  { %v1587_v47 = vadd.f32 %v1586_v41, %v1478_v53  ;;  %v6591_v55 = vpop.f32.mrb[43].mxu0 }
 0x57f   :  { %v1591_v58 = vpop.f32.mrb[44].mxu0 }
 0x580   :  { %v1592_v59 = vadd.f32 %v1591_v58, %v1483_v52  ;;  %v6594_v62 = vpop.f32.mrb[45].mxu0 }
 0x583   :  { %v1596_v63 = vpop.f32.mrb[46].mxu0 }
 0x584   :  { %v1597_v1 = vadd.f32 %v1596_v63, %v1488_v33  ;;  %v6597_v2 = vpop.f32.mrb[47].mxu0 }
 0x587   :  { %v1601_v5 = vpop.f32.mrb[48].mxu0 }
 0x588   :  { %v1602_v6 = vadd.f32 %v1601_v5, %v1493_v20  ;;  %v6600_v10 = vpop.f32.mrb[49].mxu0 }
 0x58b   :  { %v1606_v11 = vpop.f32.mrb[50].mxu0 }
 0x58c   :  { %v1607_v14 = vadd.f32 %v1606_v11, %v1498_v25  ;;  %v6603_v35 = vpop.f32.mrb[51].mxu0 }
 0x58d   :  { %v5612_v35 = vld [vmem:[%s9938_s3 + $0x88] sm:$0xff] }
 0x595   :  { %v1838_v36 = vpop.f32.mrb[52].mxu0 }
 0x596   :  { %v8977_v37 = vadd.f32 %v1838_v36, %v1587_v47  ;;  %v6679_v60 = vpop.f32.mrb[53].mxu0 }
 0x599   :  { %v1843_v17 = vpop.f32.mrb[54].mxu0 }
 0x59a   :  { %v8979_v22 = vadd.f32 %v1843_v17, %v1592_v59  ;;  %v6682_v28 = vpop.f32.mrb[55].mxu0  ;;  %v5577_v17 = vld [vmem:[%s9943_s6 + $0x78] sm:$0xff] }
 0x59d   :  { %v1848_v38 = vpop.f32.mrb[56].mxu0 }
 0x59e   :  { %v8981_v39 = vadd.f32 %v1848_v38, %v1597_v1  ;;  %v6685_v40 = vpop.f32.mrb[57].mxu0  ;;  %v5613_v38 = vld [vmem:[%s9938_s3 + $0x90] sm:$0xff] }
 0x59f   :  { %v5614_v40 = vld [vmem:[%s9938_s3 + $0x98] sm:$0x3f] }
 0x5a1   :  { %v1853_v19 = vpop.f32.mrb[58].mxu0 }
 0x5a2   :  { %v8983_v21 = vadd.f32 %v1853_v19, %v1602_v6  ;;  %v6688_v24 = vpop.f32.mrb[59].mxu0  ;;  %v5578_v19 = vld [vmem:[%s9943_s6 + $0x80] sm:$0xff] }
 0x5a3   :  { %v7656_v24 = vpack.c.bf16 %v5614_v40, %v5613_v38 }
 0x5a5   :  { %v1858_v49 = vpop.f32.mrb[60].mxu0 }
 0x5a6   :  { %v8985_v26 = vadd.f32 %v1858_v49, %v1607_v14  ;;  %v6691_v29 = vpop.f32.mrb[61].mxu0  ;;  %v5611_v14 = vld [vmem:[%s9938_s3 + $0x80] sm:$0xff]  ;;  %v5579_v49 = vld [vmem:[%s9943_s6 + $0x88] sm:$0xff] }
 0x5a7   :  { %v7653_v28 = vpack.c.bf16 %v5612_v35, %v5611_v14  ;;  %v5580_v29 = vld [vmem:[%s9943_s6 + $0x90] sm:$0xff] }
 0x5a9   :  { %v1947_v30 = vpop.f32.mrb[62].mxu0 }
 0x5aa   :  { %v6702_v32 = vpop.f32.mrb[63].mxu0 }
 0x5ad   :  { %v1952_v43 = vpop.f32.mrb[64].mxu0 }
 0x5ae   :  { %v7635_v44 = vpack.c.bf16 %v1952_v43, %v1947_v30  ;;  %v6705_v45 = vpop.f32.mrb[65].mxu0  ;;  %v5581_v30 = vld [vmem:[%s9943_s6 + $0x98] sm:$0xf] }
 0x5b0   :  { %7636 = vmatpush3.bf16.msra.mxu1 %v7635_v44 }
 0x5b1   :  { %v1957_v48 = vpop.f32.mrb[66].mxu0  ;;  %7637 = vmatprep.subr.bf16.mxu1 %v8149_v3 }
 0x5b2   :  { %v6708_v51 = vpop.f32.mrb[67].mxu0 }
 0x5b5   :  { %v1962_v53 = vpop.f32.mrb[68].mxu0 }
 0x5b6   :  { %v7638_v34 = vpack.c.bf16 %v1962_v53, %v1957_v48  ;;  %v6711_v52 = vpop.f32.mrb[69].mxu0 }
 0x5b8   :  { %7639 = vmatpush3.bf16.msra.mxu1 %v7638_v34 }
 0x5b9   :  { %v1967_v12 = vpop.f32.mrb[70].mxu0  ;;  %7640 = vmatprep.subr.bf16.mxu1 %v8149_v3 }
 0x5ba   :  { %v6714_v33 = vpop.f32.mrb[71].mxu0 }
 0x5bd   :  { %v1972_v18 = vpop.f32.mrb[72].mxu0 }
 0x5be   :  { %v7641_v20 = vpack.c.bf16 %v1972_v18, %v1967_v12  ;;  %v6717_v56 = vpop.f32.mrb[73].mxu0 }
 0x5c0   :  { %7642 = vmatpush3.bf16.msra.mxu1 %v7641_v20 }
 0x5c1   :  { %v1977_v25 = vpop.f32.mrb[74].mxu0  ;;  %7643 = vmatprep.subr.bf16.mxu1 %v8149_v3 }
 0x5c2   :  { %v6720_v31 = vpop.f32.mrb[75].mxu0 }
 0x5c5   :  { %v1982_v41 = vpop.f32.mrb[76].mxu0 }
 0x5c6   :  { %v7644_v47 = vpack.c.bf16 %v1982_v41, %v1977_v25  ;;  %v6723_v55 = vpop.f32.mrb[77].mxu0 }
 0x5c8   :  { %7645 = vmatpush3.bf16.msra.mxu1 %v7644_v47 }
 0x5c9   :  { %v1987_v58 = vpop.f32.mrb[78].mxu0  ;;  %7646 = vmatprep.subr.bf16.mxu1 %v8149_v3 }
 0x5ca   :  { %v6726_v59 = vpop.f32.mrb[79].mxu0 }
 0x5cd   :  { %v1992_v62 = vpop.f32.mrb[80].mxu0 }
 0x5ce   :  { %v7647_v63 = vpack.c.bf16 %v1992_v62, %v1987_v58  ;;  %v6729_v1 = vpop.f32.mrb[81].mxu0 }
 0x5d0   :  { %7648 = vmatpush3.bf16.msra.mxu1 %v7647_v63 }
 0x5d1   :  { %v1997_v2 = vpop.f32.mrb[82].mxu0  ;;  %7649 = vmatprep.subr.bf16.mxu1 %v8149_v3 }
 0x5d2   :  { %v6732_v5 = vpop.f32.mrb[83].mxu0 }
 0x5d5   :  { %v2002_v6 = vpop.f32.mrb[84].mxu0 }
 0x5d6   :  { %v7650_v10 = vpack.c.bf16 %v2002_v6, %v1997_v2  ;;  %v6735_v11 = vpop.f32.mrb[85].mxu0 }
 0x5d8   :  { %7651 = vmatpush3.bf16.msra.mxu1 %v7650_v10 }
 0x5d9   :  { %v2007_v36 = vpop.f32.mrb[86].mxu0  ;;  %6763 = vmatprep.subr.mxu1 %v8151_v7 }
 0x5da   :  { %v6738_v60 = vpop.f32.mrb[87].mxu0 }
 0x5dc   :  { %6764 = vmatpush3.msk.msra.mxu1 %vm1408_vm13, %v2007_v36 }
 0x5dd   :  { %6766 = vmatmul.mubr.msk.f32.vlgmr.msra.gmra.mrb[84].mxu1 %vm1392_vm14, %v5577_v17  ;;  %7652 = vmatprep.subr.bf16.mxu1 %v8149_v3 }
 0x5de   :  { %6768 = vmatprep.mubr.msk.f32.mxu1 %vm8150_vm0, %v8151_v7  ;;  %7654 = vmatpush3.bf16.msra.mxu1 %v7653_v28 }
 0x5df   :  { %7655 = vmatprep.subr.bf16.mxu1 %v8149_v3 }
 0x5e1   :  { %6769 = vmatmul.mubr.msk.f32.gmra.mrb[86].mxu1 %vm1392_vm14, %v5578_v19 }
 0x5e2   :  { %6771 = vmatprep.mubr.msk.f32.mxu1 %vm8150_vm0, %v8151_v7  ;;  %7658 = vmatpush3.bf16.msk.msra.mxu1 %vm8503_vm11, %v7656_v24 }
 0x5e3   :  { %7684 = vmatprep.subr.bf16.mxu1 %v8149_v3 }
 0x5e5   :  { %6772 = vmatmul.mubr.msk.f32.gmra.mrb[88].mxu1 %vm1392_vm14, %v5579_v49 }
 0x5e6   :  { %6774 = vmatprep.mubr.msk.f32.mxu1 %vm8150_vm0, %v8151_v7 }
 0x5e9   :  { %6775 = vmatmul.mubr.msk.f32.gmra.mrb[90].mxu1 %vm1392_vm14, %v5580_v29  ;;  %v5640_v29 = vld [vmem:[%s9938_s3 + $0xa0] sm:$0xff] }
 0x5ea   :  { %6777 = vmatprep.mubr.msk.f32.mxu1 %vm8150_vm0, %v8151_v7 }
 0x5ed   :  { %6778 = vmatmul.mubr.msk.f32.gmra.mrb[92].mxu1 %vm1392_vm14, %v5581_v30  ;;  %v5641_v30 = vld [vmem:[%s9938_s3 + $0xa8] sm:$0xff] }
 0x5ee   :  { %6788 = vmatprep.mubr.msk.f32.mxu1 %vm8150_vm0, %v8151_v7 }
 0x5f1   :  { %6789 = vmatmul.mubr.msk.f32.vlgmr.msra.gmra.mrb[94].mxu1 %vm907_vm8, %v8581_v27 }
 0x5f2   :  { %6791 = vmatprep.mubr.msk.f32.mxu1 %vm8150_vm0, %v8151_v7 }
 0x5f5   :  { %6792 = vmatmul.mubr.msk.f32.gmra.mrb[96].mxu1 %vm907_vm8, %v8595_v42 }
 0x5f6   :  { %6794 = vmatprep.mubr.msk.f32.mxu1 %vm8150_vm0, %v8151_v7 }
 0x5f9   :  { %6795 = vmatmul.mubr.msk.f32.gmra.mrb[98].mxu1 %vm907_vm8, %v8608_v46 }
 0x5fa   :  { %6797 = vmatprep.mubr.msk.f32.mxu1 %vm8150_vm0, %v8151_v7 }
 0x5fd   :  { %6798 = vmatmul.mubr.msk.f32.gmra.mrb[100].mxu1 %vm907_vm8, %v8623_v50 }
 0x5fe   :  { %6800 = vmatprep.mubr.msk.f32.mxu1 %vm8150_vm0, %v8151_v7 }
 0x601   :  { %6801 = vmatmul.mubr.msk.f32.gmra.mrb[102].mxu1 %vm907_vm8, %v8635_v54 }
 0x602   :  { %6803 = vmatprep.mubr.msk.f32.mxu1 %vm8150_vm0, %v8151_v7 }
 0x605   :  { %6804 = vmatmul.mubr.msk.f32.gmra.mrb[104].mxu1 %vm907_vm8, %v8647_v57 }
 0x606   :  { %6806 = vmatprep.mubr.msk.f32.mxu1 %vm8150_vm0, %v8151_v7 }
 0x609   :  { %6807 = vmatmul.mubr.msk.f32.gmra.mrb[106].mxu1 %vm907_vm8, %v8659_v61 }
 0x60a   :  { %6809 = vmatprep.mubr.msk.f32.mxu1 %vm8150_vm0, %v8151_v7 }
 0x60d   :  { %6810 = vmatmul.mubr.msk.f32.gmra.mrb[108].mxu1 %vm907_vm8, %v8672_v0 }
 0x60e   :  { %6812 = vmatprep.mubr.msk.f32.mxu1 %vm8150_vm0, %v8151_v7 }
 0x611   :  { %6813 = vmatmul.mubr.msk.f32.gmra.mrb[110].mxu1 %vm907_vm8, %v8685_v4 }
 0x612   :  { %6815 = vmatprep.mubr.msk.f32.mxu1 %vm8150_vm0, %v8151_v7 }
 0x615   :  { %6816 = vmatmul.mubr.msk.f32.gmra.mrb[112].mxu1 %vm907_vm8, %v8698_v8 }
 0x616   :  { %6818 = vmatprep.mubr.msk.f32.mxu1 %vm8150_vm0, %v8151_v7 }
 0x619   :  { %6819 = vmatmul.mubr.msk.f32.gmra.mrb[114].mxu1 %vm907_vm8, %v8711_v13 }
 0x61a   :  { %6821 = vmatprep.mubr.msk.f32.mxu1 %vm8150_vm0, %v8151_v7 }
 0x61d   :  { %6822 = vmatmul.mubr.msk.f32.gmra.mrb[116].mxu1 %vm907_vm8, %v8722_v15 }
 0x61e   :  { %6824 = vmatprep.mubr.msk.f32.mxu1 %vm8150_vm0, %v8151_v7 }
 0x621   :  { %6825 = vmatmul.mubr.msk.f32.gmra.mrb[118].mxu1 %vm907_vm8, %v8732_v16 }
 0x622   :  { %6941 = vmatprep.mubr.msk.f32.mxu1 %vm8150_vm0, %v8151_v7 }
 0x6b0   :  { %v2095_v32 = vpop.f32.mrb[84].mxu1 }
 0x6b1   :  { %v9076_v43 = vadd.f32 %v2095_v32, %v8977_v37  ;;  %v6767_v44 = vpop.f32.mrb[85].mxu1 }
 0x6b4   :  { %v2100_v45 = vpop.f32.mrb[86].mxu1 }
 0x6b5   :  { %v9079_v48 = vadd.f32 %v2100_v45, %v8979_v22  ;;  %v6770_v51 = vpop.f32.mrb[87].mxu1  ;;  %v5606_v45 = vld [vmem:[%s9943_s6 + $0xa0] sm:$0xff] }
 0x6b6   :  { %v7678_v51 = vpack.c.bf16 %v5641_v30, %v5640_v29 }
 0x6b8   :  { %v2105_v53 = vpop.f32.mrb[88].mxu1 }
 0x6b9   :  { %v9082_v34 = vadd.f32 %v2105_v53, %v8981_v39  ;;  %v6773_v52 = vpop.f32.mrb[89].mxu1  ;;  %v5642_v53 = vld [vmem:[%s9938_s3 + $0xb0] sm:$0xff] }
 0x6ba   :  { %v5643_v52 = vld [vmem:[%s9938_s3 + $0xb8] sm:$0x3f] }
 0x6bc   :  { %v2110_v12 = vpop.f32.mrb[90].mxu1 }
 0x6bd   :  { %v9085_v33 = vadd.f32 %v2110_v12, %v8983_v21  ;;  %v6776_v18 = vpop.f32.mrb[91].mxu1  ;;  %v5607_v12 = vld [vmem:[%s9943_s6 + $0xa8] sm:$0xff] }
 0x6be   :  { %v7681_v18 = vpack.c.bf16 %v5643_v52, %v5642_v53 }
 0x6c0   :  { %v2115_v20 = vpop.f32.mrb[92].mxu1 }
 0x6c1   :  { %v9088_v37 = vadd.f32 %v2115_v20, %v8985_v26  ;;  %v6779_v56 = vpop.f32.mrb[93].mxu1  ;;  %v5608_v20 = vld [vmem:[%s9943_s6 + $0xb0] sm:$0xff] }
 0x6c2   :  { %v5609_v56 = vld [vmem:[%s9943_s6 + $0xb8] sm:$0xff] }
 0x6c4   :  { %v2204_v25 = vpop.f32.mrb[94].mxu1 }
 0x6c5   :  { %v6790_v31 = vpop.f32.mrb[95].mxu1 }
 0x6c8   :  { %v2209_v22 = vpop.f32.mrb[96].mxu1 }
 0x6c9   :  { %v7660_v41 = vpack.c.bf16 %v2209_v22, %v2204_v25  ;;  %v6793_v47 = vpop.f32.mrb[97].mxu1  ;;  %v5610_v25 = vld [vmem:[%s9943_s6 + $0xc0] sm:$0xf] }
 0x6cb   :  { %7661 = vmatpush3.bf16.msra.mxu0 %v7660_v41 }
 0x6cc   :  { %v2214_v55 = vpop.f32.mrb[98].mxu1  ;;  %7662 = vmatprep.subr.bf16.mxu0 %v8149_v3 }
 0x6cd   :  { %v6796_v39 = vpop.f32.mrb[99].mxu1 }
 0x6d0   :  { %v2219_v58 = vpop.f32.mrb[100].mxu1 }
 0x6d1   :  { %v7663_v59 = vpack.c.bf16 %v2219_v58, %v2214_v55  ;;  %v6799_v21 = vpop.f32.mrb[101].mxu1 }
 0x6d3   :  { %7664 = vmatpush3.bf16.msra.mxu0 %v7663_v59 }
 0x6d4   :  { %v2224_v62 = vpop.f32.mrb[102].mxu1  ;;  %7665 = vmatprep.subr.bf16.mxu0 %v8149_v3 }
 0x6d5   :  { %v6802_v26 = vpop.f32.mrb[103].mxu1 }
 0x6d8   :  { %v2229_v63 = vpop.f32.mrb[104].mxu1 }
 0x6d9   :  { %v7666_v1 = vpack.c.bf16 %v2229_v63, %v2224_v62  ;;  %v6805_v2 = vpop.f32.mrb[105].mxu1 }
 0x6db   :  { %7667 = vmatpush3.bf16.msra.mxu0 %v7666_v1 }
 0x6dc   :  { %v2234_v5 = vpop.f32.mrb[106].mxu1  ;;  %7668 = vmatprep.subr.bf16.mxu0 %v8149_v3 }
 0x6dd   :  { %v6808_v6 = vpop.f32.mrb[107].mxu1 }
 0x6e0   :  { %v2239_v10 = vpop.f32.mrb[108].mxu1 }
 0x6e1   :  { %v7669_v11 = vpack.c.bf16 %v2239_v10, %v2234_v5  ;;  %v6811_v14 = vpop.f32.mrb[109].mxu1 }
 0x6e3   :  { %7670 = vmatpush3.bf16.msra.mxu0 %v7669_v11 }
 0x6e4   :  { %v2244_v35 = vpop.f32.mrb[110].mxu1  ;;  %7671 = vmatprep.subr.bf16.mxu0 %v8149_v3 }
 0x6e5   :  { %v6814_v36 = vpop.f32.mrb[111].mxu1 }
 0x6e8   :  { %v2249_v60 = vpop.f32.mrb[112].mxu1 }
 0x6e9   :  { %v7672_v17 = vpack.c.bf16 %v2249_v60, %v2244_v35  ;;  %v6817_v28 = vpop.f32.mrb[113].mxu1 }
 0x6eb   :  { %7673 = vmatpush3.bf16.msra.mxu0 %v7672_v17 }
 0x6ec   :  { %v2254_v38 = vpop.f32.mrb[114].mxu1  ;;  %7674 = vmatprep.subr.bf16.mxu0 %v8149_v3 }
 0x6ed   :  { %v6820_v40 = vpop.f32.mrb[115].mxu1 }
 0x6f0   :  { %v2259_v19 = vpop.f32.mrb[116].mxu1 }
 0x6f1   :  { %v7675_v24 = vpack.c.bf16 %v2259_v19, %v2254_v38  ;;  %v6823_v49 = vpop.f32.mrb[117].mxu1 }
 0x6f3   :  { %7676 = vmatpush3.bf16.msra.mxu0 %v7675_v24 }
 0x6f4   :  { %v2264_v32 = vpop.f32.mrb[118].mxu1  ;;  %6851 = vmatprep.subr.mxu0 %v8151_v7 }
 0x6f5   :  { %v6826_v44 = vpop.f32.mrb[119].mxu1 }
 0x6f7   :  { %6852 = vmatpush3.msk.msra.mxu0 %vm1408_vm13, %v2264_v32 }
 0x6f8   :  { %6854 = vmatmul.mubr.msk.f32.vlgmr.msra.gmra.mrb[88].mxu0 %vm1392_vm14, %v5606_v45  ;;  %7677 = vmatprep.subr.bf16.mxu0 %v8149_v3 }
 0x6f9   :  { %6856 = vmatprep.mubr.msk.f32.mxu0 %vm8150_vm0, %v8151_v7  ;;  %7679 = vmatpush3.bf16.msra.mxu0 %v7678_v51 }
 0x6fa   :  { %7680 = vmatprep.subr.bf16.mxu0 %v8149_v3 }
 0x6fc   :  { %6857 = vmatmul.mubr.msk.f32.gmra.mrb[90].mxu0 %vm1392_vm14, %v5607_v12 }
 0x6fd   :  { %6859 = vmatprep.mubr.msk.f32.mxu0 %vm8150_vm0, %v8151_v7  ;;  %7683 = vmatpush3.bf16.msk.msra.mxu0 %vm8503_vm11, %v7681_v18 }
 0x6fe   :  { %7709 = vmatprep.subr.bf16.mxu0 %v8149_v3 }
 0x700   :  { %6860 = vmatmul.mubr.msk.f32.gmra.mrb[92].mxu0 %vm1392_vm14, %v5608_v20 }
 0x701   :  { %6862 = vmatprep.mubr.msk.f32.mxu0 %vm8150_vm0, %v8151_v7 }
 0x704   :  { %6863 = vmatmul.mubr.msk.f32.gmra.mrb[94].mxu0 %vm1392_vm14, %v5609_v56  ;;  %v5669_v56 = vld [vmem:[%s9938_s3 + $0xc0] sm:$0xff] }
 0x705   :  { %6865 = vmatprep.mubr.msk.f32.mxu0 %vm8150_vm0, %v8151_v7 }
 0x708   :  { %6866 = vmatmul.mubr.msk.f32.gmra.mrb[96].mxu0 %vm1392_vm14, %v5610_v25  ;;  %v5670_v25 = vld [vmem:[%s9938_s3 + $0xc8] sm:$0xff] }
 0x709   :  { %6876 = vmatprep.mubr.msk.f32.mxu0 %vm8150_vm0, %v8151_v7 }
 0x70c   :  { %6877 = vmatmul.mubr.msk.f32.vlgmr.msra.gmra.mrb[98].mxu0 %vm907_vm8, %v8581_v27 }
 0x70d   :  { %6879 = vmatprep.mubr.msk.f32.mxu0 %vm8150_vm0, %v8151_v7 }
 0x710   :  { %6880 = vmatmul.mubr.msk.f32.gmra.mrb[100].mxu0 %vm907_vm8, %v8595_v42 }
 0x711   :  { %6882 = vmatprep.mubr.msk.f32.mxu0 %vm8150_vm0, %v8151_v7 }
 0x714   :  { %6883 = vmatmul.mubr.msk.f32.gmra.mrb[102].mxu0 %vm907_vm8, %v8608_v46 }
 0x715   :  { %6885 = vmatprep.mubr.msk.f32.mxu0 %vm8150_vm0, %v8151_v7 }
 0x718   :  { %6886 = vmatmul.mubr.msk.f32.gmra.mrb[104].mxu0 %vm907_vm8, %v8623_v50 }
 0x719   :  { %6888 = vmatprep.mubr.msk.f32.mxu0 %vm8150_vm0, %v8151_v7 }
 0x71c   :  { %6889 = vmatmul.mubr.msk.f32.gmra.mrb[106].mxu0 %vm907_vm8, %v8635_v54 }
 0x71d   :  { %6891 = vmatprep.mubr.msk.f32.mxu0 %vm8150_vm0, %v8151_v7 }
 0x720   :  { %6892 = vmatmul.mubr.msk.f32.gmra.mrb[108].mxu0 %vm907_vm8, %v8647_v57 }
 0x721   :  { %6894 = vmatprep.mubr.msk.f32.mxu0 %vm8150_vm0, %v8151_v7 }
 0x724   :  { %6895 = vmatmul.mubr.msk.f32.gmra.mrb[110].mxu0 %vm907_vm8, %v8659_v61 }
 0x725   :  { %6897 = vmatprep.mubr.msk.f32.mxu0 %vm8150_vm0, %v8151_v7 }
 0x728   :  { %6898 = vmatmul.mubr.msk.f32.gmra.mrb[112].mxu0 %vm907_vm8, %v8672_v0 }
 0x729   :  { %6900 = vmatprep.mubr.msk.f32.mxu0 %vm8150_vm0, %v8151_v7 }
 0x72c   :  { %6901 = vmatmul.mubr.msk.f32.gmra.mrb[114].mxu0 %vm907_vm8, %v8685_v4 }
 0x72d   :  { %6903 = vmatprep.mubr.msk.f32.mxu0 %vm8150_vm0, %v8151_v7 }
 0x730   :  { %6904 = vmatmul.mubr.msk.f32.gmra.mrb[116].mxu0 %vm907_vm8, %v8698_v8 }
 0x731   :  { %6906 = vmatprep.mubr.msk.f32.mxu0 %vm8150_vm0, %v8151_v7 }
 0x734   :  { %6907 = vmatmul.mubr.msk.f32.gmra.mrb[118].mxu0 %vm907_vm8, %v8711_v13 }
 0x735   :  { %6909 = vmatprep.mubr.msk.f32.mxu0 %vm8150_vm0, %v8151_v7 }
 0x738   :  { %6910 = vmatmul.mubr.msk.f32.gmra.mrb[120].mxu0 %vm907_vm8, %v8722_v15 }
 0x739   :  { %6912 = vmatprep.mubr.msk.f32.mxu0 %vm8150_vm0, %v8151_v7 }
 0x73c   :  { %6913 = vmatmul.mubr.msk.f32.gmra.mrb[122].mxu0 %vm907_vm8, %v8732_v16 }
 0x73d   :  { %7029 = vmatprep.mubr.msk.f32.mxu0 %vm8150_vm0, %v8151_v7 }
 0x7cb   :  { %v2352_v31 = vpop.f32.mrb[88].mxu0 }
 0x7cc   :  { %v9179_v22 = vadd.f32 %v2352_v31, %v9076_v43  ;;  %v6855_v41 = vpop.f32.mrb[89].mxu0 }
 0x7cf   :  { %v2357_v47 = vpop.f32.mrb[90].mxu0 }
 0x7d0   :  { %v9182_v55 = vadd.f32 %v2357_v47, %v9079_v48  ;;  %v6858_v39 = vpop.f32.mrb[91].mxu0  ;;  %v5635_v47 = vld [vmem:[%s9943_s6 + $0xc8] sm:$0xff] }
 0x7d1   :  { %v7703_v39 = vpack.c.bf16 %v5670_v25, %v5669_v56 }
 0x7d3   :  { %v2362_v58 = vpop.f32.mrb[92].mxu0 }
 0x7d4   :  { %v9185_v59 = vadd.f32 %v2362_v58, %v9082_v34  ;;  %v6861_v21 = vpop.f32.mrb[93].mxu0  ;;  %v5671_v58 = vld [vmem:[%s9938_s3 + $0xd0] sm:$0xff] }
 0x7d5   :  { %v5672_v21 = vld [vmem:[%s9938_s3 + $0xd8] sm:$0x3f] }
 0x7d7   :  { %v2367_v62 = vpop.f32.mrb[94].mxu0 }
 0x7d8   :  { %v9188_v26 = vadd.f32 %v2367_v62, %v9085_v33  ;;  %v6864_v63 = vpop.f32.mrb[95].mxu0  ;;  %v5636_v62 = vld [vmem:[%s9943_s6 + $0xd0] sm:$0xff] }
 0x7d9   :  { %v7706_v63 = vpack.c.bf16 %v5672_v21, %v5671_v58 }
 0x7db   :  { %v2372_v1 = vpop.f32.mrb[96].mxu0 }
 0x7dc   :  { %v9191_v43 = vadd.f32 %v2372_v1, %v9088_v37  ;;  %v6867_v2 = vpop.f32.mrb[97].mxu0  ;;  %v5637_v1 = vld [vmem:[%s9943_s6 + $0xd8] sm:$0xff] }
 0x7dd   :  { %v5638_v2 = vld [vmem:[%s9943_s6 + $0xe0] sm:$0xff] }
 0x7df   :  { %v2461_v5 = vpop.f32.mrb[98].mxu0 }
 0x7e0   :  { %v6878_v6 = vpop.f32.mrb[99].mxu0 }
 0x7e3   :  { %v2466_v48 = vpop.f32.mrb[100].mxu0 }
 0x7e4   :  { %v7685_v10 = vpack.c.bf16 %v2466_v48, %v2461_v5  ;;  %v6881_v11 = vpop.f32.mrb[101].mxu0  ;;  %v5639_v5 = vld [vmem:[%s9943_s6 + $0xe8] sm:$0xf] }
 0x7e6   :  { %7686 = vmatpush3.bf16.msra.mxu1 %v7685_v10 }
 0x7e7   :  { %v2471_v14 = vpop.f32.mrb[102].mxu0  ;;  %7687 = vmatprep.subr.bf16.mxu1 %v8149_v3 }
 0x7e8   :  { %v6884_v34 = vpop.f32.mrb[103].mxu0 }
 0x7eb   :  { %v2476_v35 = vpop.f32.mrb[104].mxu0 }
 0x7ec   :  { %v7688_v36 = vpack.c.bf16 %v2476_v35, %v2471_v14  ;;  %v6887_v33 = vpop.f32.mrb[105].mxu0 }
 0x7ee   :  { %7689 = vmatpush3.bf16.msra.mxu1 %v7688_v36 }
 0x7ef   :  { %v2481_v60 = vpop.f32.mrb[106].mxu0  ;;  %7690 = vmatprep.subr.bf16.mxu1 %v8149_v3 }
 0x7f0   :  { %v6890_v37 = vpop.f32.mrb[107].mxu0 }
 0x7f3   :  { %v2486_v17 = vpop.f32.mrb[108].mxu0 }
 0x7f4   :  { %v7691_v28 = vpack.c.bf16 %v2486_v17, %v2481_v60  ;;  %v6893_v38 = vpop.f32.mrb[109].mxu0 }
 0x7f6   :  { %7692 = vmatpush3.bf16.msra.mxu1 %v7691_v28 }
 0x7f7   :  { %v2491_v40 = vpop.f32.mrb[110].mxu0  ;;  %7693 = vmatprep.subr.bf16.mxu1 %v8149_v3 }
 0x7f8   :  { %v6896_v19 = vpop.f32.mrb[111].mxu0 }
 0x7fb   :  { %v2496_v24 = vpop.f32.mrb[112].mxu0 }
 0x7fc   :  { %v7694_v49 = vpack.c.bf16 %v2496_v24, %v2491_v40  ;;  %v6899_v29 = vpop.f32.mrb[113].mxu0 }
 0x7fe   :  { %7695 = vmatpush3.bf16.msra.mxu1 %v7694_v49 }
 0x7ff   :  { %v2501_v30 = vpop.f32.mrb[114].mxu0  ;;  %7696 = vmatprep.subr.bf16.mxu1 %v8149_v3 }
 0x800   :  { %v6902_v32 = vpop.f32.mrb[115].mxu0 }
 0x803   :  { %v2506_v44 = vpop.f32.mrb[116].mxu0 }
 0x804   :  { %v7697_v45 = vpack.c.bf16 %v2506_v44, %v2501_v30  ;;  %v6905_v51 = vpop.f32.mrb[117].mxu0 }
 0x806   :  { %7698 = vmatpush3.bf16.msra.mxu1 %v7697_v45 }
 0x807   :  { %v2511_v53 = vpop.f32.mrb[118].mxu0  ;;  %7699 = vmatprep.subr.bf16.mxu1 %v8149_v3 }
 0x808   :  { %v6908_v52 = vpop.f32.mrb[119].mxu0 }
 0x80b   :  { %v2516_v12 = vpop.f32.mrb[120].mxu0 }
 0x80c   :  { %v7700_v18 = vpack.c.bf16 %v2516_v12, %v2511_v53  ;;  %v6911_v20 = vpop.f32.mrb[121].mxu0 }
 0x80e   :  { %7701 = vmatpush3.bf16.msra.mxu1 %v7700_v18 }
 0x80f   :  { %v2521_v31 = vpop.f32.mrb[122].mxu0  ;;  %6939 = vmatprep.subr.mxu1 %v8151_v7 }
 0x810   :  { %v6914_v41 = vpop.f32.mrb[123].mxu0 }
 0x812   :  { %6940 = vmatpush3.msk.msra.mxu1 %vm1408_vm13, %v2521_v31 }
 0x813   :  { %6942 = vmatmul.mubr.msk.f32.vlgmr.msra.gmra.mrb[120].mxu1 %vm1392_vm14, %v5635_v47  ;;  %7702 = vmatprep.subr.bf16.mxu1 %v8149_v3 }
 0x814   :  { %6944 = vmatprep.mubr.msk.f32.mxu1 %vm8150_vm0, %v8151_v7  ;;  %7704 = vmatpush3.bf16.msra.mxu1 %v7703_v39 }
 0x815   :  { %7705 = vmatprep.subr.bf16.mxu1 %v8149_v3 }
 0x817   :  { %6945 = vmatmul.mubr.msk.f32.gmra.mrb[122].mxu1 %vm1392_vm14, %v5636_v62 }
 0x818   :  { %6947 = vmatprep.mubr.msk.f32.mxu1 %vm8150_vm0, %v8151_v7  ;;  %7708 = vmatpush3.bf16.msk.msra.mxu1 %vm8503_vm11, %v7706_v63 }
 0x819   :  { %7734 = vmatprep.subr.bf16.mxu1 %v8149_v3 }
 0x81b   :  { %6948 = vmatmul.mubr.msk.f32.gmra.mrb[124].mxu1 %vm1392_vm14, %v5637_v1 }
 0x81c   :  { %6950 = vmatprep.mubr.msk.f32.mxu1 %vm8150_vm0, %v8151_v7 }
 0x81f   :  { %6951 = vmatmul.mubr.msk.f32.gmra.mrb[126].mxu1 %vm1392_vm14, %v5638_v2  ;;  %v5698_v2 = vld [vmem:[%s9938_s3 + $0xe0] sm:$0xff] }
 0x820   :  { %6953 = vmatprep.mubr.msk.f32.mxu1 %vm8150_vm0, %v8151_v7 }
 0x823   :  { %6954 = vmatmul.mubr.msk.f32.gmra.mrb[128].mxu1 %vm1392_vm14, %v5639_v5  ;;  %v5699_v5 = vld [vmem:[%s9938_s3 + $0xe8] sm:$0xff] }
 0x824   :  { %6964 = vmatprep.mubr.msk.f32.mxu1 %vm8150_vm0, %v8151_v7 }
 0x827   :  { %6965 = vmatmul.mubr.msk.f32.vlgmr.msra.gmra.mrb[130].mxu1 %vm907_vm8, %v8581_v27 }
 0x828   :  { %6967 = vmatprep.mubr.msk.f32.mxu1 %vm8150_vm0, %v8151_v7 }
 0x82b   :  { %6968 = vmatmul.mubr.msk.f32.gmra.mrb[132].mxu1 %vm907_vm8, %v8595_v42 }
 0x82c   :  { %6970 = vmatprep.mubr.msk.f32.mxu1 %vm8150_vm0, %v8151_v7 }
 0x82f   :  { %6971 = vmatmul.mubr.msk.f32.gmra.mrb[134].mxu1 %vm907_vm8, %v8608_v46 }
 0x830   :  { %6973 = vmatprep.mubr.msk.f32.mxu1 %vm8150_vm0, %v8151_v7 }
 0x833   :  { %6974 = vmatmul.mubr.msk.f32.gmra.mrb[136].mxu1 %vm907_vm8, %v8623_v50 }
 0x834   :  { %6976 = vmatprep.mubr.msk.f32.mxu1 %vm8150_vm0, %v8151_v7 }
 0x837   :  { %6977 = vmatmul.mubr.msk.f32.gmra.mrb[138].mxu1 %vm907_vm8, %v8635_v54 }
 0x838   :  { %6979 = vmatprep.mubr.msk.f32.mxu1 %vm8150_vm0, %v8151_v7 }
 0x83b   :  { %6980 = vmatmul.mubr.msk.f32.gmra.mrb[140].mxu1 %vm907_vm8, %v8647_v57 }
 0x83c   :  { %6982 = vmatprep.mubr.msk.f32.mxu1 %vm8150_vm0, %v8151_v7 }
 0x83f   :  { %6983 = vmatmul.mubr.msk.f32.gmra.mrb[142].mxu1 %vm907_vm8, %v8659_v61 }
 0x840   :  { %6985 = vmatprep.mubr.msk.f32.mxu1 %vm8150_vm0, %v8151_v7 }
 0x843   :  { %6986 = vmatmul.mubr.msk.f32.gmra.mrb[144].mxu1 %vm907_vm8, %v8672_v0 }
 0x844   :  { %6988 = vmatprep.mubr.msk.f32.mxu1 %vm8150_vm0, %v8151_v7 }
 0x847   :  { %6989 = vmatmul.mubr.msk.f32.gmra.mrb[146].mxu1 %vm907_vm8, %v8685_v4 }
 0x848   :  { %6991 = vmatprep.mubr.msk.f32.mxu1 %vm8150_vm0, %v8151_v7 }
 0x84b   :  { %6992 = vmatmul.mubr.msk.f32.gmra.mrb[148].mxu1 %vm907_vm8, %v8698_v8 }
 0x84c   :  { %6994 = vmatprep.mubr.msk.f32.mxu1 %vm8150_vm0, %v8151_v7 }
 0x84f   :  { %6995 = vmatmul.mubr.msk.f32.gmra.mrb[150].mxu1 %vm907_vm8, %v8711_v13 }
 0x850   :  { %6997 = vmatprep.mubr.msk.f32.mxu1 %vm8150_vm0, %v8151_v7 }
 0x853   :  { %6998 = vmatmul.mubr.msk.f32.gmra.mrb[152].mxu1 %vm907_vm8, %v8722_v15 }
 0x854   :  { %7000 = vmatprep.mubr.msk.f32.mxu1 %vm8150_vm0, %v8151_v7 }
 0x857   :  { %7001 = vmatmul.mubr.msk.f32.gmra.mrb[154].mxu1 %vm907_vm8, %v8732_v16 }
 0x858   :  { %7117 = vmatprep.mubr.msk.f32.mxu1 %vm8150_vm0, %v8151_v7 }
 0x8e6   :  { %v2609_v6 = vpop.f32.mrb[120].mxu1 }
 0x8e7   :  { %v9282_v48 = vadd.f32 %v2609_v6, %v9179_v22  ;;  %v6943_v10 = vpop.f32.mrb[121].mxu1 }
 0x8ea   :  { %v2614_v11 = vpop.f32.mrb[122].mxu1 }
 0x8eb   :  { %v9285_v14 = vadd.f32 %v2614_v11, %v9182_v55  ;;  %v6946_v34 = vpop.f32.mrb[123].mxu1  ;;  %v5664_v11 = vld [vmem:[%s9943_s6 + $0xf0] sm:$0xff] }
 0x8ec   :  { %v7728_v34 = vpack.c.bf16 %v5699_v5, %v5698_v2 }
 0x8ee   :  { %v2619_v35 = vpop.f32.mrb[124].mxu1 }
 0x8ef   :  { %v9288_v36 = vadd.f32 %v2619_v35, %v9185_v59  ;;  %v6949_v33 = vpop.f32.mrb[125].mxu1  ;;  %v5700_v35 = vld [vmem:[%s9938_s3 + $0xf0] sm:$0xff] }
 0x8f0   :  { %v5701_v33 = vld [vmem:[%s9938_s3 + $0xf8] sm:$0x3f] }
 0x8f2   :  { %v2624_v60 = vpop.f32.mrb[126].mxu1 }
 0x8f3   :  { %v9291_v37 = vadd.f32 %v2624_v60, %v9188_v26  ;;  %v6952_v17 = vpop.f32.mrb[127].mxu1  ;;  %v5665_v60 = vld [vmem:[%s9943_s6 + $0xf8] sm:$0xff] }
 0x8f4   :  { %v7731_v17 = vpack.c.bf16 %v5701_v33, %v5700_v35 }
 0x8f6   :  { %v2629_v28 = vpop.f32.mrb[128].mxu1 }
 0x8f7   :  { %v9294_v22 = vadd.f32 %v2629_v28, %v9191_v43  ;;  %v6955_v38 = vpop.f32.mrb[129].mxu1  ;;  %v5666_v28 = vld [vmem:[%s9943_s6 + $0x100] sm:$0xff] }
 0x8f8   :  { %v5667_v38 = vld [vmem:[%s9943_s6 + $0x108] sm:$0xff] }
 0x8fa   :  { %v2718_v40 = vpop.f32.mrb[130].mxu1 }
 0x8fb   :  { %v6966_v19 = vpop.f32.mrb[131].mxu1 }
 0x8fe   :  { %v2723_v55 = vpop.f32.mrb[132].mxu1 }
 0x8ff   :  { %v7710_v24 = vpack.c.bf16 %v2723_v55, %v2718_v40  ;;  %v6969_v49 = vpop.f32.mrb[133].mxu1  ;;  %v5668_v40 = vld [vmem:[%s9943_s6 + $0x110] sm:$0xf] }
 0x901   :  { %7711 = vmatpush3.bf16.msra.mxu0 %v7710_v24 }
 0x902   :  { %v2728_v29 = vpop.f32.mrb[134].mxu1  ;;  %7712 = vmatprep.subr.bf16.mxu0 %v8149_v3 }
 0x903   :  { %v6972_v59 = vpop.f32.mrb[135].mxu1 }
 0x906   :  { %v2733_v30 = vpop.f32.mrb[136].mxu1 }
 0x907   :  { %v7713_v32 = vpack.c.bf16 %v2733_v30, %v2728_v29  ;;  %v6975_v26 = vpop.f32.mrb[137].mxu1 }
 0x909   :  { %7714 = vmatpush3.bf16.msra.mxu0 %v7713_v32 }
 0x90a   :  { %v2738_v44 = vpop.f32.mrb[138].mxu1  ;;  %7715 = vmatprep.subr.bf16.mxu0 %v8149_v3 }
 0x90b   :  { %v6978_v43 = vpop.f32.mrb[139].mxu1 }
 0x90e   :  { %v2743_v45 = vpop.f32.mrb[140].mxu1 }
 0x90f   :  { %v7716_v51 = vpack.c.bf16 %v2743_v45, %v2738_v44  ;;  %v6981_v53 = vpop.f32.mrb[141].mxu1 }
 0x911   :  { %7717 = vmatpush3.bf16.msra.mxu0 %v7716_v51 }
 0x912   :  { %v2748_v52 = vpop.f32.mrb[142].mxu1  ;;  %7718 = vmatprep.subr.bf16.mxu0 %v8149_v3 }
 0x913   :  { %v6984_v12 = vpop.f32.mrb[143].mxu1 }
 0x916   :  { %v2753_v18 = vpop.f32.mrb[144].mxu1 }
 0x917   :  { %v7719_v20 = vpack.c.bf16 %v2753_v18, %v2748_v52  ;;  %v6987_v56 = vpop.f32.mrb[145].mxu1 }
 0x919   :  { %7720 = vmatpush3.bf16.msra.mxu0 %v7719_v20 }
 0x91a   :  { %v2758_v25 = vpop.f32.mrb[146].mxu1  ;;  %7721 = vmatprep.subr.bf16.mxu0 %v8149_v3 }
 0x91b   :  { %v6990_v31 = vpop.f32.mrb[147].mxu1 }
 0x91e   :  { %v2763_v41 = vpop.f32.mrb[148].mxu1 }
 0x91f   :  { %v7722_v47 = vpack.c.bf16 %v2763_v41, %v2758_v25  ;;  %v6993_v39 = vpop.f32.mrb[149].mxu1 }
 0x921   :  { %7723 = vmatpush3.bf16.msra.mxu0 %v7722_v47 }
 0x922   :  { %v2768_v58 = vpop.f32.mrb[150].mxu1  ;;  %7724 = vmatprep.subr.bf16.mxu0 %v8149_v3 }
 0x923   :  { %v6996_v21 = vpop.f32.mrb[151].mxu1 }
 0x926   :  { %v2773_v62 = vpop.f32.mrb[152].mxu1 }
 0x927   :  { %v7725_v63 = vpack.c.bf16 %v2773_v62, %v2768_v58  ;;  %v6999_v1 = vpop.f32.mrb[153].mxu1 }
 0x929   :  { %7726 = vmatpush3.bf16.msra.mxu0 %v7725_v63 }
 0x92a   :  { %v2778_v6 = vpop.f32.mrb[154].mxu1  ;;  %7027 = vmatprep.subr.mxu0 %v8151_v7 }
 0x92b   :  { %v7002_v10 = vpop.f32.mrb[155].mxu1 }
 0x92d   :  { %7028 = vmatpush3.msk.msra.mxu0 %vm1408_vm13, %v2778_v6 }
 0x92e   :  { %7030 = vmatmul.mubr.msk.f32.vlgmr.msra.gmra.mrb[124].mxu0 %vm1392_vm14, %v5664_v11  ;;  %7727 = vmatprep.subr.bf16.mxu0 %v8149_v3 }
 0x92f   :  { %7032 = vmatprep.mubr.msk.f32.mxu0 %vm8150_vm0, %v8151_v7  ;;  %7729 = vmatpush3.bf16.msra.mxu0 %v7728_v34 }
 0x930   :  { %7730 = vmatprep.subr.bf16.mxu0 %v8149_v3 }
 0x932   :  { %7033 = vmatmul.mubr.msk.f32.gmra.mrb[126].mxu0 %vm1392_vm14, %v5665_v60 }
 0x933   :  { %7035 = vmatprep.mubr.msk.f32.mxu0 %vm8150_vm0, %v8151_v7  ;;  %7733 = vmatpush3.bf16.msk.msra.mxu0 %vm8503_vm11, %v7731_v17 }
 0x934   :  { %7759 = vmatprep.subr.bf16.mxu0 %v8149_v3 }
 0x936   :  { %7036 = vmatmul.mubr.msk.f32.gmra.mrb[128].mxu0 %vm1392_vm14, %v5666_v28 }
 0x937   :  { %7038 = vmatprep.mubr.msk.f32.mxu0 %vm8150_vm0, %v8151_v7 }
 0x93a   :  { %7039 = vmatmul.mubr.msk.f32.gmra.mrb[130].mxu0 %vm1392_vm14, %v5667_v38  ;;  %v5727_v38 = vld [vmem:[%s9938_s3 + $0x100] sm:$0xff] }
 0x93b   :  { %7041 = vmatprep.mubr.msk.f32.mxu0 %vm8150_vm0, %v8151_v7 }
 0x93e   :  { %7042 = vmatmul.mubr.msk.f32.gmra.mrb[132].mxu0 %vm1392_vm14, %v5668_v40  ;;  %v5728_v40 = vld [vmem:[%s9938_s3 + $0x108] sm:$0xff] }
 0x93f   :  { %7052 = vmatprep.mubr.msk.f32.mxu0 %vm8150_vm0, %v8151_v7 }
 0x942   :  { %7053 = vmatmul.mubr.msk.f32.vlgmr.msra.gmra.mrb[134].mxu0 %vm907_vm8, %v8581_v27 }
 0x943   :  { %7055 = vmatprep.mubr.msk.f32.mxu0 %vm8150_vm0, %v8151_v7 }
 0x946   :  { %7056 = vmatmul.mubr.msk.f32.gmra.mrb[136].mxu0 %vm907_vm8, %v8595_v42 }
 0x947   :  { %7058 = vmatprep.mubr.msk.f32.mxu0 %vm8150_vm0, %v8151_v7 }
 0x94a   :  { %7059 = vmatmul.mubr.msk.f32.gmra.mrb[138].mxu0 %vm907_vm8, %v8608_v46 }
 0x94b   :  { %7061 = vmatprep.mubr.msk.f32.mxu0 %vm8150_vm0, %v8151_v7 }
 0x94e   :  { %7062 = vmatmul.mubr.msk.f32.gmra.mrb[140].mxu0 %vm907_vm8, %v8623_v50 }
 0x94f   :  { %7064 = vmatprep.mubr.msk.f32.mxu0 %vm8150_vm0, %v8151_v7 }
 0x952   :  { %7065 = vmatmul.mubr.msk.f32.gmra.mrb[142].mxu0 %vm907_vm8, %v8635_v54 }
 0x953   :  { %7067 = vmatprep.mubr.msk.f32.mxu0 %vm8150_vm0, %v8151_v7 }
 0x956   :  { %7068 = vmatmul.mubr.msk.f32.gmra.mrb[144].mxu0 %vm907_vm8, %v8647_v57 }
 0x957   :  { %7070 = vmatprep.mubr.msk.f32.mxu0 %vm8150_vm0, %v8151_v7 }
 0x95a   :  { %7071 = vmatmul.mubr.msk.f32.gmra.mrb[146].mxu0 %vm907_vm8, %v8659_v61 }
 0x95b   :  { %7073 = vmatprep.mubr.msk.f32.mxu0 %vm8150_vm0, %v8151_v7 }
 0x95e   :  { %7074 = vmatmul.mubr.msk.f32.gmra.mrb[148].mxu0 %vm907_vm8, %v8672_v0 }
 0x95f   :  { %7076 = vmatprep.mubr.msk.f32.mxu0 %vm8150_vm0, %v8151_v7 }
 0x962   :  { %7077 = vmatmul.mubr.msk.f32.gmra.mrb[150].mxu0 %vm907_vm8, %v8685_v4 }
 0x963   :  { %7079 = vmatprep.mubr.msk.f32.mxu0 %vm8150_vm0, %v8151_v7 }
 0x966   :  { %7080 = vmatmul.mubr.msk.f32.gmra.mrb[152].mxu0 %vm907_vm8, %v8698_v8 }
 0x967   :  { %7082 = vmatprep.mubr.msk.f32.mxu0 %vm8150_vm0, %v8151_v7 }
 0x96a   :  { %7083 = vmatmul.mubr.msk.f32.gmra.mrb[154].mxu0 %vm907_vm8, %v8711_v13 }
 0x96b   :  { %7085 = vmatprep.mubr.msk.f32.mxu0 %vm8150_vm0, %v8151_v7 }
 0x96e   :  { %7086 = vmatmul.mubr.msk.f32.gmra.mrb[156].mxu0 %vm907_vm8, %v8722_v15 }
 0x96f   :  { %7088 = vmatprep.mubr.msk.f32.mxu0 %vm8150_vm0, %v8151_v7 }
 0x972   :  { %7089 = vmatmul.mubr.msk.f32.gmra.mrb[158].mxu0 %vm907_vm8, %v8732_v16 }
 0x973   :  { %7205 = vmatprep.mubr.msk.f32.mxu0 %vm8150_vm0, %v8151_v7 }
 0xa01   :  { %v2866_v19 = vpop.f32.mrb[124].mxu0 }
 0xa02   :  { %v9385_v55 = vadd.f32 %v2866_v19, %v9282_v48  ;;  %v7031_v24 = vpop.f32.mrb[125].mxu0 }
 0xa05   :  { %v2871_v49 = vpop.f32.mrb[126].mxu0 }
 0xa06   :  { %v9388_v29 = vadd.f32 %v2871_v49, %v9285_v14  ;;  %v7034_v59 = vpop.f32.mrb[127].mxu0  ;;  %v5693_v49 = vld [vmem:[%s9943_s6 + $0x118] sm:$0xff] }
 0xa07   :  { %v7753_v59 = vpack.c.bf16 %v5728_v40, %v5727_v38  ;;  %v5723_v38 = vld [vmem:[%s9943_s6 + $0x148] sm:$0xff]  ;;  %v5724_v40 = vld [vmem:[%s9943_s6 + $0x150] sm:$0xff] }
 0xa09   :  { %v2876_v30 = vpop.f32.mrb[128].mxu0 }
 0xa0a   :  { %v9391_v32 = vadd.f32 %v2876_v30, %v9288_v36  ;;  %v7037_v26 = vpop.f32.mrb[129].mxu0  ;;  %v5729_v30 = vld [vmem:[%s9938_s3 + $0x110] sm:$0xff] }
 0xa0b   :  { %v5730_v26 = vld [vmem:[%s9938_s3 + $0x118] sm:$0x3f] }
 0xa0d   :  { %v2881_v44 = vpop.f32.mrb[130].mxu0 }
 0xa0e   :  { %v9394_v43 = vadd.f32 %v2881_v44, %v9291_v37  ;;  %v7040_v45 = vpop.f32.mrb[131].mxu0  ;;  %v5694_v44 = vld [vmem:[%s9943_s6 + $0x120] sm:$0xff] }
 0xa0f   :  { %v7756_v45 = vpack.c.bf16 %v5730_v26, %v5729_v30 }
 0xa11   :  { %v2886_v51 = vpop.f32.mrb[132].mxu0 }
 0xa12   :  { %v9397_v48 = vadd.f32 %v2886_v51, %v9294_v22  ;;  %v7043_v53 = vpop.f32.mrb[133].mxu0  ;;  %v5695_v51 = vld [vmem:[%s9943_s6 + $0x128] sm:$0xff] }
 0xa13   :  { %v5696_v53 = vld [vmem:[%s9943_s6 + $0x130] sm:$0xff] }
 0xa15   :  { %v2975_v52 = vpop.f32.mrb[134].mxu0 }
 0xa16   :  { %v7054_v12 = vpop.f32.mrb[135].mxu0 }
 0xa19   :  { %v2980_v14 = vpop.f32.mrb[136].mxu0 }
 0xa1a   :  { %v7735_v18 = vpack.c.bf16 %v2980_v14, %v2975_v52  ;;  %v7057_v20 = vpop.f32.mrb[137].mxu0  ;;  %v5697_v52 = vld [vmem:[%s9943_s6 + $0x138] sm:$0xf] }
 0xa1c   :  { %7736 = vmatpush3.bf16.msra.mxu1 %v7735_v18 }
 0xa1d   :  { %v2985_v56 = vpop.f32.mrb[138].mxu0  ;;  %7737 = vmatprep.subr.bf16.mxu1 %v8149_v3 }
 0xa1e   :  { %v7060_v36 = vpop.f32.mrb[139].mxu0 }
 0xa21   :  { %v2990_v25 = vpop.f32.mrb[140].mxu0 }
 0xa22   :  { %v7738_v31 = vpack.c.bf16 %v2990_v25, %v2985_v56  ;;  %v7063_v37 = vpop.f32.mrb[141].mxu0 }
 0xa24   :  { %7739 = vmatpush3.bf16.msra.mxu1 %v7738_v31 }
 0xa25   :  { %v2995_v41 = vpop.f32.mrb[142].mxu0  ;;  %7740 = vmatprep.subr.bf16.mxu1 %v8149_v3 }
 0xa26   :  { %v7066_v22 = vpop.f32.mrb[143].mxu0 }
 0xa29   :  { %v3000_v47 = vpop.f32.mrb[144].mxu0 }
 0xa2a   :  { %v7741_v39 = vpack.c.bf16 %v3000_v47, %v2995_v41  ;;  %v7069_v58 = vpop.f32.mrb[145].mxu0 }
 0xa2c   :  { %7742 = vmatpush3.bf16.msra.mxu1 %v7741_v39 }
 0xa2d   :  { %v3005_v21 = vpop.f32.mrb[146].mxu0  ;;  %7743 = vmatprep.subr.bf16.mxu1 %v8149_v3 }
 0xa2e   :  { %v7072_v62 = vpop.f32.mrb[147].mxu0 }
 0xa31   :  { %v3010_v63 = vpop.f32.mrb[148].mxu0 }
 0xa32   :  { %v7744_v1 = vpack.c.bf16 %v3010_v63, %v3005_v21  ;;  %v7075_v2 = vpop.f32.mrb[149].mxu0 }
 0xa34   :  { %7745 = vmatpush3.bf16.msra.mxu1 %v7744_v1 }
 0xa35   :  { %v3015_v5 = vpop.f32.mrb[150].mxu0  ;;  %7746 = vmatprep.subr.bf16.mxu1 %v8149_v3 }
 0xa36   :  { %v7078_v6 = vpop.f32.mrb[151].mxu0 }
 0xa39   :  { %v3020_v10 = vpop.f32.mrb[152].mxu0 }
 0xa3a   :  { %v7747_v11 = vpack.c.bf16 %v3020_v10, %v3015_v5  ;;  %v7081_v34 = vpop.f32.mrb[153].mxu0 }
 0xa3c   :  { %7748 = vmatpush3.bf16.msra.mxu1 %v7747_v11 }
 0xa3d   :  { %v3025_v35 = vpop.f32.mrb[154].mxu0  ;;  %7749 = vmatprep.subr.bf16.mxu1 %v8149_v3 }
 0xa3e   :  { %v7084_v33 = vpop.f32.mrb[155].mxu0 }
 0xa41   :  { %v3030_v60 = vpop.f32.mrb[156].mxu0 }
 0xa42   :  { %v7750_v17 = vpack.c.bf16 %v3030_v60, %v3025_v35  ;;  %v7087_v28 = vpop.f32.mrb[157].mxu0 }
 0xa43   :  { %v5722_v28 = vld [vmem:[%s9943_s6 + $0x140] sm:$0xff] }
 0xa44   :  { %7751 = vmatpush3.bf16.msra.mxu1 %v7750_v17 }
 0xa45   :  { %v3035_v19 = vpop.f32.mrb[158].mxu0  ;;  %7115 = vmatprep.subr.mxu1 %v8151_v7 }
 0xa46   :  { %v7090_v24 = vpop.f32.mrb[159].mxu0 }
 0xa47   :  { %v5726_v24 = vld [vmem:[%s9943_s6 + $0x160] sm:$0xf] }
 0xa48   :  { %7116 = vmatpush3.msk.msra.mxu1 %vm1408_vm13, %v3035_v19  ;;  %v5725_v19 = vld [vmem:[%s9943_s6 + $0x158] sm:$0xff] }
 0xa49   :  { %7118 = vmatmul.mubr.msk.f32.vlgmr.msra.gmra.mrb[156].mxu1 %vm1392_vm14, %v5693_v49  ;;  %7752 = vmatprep.subr.bf16.mxu1 %v8149_v3  ;;  %v3503_v49 = vld [vmem:[%s9944_s12] sm:$0xff] }
 0xa4a   :  { %7120 = vmatprep.mubr.msk.f32.mxu1 %vm8150_vm0, %v8151_v7  ;;  %7754 = vmatpush3.bf16.msra.mxu1 %v7753_v59  ;;  %v3504_v59 = vld [vmem:[%s9944_s12 + $0x8] sm:$0x3] }
 0xa4b   :  { %7755 = vmatprep.subr.bf16.mxu1 %v8149_v3  ;;  %v7778_v30 = vpack.c.bf16 %v3504_v59, %v3503_v49 }
 0xa4d   :  { %7121 = vmatmul.mubr.msk.f32.gmra.mrb[158].mxu1 %vm1392_vm14, %v5694_v44 }
 0xa4e   :  { %7123 = vmatprep.mubr.msk.f32.mxu1 %vm8150_vm0, %v8151_v7  ;;  %7758 = vmatpush3.bf16.msk.msra.mxu1 %vm8503_vm11, %v7756_v45 }
 0xa4f   :  { %7785 = vmatprep.subr.bf16.mxu1 %v8149_v3 }
 0xa51   :  { %7124 = vmatmul.mubr.msk.f32.gmra.mrb[160].mxu1 %vm1392_vm14, %v5695_v51 }
 0xa52   :  { %7126 = vmatprep.mubr.msk.f32.mxu1 %vm8150_vm0, %v8151_v7 }
 0xa55   :  { %7127 = vmatmul.mubr.msk.f32.gmra.mrb[162].mxu1 %vm1392_vm14, %v5696_v53  ;;  %v5751_v53 = vld [vmem:[%s9945_s15] ss:$0 sm:$0xff] }
 0xa56   :  { %7129 = vmatprep.mubr.msk.f32.mxu1 %vm8150_vm0, %v8151_v7 }
 0xa59   :  { %7130 = vmatmul.mubr.msk.f32.gmra.mrb[164].mxu1 %vm1392_vm14, %v5697_v52 }
 0xa5a   :  { %7140 = vmatprep.mubr.msk.f32.mxu1 %vm8150_vm0, %v8151_v7 }
 0xa5d   :  { %7141 = vmatmul.mubr.msk.f32.vlgmr.msra.gmra.mrb[166].mxu1 %vm907_vm8, %v8581_v27 }
 0xa5e   :  { %7143 = vmatprep.mubr.msk.f32.mxu1 %vm8150_vm0, %v8151_v7 }
 0xa61   :  { %7144 = vmatmul.mubr.msk.f32.gmra.mrb[168].mxu1 %vm907_vm8, %v8595_v42 }
 0xa62   :  { %7146 = vmatprep.mubr.msk.f32.mxu1 %vm8150_vm0, %v8151_v7 }
 0xa65   :  { %7147 = vmatmul.mubr.msk.f32.gmra.mrb[170].mxu1 %vm907_vm8, %v8608_v46 }
 0xa66   :  { %7149 = vmatprep.mubr.msk.f32.mxu1 %vm8150_vm0, %v8151_v7 }
 0xa69   :  { %7150 = vmatmul.mubr.msk.f32.gmra.mrb[172].mxu1 %vm907_vm8, %v8623_v50 }
 0xa6a   :  { %7152 = vmatprep.mubr.msk.f32.mxu1 %vm8150_vm0, %v8151_v7 }
 0xa6d   :  { %7153 = vmatmul.mubr.msk.f32.gmra.mrb[174].mxu1 %vm907_vm8, %v8635_v54 }
 0xa6e   :  { %7155 = vmatprep.mubr.msk.f32.mxu1 %vm8150_vm0, %v8151_v7 }
 0xa71   :  { %7156 = vmatmul.mubr.msk.f32.gmra.mrb[176].mxu1 %vm907_vm8, %v8647_v57 }
 0xa72   :  { %7158 = vmatprep.mubr.msk.f32.mxu1 %vm8150_vm0, %v8151_v7 }
 0xa75   :  { %7159 = vmatmul.mubr.msk.f32.gmra.mrb[178].mxu1 %vm907_vm8, %v8659_v61 }
 0xa76   :  { %7161 = vmatprep.mubr.msk.f32.mxu1 %vm8150_vm0, %v8151_v7 }
 0xa79   :  { %7162 = vmatmul.mubr.msk.f32.gmra.mrb[180].mxu1 %vm907_vm8, %v8672_v0 }
 0xa7a   :  { %7164 = vmatprep.mubr.msk.f32.mxu1 %vm8150_vm0, %v8151_v7 }
 0xa7d   :  { %7165 = vmatmul.mubr.msk.f32.gmra.mrb[182].mxu1 %vm907_vm8, %v8685_v4 }
 0xa7e   :  { %7167 = vmatprep.mubr.msk.f32.mxu1 %vm8150_vm0, %v8151_v7 }
 0xa81   :  { %7168 = vmatmul.mubr.msk.f32.gmra.mrb[184].mxu1 %vm907_vm8, %v8698_v8 }
 0xa82   :  { %7170 = vmatprep.mubr.msk.f32.mxu1 %vm8150_vm0, %v8151_v7 }
 0xa85   :  { %7171 = vmatmul.mubr.msk.f32.gmra.mrb[186].mxu1 %vm907_vm8, %v8711_v13 }
 0xa86   :  { %7173 = vmatprep.mubr.msk.f32.mxu1 %vm8150_vm0, %v8151_v7 }
 0xa89   :  { %7174 = vmatmul.mubr.msk.f32.gmra.mrb[188].mxu1 %vm907_vm8, %v8722_v15 }
 0xa8a   :  { %7176 = vmatprep.mubr.msk.f32.mxu1 %vm8150_vm0, %v8151_v7 }
 0xa8d   :  { %7177 = vmatmul.mubr.msk.f32.gmra.mrb[190].mxu1 %vm907_vm8, %v8732_v16 }
 0xa8e   :  { %7268 = vmatprep.mubr.msk.f32.mxu1 %vm8150_vm0, %v8151_v7 }
 0xb1c   :  { %v3123_v9 = vpop.f32.mrb[156].mxu1 }
 0xb1d   :  { %v9488_v27 = vadd.f32 %v3123_v9, %v9385_v55  ;;  %v7119_v42 = vpop.f32.mrb[157].mxu1 }
 0xb20   :  { %v3128_v46 = vpop.f32.mrb[158].mxu1 }
 0xb21   :  { %v9491_v50 = vadd.f32 %v3128_v46, %v9388_v29  ;;  %v7122_v54 = vpop.f32.mrb[159].mxu1 }
 0xb24   :  { %v3133_v57 = vpop.f32.mrb[160].mxu1 }
 0xb25   :  { %v9494_v61 = vadd.f32 %v3133_v57, %v9391_v32  ;;  %v7125_v0 = vpop.f32.mrb[161].mxu1 }
 0xb28   :  { %v3138_v4 = vpop.f32.mrb[162].mxu1 }
 0xb29   :  { %v9497_v8 = vadd.f32 %v3138_v4, %v9394_v43  ;;  %v7128_v13 = vpop.f32.mrb[163].mxu1 }
 0xb2c   :  { %v3143_v15 = vpop.f32.mrb[164].mxu1 }
 0xb2d   :  { %v9500_v16 = vadd.f32 %v3143_v15, %v9397_v48  ;;  %v7131_v55 = vpop.f32.mrb[165].mxu1 }
 0xb30   :  { %v3232_v12 = vpop.f32.mrb[166].mxu1 }
 0xb31   :  { %v7142_v14 = vpop.f32.mrb[167].mxu1 }
 0xb34   :  { %v3237_v29 = vpop.f32.mrb[168].mxu1 }
 0xb35   :  { %v7760_v18 = vpack.c.bf16 %v3237_v29, %v3232_v12  ;;  %v7145_v20 = vpop.f32.mrb[169].mxu1 }
 0xb37   :  { %7761 = vmatpush3.bf16.msra.mxu0 %v7760_v18 }
 0xb38   :  { %v3242_v56 = vpop.f32.mrb[170].mxu1  ;;  %7762 = vmatprep.subr.bf16.mxu0 %v8149_v3 }
 0xb39   :  { %v7148_v32 = vpop.f32.mrb[171].mxu1 }
 0xb3c   :  { %v3247_v36 = vpop.f32.mrb[172].mxu1 }
 0xb3d   :  { %v7763_v25 = vpack.c.bf16 %v3247_v36, %v3242_v56  ;;  %v7151_v43 = vpop.f32.mrb[173].mxu1 }
 0xb3f   :  { %7764 = vmatpush3.bf16.msra.mxu0 %v7763_v25 }
 0xb40   :  { %v3252_v31 = vpop.f32.mrb[174].mxu1  ;;  %7765 = vmatprep.subr.bf16.mxu0 %v8149_v3 }
 0xb41   :  { %v7154_v48 = vpop.f32.mrb[175].mxu1 }
 0xb44   :  { %v3257_v37 = vpop.f32.mrb[176].mxu1 }
 0xb45   :  { %v7766_v41 = vpack.c.bf16 %v3257_v37, %v3252_v31  ;;  %v7157_v22 = vpop.f32.mrb[177].mxu1 }
 0xb47   :  { %7767 = vmatpush3.bf16.msra.mxu0 %v7766_v41 }
 0xb48   :  { %v3262_v47 = vpop.f32.mrb[178].mxu1  ;;  %7768 = vmatprep.subr.bf16.mxu0 %v8149_v3 }
 0xb49   :  { %v7160_v39 = vpop.f32.mrb[179].mxu1 }
 0xb4c   :  { %v3267_v58 = vpop.f32.mrb[180].mxu1 }
 0xb4d   :  { %v7769_v21 = vpack.c.bf16 %v3267_v58, %v3262_v47  ;;  %v7163_v62 = vpop.f32.mrb[181].mxu1 }
 0xb4f   :  { %7770 = vmatpush3.bf16.msra.mxu0 %v7769_v21 }
 0xb50   :  { %v3272_v63 = vpop.f32.mrb[182].mxu1  ;;  %7771 = vmatprep.subr.bf16.mxu0 %v8149_v3 }
 0xb51   :  { %v7166_v1 = vpop.f32.mrb[183].mxu1 }
 0xb54   :  { %v3277_v2 = vpop.f32.mrb[184].mxu1 }
 0xb55   :  { %v7772_v5 = vpack.c.bf16 %v3277_v2, %v3272_v63  ;;  %v7169_v6 = vpop.f32.mrb[185].mxu1 }
 0xb57   :  { %7773 = vmatpush3.bf16.msra.mxu0 %v7772_v5 }
 0xb58   :  { %v3282_v10 = vpop.f32.mrb[186].mxu1  ;;  %7774 = vmatprep.subr.bf16.mxu0 %v8149_v3 }
 0xb59   :  { %v7172_v11 = vpop.f32.mrb[187].mxu1 }
 0xb5c   :  { %v3287_v34 = vpop.f32.mrb[188].mxu1 }
 0xb5d   :  { %v7775_v35 = vpack.c.bf16 %v3287_v34, %v3282_v10  ;;  %v7175_v33 = vpop.f32.mrb[189].mxu1 }
 0xb5f   :  { %7776 = vmatpush3.bf16.msra.mxu0 %v7775_v35 }
 0xb60   :  { %v3292_v60 = vpop.f32.mrb[190].mxu1  ;;  %7203 = vmatprep.subr.mxu0 %v8151_v7 }
 0xb61   :  { %v7178_v17 = vpop.f32.mrb[191].mxu1 }
 0xb63   :  { %7204 = vmatpush3.msk.msra.mxu0 %vm1408_vm13, %v3292_v60 }
 0xb64   :  { %7206 = vmatmul.mubr.msk.f32.vlgmr.msra.gmra.mrb[160].mxu0 %vm1392_vm14, %v5722_v28  ;;  %7777 = vmatprep.subr.bf16.mxu0 %v8149_v3 }
 0xb65   :  { %7208 = vmatprep.mubr.msk.f32.mxu0 %vm8150_vm0, %v8151_v7  ;;  %7780 = vmatpush3.bf16.msk.msra.mxu0 %vm9533_vm2, %v7778_v30 }
 0xb66   :  { %7781 = vmatprep.subr.bf16.mxu0 %v8149_v3 }
 0xb68   :  { %7209 = vmatmul.mubr.msk.f32.gmra.mrb[162].mxu0 %vm1392_vm14, %v5723_v38 }
 0xb69   :  { %7211 = vmatprep.mubr.msk.f32.mxu0 %vm8150_vm0, %v8151_v7 }
 0xb6c   :  { %7212 = vmatmul.mubr.msk.f32.gmra.mrb[164].mxu0 %vm1392_vm14, %v5724_v40 }
 0xb6d   :  { %7214 = vmatprep.mubr.msk.f32.mxu0 %vm8150_vm0, %v8151_v7 }
 0xb70   :  { %7215 = vmatmul.mubr.msk.f32.gmra.mrb[166].mxu0 %vm1392_vm14, %v5725_v19 }
 0xb71   :  { %7217 = vmatprep.mubr.msk.f32.mxu0 %vm8150_vm0, %v8151_v7 }
 0xb74   :  { %7218 = vmatmul.mubr.msk.f32.gmra.mrb[168].mxu0 %vm1392_vm14, %v5726_v24 }
 0xb75   :  { %7224 = vmatprep.mubr.msk.f32.mxu0 %vm8150_vm0, %v8151_v7 }
 0xc37   :  { %v3380_v44 = vpop.f32.mrb[160].mxu0 }
 0xc38   :  { %v3404_v45 = vadd.f32 %v3380_v44, %v9488_v27  ;;  %v7207_v51 = vpop.f32.mrb[161].mxu0 }
 0xc3a   :  { %v3416_v9 = vadd.f32 %v5751_v53, %v3404_v45 }
 0xc3b   :  { %v3385_v52 = vpop.f32.mrb[162].mxu0 }
 0xc3c   :  { %v3405_v42 = vadd.f32 %v3385_v52, %v9491_v50  ;;  %v7210_v46 = vpop.f32.mrb[163].mxu0  ;;  %v3424_v0 = vsel %vm3423_vm3, %v3416_v9, 0.0 }
 0xc3e   :  { %v3417_v54 = vadd.f32 %v5751_v53, %v3405_v42 }
 0xc3f   :  { %v3390_v57 = vpop.f32.mrb[164].mxu0 }
 0xc40   :  { %v3425_v4 = vsel %vm3423_vm3, %v3417_v54, 0.0  ;;  %v3406_v13 = vadd.f32 %v3390_v57, %v9494_v61  ;;  %v7213_v15 = vpop.f32.mrb[165].mxu0 }
 0xc41   :  { %v3426_v55 = vadd.f32 %v3425_v4, %v3424_v0  ;;  %v5753_v0 = vld [vmem:[%s9949_s18] ss:$0 sm:$0xff] }
 0xc42   :  { %v3418_v12 = vadd.f32 %v5751_v53, %v3406_v13 }
 0xc43   :  { %v3395_v27 = vpop.f32.mrb[166].mxu0 }
 0xc44   :  { %v3427_v14 = vsel %vm3423_vm3, %v3418_v12, 0.0  ;;  %v3407_v29 = vadd.f32 %v3395_v27, %v9497_v8  ;;  %v7216_v18 = vpop.f32.mrb[167].mxu0 }
 0xc45   :  { %v3428_v50 = vadd.f32 %v3427_v14, %v3426_v55  ;;  %v5761_v55 = vld [vmem:[%s9944_s12 + $0x10] sm:$0xff] }
 0xc46   :  { %v3419_v20 = vadd.f32 %v5751_v53, %v3407_v29 }
 0xc47   :  { %v3400_v56 = vpop.f32.mrb[168].mxu0 }
 0xc48   :  { %v3429_v32 = vsel %vm3423_vm3, %v3419_v20, 0.0  ;;  %v3408_v36 = vadd.f32 %v3400_v56, %v9500_v16  ;;  %v7219_v25 = vpop.f32.mrb[169].mxu0 }
 0xc49   :  { %v3430_v43 = vadd.f32 %v3429_v32, %v3428_v50 }
 0xc4a   :  { %v3420_v61 = vadd.f32 %v5751_v53, %v3408_v36 }
 0xc4c   :  { %v3432_v31 = vsel %vm3431_vm4, %v3420_v61, 0.0 }
 0xc4d   :  { %v3433_v48 = vadd.f32 %v3432_v31, %v3430_v43 }
 0xc4f   :  { %v3434_v37 = vrot.slane %v3433_v48, 4 }
 0xc51   :  { %v3435_v41 = vadd.f32 %v3434_v37, %v3433_v48 }
 0xc53   :  { %v3436_v22 = vrot.slane %v3435_v41, 2 }
 0xc55   :  { %v3437_v47 = vadd.f32 %v3436_v22, %v3435_v41 }
 0xc57   :  { %v3438_v8 = vrot.slane %v3437_v47, 1 }
 0xc59   :  { %v3439_v39 = vadd.f32 %v3438_v8, %v3437_v47 }
 0xc5b   :  { %v3441_v58 = vmul.f32 0.027777778, %v3439_v39 }
 0xc5d   :  { %v3442_v21 = vsub.f32 %v3416_v9, %v3441_v58  ;;  %v3443_v62 = vsub.f32 %v3417_v54, %v3441_v58  ;;  %v3444_v63 = vsub.f32 %v3418_v12, %v3441_v58  ;;  %v3445_v1 = vsub.f32 %v3419_v20, %v3441_v58  ;;  %v5752_v9 = vld [vmem:[%s9948_s16] ss:$0 sm:$0xff]  ;;  %v5762_v12 = vld [vmem:[%s9944_s12 + $0x18] sm:$0x3] }
 0xc5e   :  { %v3446_v2 = vsub.f32 %v3420_v61, %v3441_v58  ;;  %v7782_v14 = vpack.c.bf16 %v5762_v12, %v5761_v55  ;;  %v5785_v55 = vld [vmem:[%s9944_s12 + $0x30] sm:$0xff]  ;;  %v5786_v12 = vld [vmem:[%s9944_s12 + $0x38] sm:$0x3] }
 0xc5f   :  { %v3447_v16 = vmul.f32 %v3442_v21, %v3442_v21  ;;  %v3448_v5 = vmul.f32 %v3443_v62, %v3443_v62  ;;  %v3449_v6 = vmul.f32 %v3444_v63, %v3444_v63  ;;  %v3450_v10 = vmul.f32 %v3445_v1, %v3445_v1 }
 0xc60   :  { %v3451_v33 = vmul.f32 %v3446_v2, %v3446_v2 }
 0xc61   :  { %v3452_v11 = vsel %vm3423_vm3, %v3447_v16, 0.0  ;;  %v3453_v34 = vsel %vm3423_vm3, %v3448_v5, 0.0  ;;  %v3455_v60 = vsel %vm3423_vm3, %v3449_v6, 0.0  ;;  %v3457_v28 = vsel %vm3423_vm3, %v3450_v10, 0.0 }
 0xc62   :  { %v3454_v35 = vadd.f32 %v3453_v34, %v3452_v11  ;;  %v3459_v40 = vsel %vm3431_vm4, %v3451_v33, 0.0 }
 0xc64   :  { %v3456_v17 = vadd.f32 %v3455_v60, %v3454_v35 }
 0xc66   :  { %v3458_v38 = vadd.f32 %v3457_v28, %v3456_v17 }
 0xc68   :  { %v3460_v19 = vadd.f32 %v3459_v40, %v3458_v38  ;;  %v5760_v40 = vld [vmem:[%s9950_s22 + $0x4] sm:$0xf] }
 0xc6a   :  { %v3461_v24 = vrot.slane %v3460_v19, 4 }
 0xc6c   :  { %v3462_v49 = vadd.f32 %v3461_v24, %v3460_v19  ;;  %v5774_v19 = vld [vmem:[%s9944_s12 + $0x20] sm:$0xff]  ;;  %v5775_v24 = vld [vmem:[%s9944_s12 + $0x28] sm:$0x3] }
 0xc6e   :  { %v3463_v59 = vrot.slane %v3462_v49, 2 }
 0xc70   :  { %v3464_v30 = vadd.f32 %v3463_v59, %v3462_v49  ;;  %v3502_v49 = vld [vmem:[%s9950_s22] sm:$0xf]  ;;  %v7798_v59 = vpack.c.bf16 %v5775_v24, %v5774_v19 }
 0xc72   :  { %v3465_v44 = vrot.slane %v3464_v30, 1 }
 0xc74   :  { %v3466_v45 = vadd.f32 %v3465_v44, %v3464_v30 }
 0xc76   :  { %v3467_v51 = vmul.f32 0.027777778, %v3466_v45 }
 0xc78   :  { %v3468_v53 = vadd.f32 1e-05, %v3467_v51 }
 0xc7a   :  { %7939 = vrsqrt.f32 %v3468_v53 }
 0xc84   :  { %v7940_v52 = vpop.eup %7939 }
 0xc85   :  { %v3470_v42 = vmul.f32 %v7940_v52, %v3442_v21  ;;  %v3471_v46 = vmul.f32 %v7940_v52, %v3443_v62  ;;  %v3472_v54 = vmul.f32 %v7940_v52, %v3444_v63  ;;  %v3473_v57 = vmul.f32 %v7940_v52, %v3445_v1 }
 0xc86   :  { %v3474_v4 = vmul.f32 %v7940_v52, %v3446_v2 }
 0xc87   :  { %v3481_v13 = vmul.f32 %v5752_v9, %v3470_v42  ;;  %v3482_v15 = vmul.f32 %v5752_v9, %v3471_v46  ;;  %v3483_v29 = vmul.f32 %v5752_v9, %v3472_v54  ;;  %v3484_v20 = vmul.f32 %v5752_v9, %v3473_v57 }
 0xc88   :  { %v3485_v36 = vmul.f32 %v5752_v9, %v3474_v4 }
 0xc89   :  { %v3492_v27 = vadd.f32 %v5753_v0, %v3481_v13  ;;  %v3493_v18 = vadd.f32 %v5753_v0, %v3482_v15  ;;  %v3494_v56 = vadd.f32 %v5753_v0, %v3483_v29  ;;  %v3495_v25 = vadd.f32 %v5753_v0, %v3484_v20  ;;  %v5773_v29 = vld [vmem:[%s9950_s22 + $0x8] sm:$0xf] }
 0xc8a   :  { %v3496_v61 = vadd.f32 %v5753_v0, %v3485_v36 }
 0xc8b   :  { %v9560_v50 = vmax.f32 %v3492_v27, 0.0  ;;  %v9568_v32 = vmax.f32 %v3493_v18, 0.0  ;;  %v9575_v43 = vmax.f32 %v3494_v56, 0.0  ;;  %v9581_v31 = vmax.f32 %v3495_v25, 0.0 }
 0xc8c   :  { %v9587_v48 = vmax.f32 %v3496_v61, 0.0  ;;  %v7808_v18 = vpack.c.bf16 %v5786_v12, %v5785_v55 }
 0xc8d   :  { %7225 = vmatmul.mubr.msk.f32.vlgmr.msra.gmra.mrb[170].mxu0 %vm3423_vm3, %v9560_v50 }
 0xc8e   :  { %7227 = vmatprep.mubr.msk.f32.mxu0 %vm8150_vm0, %v8151_v7  ;;  %7784 = vmatpush3.bf16.msk.msra.mxu0 %vm9533_vm2, %v7782_v14 }
 0xc8f   :  { %7801 = vmatprep.subr.bf16.mxu0 %v8149_v3 }
 0xc91   :  { %7228 = vmatmul.mubr.msk.f32.gmra.mrb[172].mxu0 %vm3423_vm3, %v9568_v32 }
 0xc92   :  { %7230 = vmatprep.mubr.msk.f32.mxu0 %vm8150_vm0, %v8151_v7 }
 0xc95   :  { %7231 = vmatmul.mubr.msk.f32.gmra.mrb[174].mxu0 %vm3423_vm3, %v9575_v43 }
 0xc96   :  { %7233 = vmatprep.mubr.msk.f32.mxu0 %vm8150_vm0, %v8151_v7 }
 0xc99   :  { %7234 = vmatmul.mubr.msk.f32.gmra.mrb[176].mxu0 %vm3423_vm3, %v9581_v31 }
 0xc9a   :  { %7236 = vmatprep.mubr.msk.f32.mxu0 %vm8150_vm0, %v8151_v7 }
 0xc9d   :  { %7237 = vmatmul.mubr.msk.f32.gmra.mrb[178].mxu0 %vm3423_vm3, %v9587_v48 }
 0xc9e   :  { %7243 = vmatprep.mubr.msk.f32.mxu0 %vm8150_vm0, %v8151_v7 }
 0xca1   :  { %7244 = vmatmul.mubr.msk.f32.vlgmr.msra.gmra.mrb[180].mxu0 %vm3423_vm3, %v9560_v50 }
 0xca2   :  { %7246 = vmatprep.mubr.msk.f32.mxu0 %vm8150_vm0, %v8151_v7 }
 0xca5   :  { %7247 = vmatmul.mubr.msk.f32.gmra.mrb[182].mxu0 %vm3423_vm3, %v9568_v32 }
 0xca6   :  { %7249 = vmatprep.mubr.msk.f32.mxu0 %vm8150_vm0, %v8151_v7 }
 0xca9   :  { %7250 = vmatmul.mubr.msk.f32.gmra.mrb[184].mxu0 %vm3423_vm3, %v9575_v43 }
 0xcaa   :  { %7252 = vmatprep.mubr.msk.f32.mxu0 %vm8150_vm0, %v8151_v7 }
 0xcad   :  { %7253 = vmatmul.mubr.msk.f32.gmra.mrb[186].mxu0 %vm3423_vm3, %v9581_v31 }
 0xcae   :  { %7255 = vmatprep.mubr.msk.f32.mxu0 %vm8150_vm0, %v8151_v7 }
 0xcb1   :  { %7256 = vmatmul.mubr.msk.f32.gmra.mrb[188].mxu0 %vm3423_vm3, %v9587_v48 }
 0xcb2   :  { %7313 = vmatprep.mubr.msk.f32.mxu0 %vm8150_vm0, %v8151_v7 }
 0xd60   :  { %v3590_v37 = vpop.f32.mrb[170].mxu0 }
 0xd61   :  { %v7226_v41 = vpop.f32.mrb[171].mxu0 }
 0xd64   :  { %v3595_v22 = vpop.f32.mrb[172].mxu0 }
 0xd65   :  { %v7792_v47 = vpack.c.bf16 %v3595_v22, %v3590_v37  ;;  %v7229_v8 = vpop.f32.mrb[173].mxu0 }
 0xd68   :  { %v3600_v39 = vpop.f32.mrb[174].mxu0 }
 0xd69   :  { %v7232_v58 = vpop.f32.mrb[175].mxu0 }
 0xd6c   :  { %v3605_v21 = vpop.f32.mrb[176].mxu0 }
 0xd6d   :  { %v7795_v62 = vpack.c.bf16 %v3605_v21, %v3600_v39  ;;  %v7235_v63 = vpop.f32.mrb[177].mxu0 }
 0xd6e   :  { %v5797_v63 = vld [vmem:[%s9944_s12 + $0x48] sm:$0x3] }
 0xd70   :  { %v3610_v1 = vpop.f32.mrb[178].mxu0 }
 0xd71   :  { %v7238_v2 = vpop.f32.mrb[179].mxu0 }
 0xd74   :  { %v3688_v16 = vpop.f32.mrb[180].mxu0 }
 0xd75   :  { %v7245_v5 = vpop.f32.mrb[181].mxu0 }
 0xd78   :  { %v3693_v6 = vpop.f32.mrb[182].mxu0 }
 0xd79   :  { %v7786_v10 = vpack.c.bf16 %v3693_v6, %v3688_v16  ;;  %v7248_v11 = vpop.f32.mrb[183].mxu0  ;;  %v5784_v16 = vld [vmem:[%s9950_s22 + $0xc] sm:$0xf] }
 0xd7b   :  { %7787 = vmatpush3.bf16.msra.mxu1 %v7786_v10 }
 0xd7c   :  { %v3698_v34 = vpop.f32.mrb[184].mxu0  ;;  %7788 = vmatprep.subr.bf16.mxu1 %v8149_v3 }
 0xd7d   :  { %v7251_v35 = vpop.f32.mrb[185].mxu0 }
 0xd80   :  { %v3703_v33 = vpop.f32.mrb[186].mxu0 }
 0xd81   :  { %v7789_v60 = vpack.c.bf16 %v3703_v33, %v3698_v34  ;;  %v7254_v17 = vpop.f32.mrb[187].mxu0 }
 0xd83   :  { %7790 = vmatpush3.bf16.msra.mxu1 %v7789_v60 }
 0xd84   :  { %v3708_v28 = vpop.f32.mrb[188].mxu0  ;;  %7266 = vmatprep.subr.mxu1 %v8151_v7 }
 0xd85   :  { %v7257_v38 = vpop.f32.mrb[189].mxu0 }
 0xd87   :  { %7267 = vmatpush3.msk.msra.mxu1 %vm1408_vm13, %v3708_v28 }
 0xd88   :  { %7791 = vmatprep.subr.bf16.mxu1 %v8149_v3  ;;  %7269 = vmatmul.mubr.msk.f32.vlgmr.msra.gmra.mrb[192].mxu1 %vm3712_vm6, %v5760_v40 }
 0xd89   :  { %7793 = vmatpush3.bf16.msra.mxu1 %v7792_v47  ;;  %7281 = vmatprep.mubr.msk.f32.mxu1 %vm8150_vm0, %v8151_v7 }
 0xd8a   :  { %7794 = vmatprep.subr.bf16.mxu1 %v8149_v3 }
 0xd8d   :  { %7796 = vmatpush3.bf16.msra.mxu1 %v7795_v62  ;;  %v5796_v62 = vld [vmem:[%s9944_s12 + $0x40] sm:$0xff] }
 0xd8e   :  { %7279 = vmatprep.subr.mxu1 %v8151_v7  ;;  %v7818_v5 = vpack.c.bf16 %v5797_v63, %v5796_v62 }
 0xd91   :  { %7280 = vmatpush3.msk.msra.mxu1 %vm1408_vm13, %v3610_v1 }
 0xd92   :  { %7282 = vmatmul.mubr.msk.f32.vlgmr.msra.gmra.mrb[194].mxu1 %vm3712_vm6, %v3502_v49  ;;  %7797 = vmatprep.subr.bf16.mxu1 %v8149_v3  ;;  %v5807_v49 = vld [vmem:[%s9944_s12 + $0x50] sm:$0xff] }
 0xd93   :  { %7800 = vmatpush3.bf16.msk.msra.mxu1 %vm9533_vm2, %v7798_v59  ;;  %7288 = vmatprep.mubr.msk.f32.mxu1 %vm8150_vm0, %v8151_v7  ;;  %v5808_v59 = vld [vmem:[%s9944_s12 + $0x58] sm:$0x3] }
 0xd94   :  { %7811 = vmatprep.subr.bf16.mxu1 %v8149_v3 }
 0xd96   :  { %7289 = vmatmul.mubr.msk.f32.vlgmr.msra.gmra.mrb[196].mxu1 %vm3423_vm3, %v9560_v50 }
 0xd97   :  { %7291 = vmatprep.mubr.msk.f32.mxu1 %vm8150_vm0, %v8151_v7 }
 0xd9a   :  { %7292 = vmatmul.mubr.msk.f32.gmra.mrb[198].mxu1 %vm3423_vm3, %v9568_v32 }
 0xd9b   :  { %7294 = vmatprep.mubr.msk.f32.mxu1 %vm8150_vm0, %v8151_v7 }
 0xd9e   :  { %7295 = vmatmul.mubr.msk.f32.gmra.mrb[200].mxu1 %vm3423_vm3, %v9575_v43 }
 0xd9f   :  { %7297 = vmatprep.mubr.msk.f32.mxu1 %vm8150_vm0, %v8151_v7 }
 0xda2   :  { %7298 = vmatmul.mubr.msk.f32.gmra.mrb[202].mxu1 %vm3423_vm3, %v9581_v31 }
 0xda3   :  { %7300 = vmatprep.mubr.msk.f32.mxu1 %vm8150_vm0, %v8151_v7 }
 0xda6   :  { %7301 = vmatmul.mubr.msk.f32.gmra.mrb[204].mxu1 %vm3423_vm3, %v9587_v48 }
 0xda7   :  { %7345 = vmatprep.mubr.msk.f32.mxu1 %vm8150_vm0, %v8151_v7 }
 0xe5b   :  { %v3785_v30 = vpop.f32.mrb[192].mxu1 }
 0xe5c   :  { %v7270_v44 = vpop.f32.mrb[193].mxu1 }
 0xe65   :  { %v3861_v45 = vpop.f32.mrb[194].mxu1 }
 0xe66   :  { %v3862_v51 = vadd.f32 %v3861_v45, %v3785_v30  ;;  %v7283_v53 = vpop.f32.mrb[195].mxu1  ;;  %v5795_v45 = vld [vmem:[%s9950_s22 + $0x10] sm:$0xf] }
 0xe69   :  { %v3939_v52 = vpop.f32.mrb[196].mxu1 }
 0xe6a   :  { %v7290_v9 = vpop.f32.mrb[197].mxu1 }
 0xe6d   :  { %v3944_v42 = vpop.f32.mrb[198].mxu1 }
 0xe6e   :  { %v7802_v46 = vpack.c.bf16 %v3944_v42, %v3939_v52  ;;  %v7293_v54 = vpop.f32.mrb[199].mxu1 }
 0xe70   :  { %7803 = vmatpush3.bf16.msra.mxu0 %v7802_v46 }
 0xe71   :  { %v3949_v57 = vpop.f32.mrb[200].mxu1  ;;  %7804 = vmatprep.subr.bf16.mxu0 %v8149_v3 }
 0xe72   :  { %v7296_v0 = vpop.f32.mrb[201].mxu1 }
 0xe75   :  { %v3954_v4 = vpop.f32.mrb[202].mxu1 }
 0xe76   :  { %v7805_v13 = vpack.c.bf16 %v3954_v4, %v3949_v57  ;;  %v7299_v15 = vpop.f32.mrb[203].mxu1 }
 0xe78   :  { %7806 = vmatpush3.bf16.msra.mxu0 %v7805_v13 }
 0xe79   :  { %v3959_v27 = vpop.f32.mrb[204].mxu1  ;;  %7311 = vmatprep.subr.mxu0 %v8151_v7 }
 0xe7a   :  { %v7302_v14 = vpop.f32.mrb[205].mxu1 }
 0xe7b   :  { %v5819_v14 = vld [vmem:[%s9944_s12 + $0x68] sm:$0x3] }
 0xe7c   :  { %7312 = vmatpush3.msk.msra.mxu0 %vm1408_vm13, %v3959_v27  ;;  %v5818_v27 = vld [vmem:[%s9944_s12 + $0x60] sm:$0xff] }
 0xe7d   :  { %7314 = vmatmul.mubr.msk.f32.vlgmr.msra.gmra.mrb[190].mxu0 %vm3712_vm6, %v5773_v29  ;;  %7807 = vmatprep.subr.bf16.mxu0 %v8149_v3 }
 0xe7e   :  { %7810 = vmatpush3.bf16.msk.msra.mxu0 %vm9533_vm2, %v7808_v18  ;;  %7320 = vmatprep.mubr.msk.f32.mxu0 %vm8150_vm0, %v8151_v7 }
 0xe7f   :  { %7821 = vmatprep.subr.bf16.mxu0 %v8149_v3 }
 0xe81   :  { %7321 = vmatmul.mubr.msk.f32.vlgmr.msra.gmra.mrb[192].mxu0 %vm3423_vm3, %v9560_v50 }
 0xe82   :  { %7323 = vmatprep.mubr.msk.f32.mxu0 %vm8150_vm0, %v8151_v7 }
 0xe85   :  { %7324 = vmatmul.mubr.msk.f32.gmra.mrb[194].mxu0 %vm3423_vm3, %v9568_v32 }
 0xe86   :  { %7326 = vmatprep.mubr.msk.f32.mxu0 %vm8150_vm0, %v8151_v7 }
 0xe89   :  { %7327 = vmatmul.mubr.msk.f32.gmra.mrb[196].mxu0 %vm3423_vm3, %v9575_v43 }
 0xe8a   :  { %7329 = vmatprep.mubr.msk.f32.mxu0 %vm8150_vm0, %v8151_v7 }
 0xe8d   :  { %7330 = vmatmul.mubr.msk.f32.gmra.mrb[198].mxu0 %vm3423_vm3, %v9581_v31 }
 0xe8e   :  { %7332 = vmatprep.mubr.msk.f32.mxu0 %vm8150_vm0, %v8151_v7 }
 0xe91   :  { %7333 = vmatmul.mubr.msk.f32.gmra.mrb[200].mxu0 %vm3423_vm3, %v9587_v48 }
 0xe92   :  { %7377 = vmatprep.mubr.msk.f32.mxu0 %vm8150_vm0, %v8151_v7 }
 0xf50   :  { %v4035_v20 = vpop.f32.mrb[190].mxu0 }
 0xf51   :  { %v4039_v56 = vadd.f32 %v4035_v20, %v3862_v51  ;;  %v7315_v36 = vpop.f32.mrb[191].mxu0  ;;  %v7828_v51 = vpack.c.bf16 %v5808_v59, %v5807_v49  ;;  %v5806_v20 = vld [vmem:[%s9950_s22 + $0x14] sm:$0xf] }
 0xf54   :  { %v4114_v25 = vpop.f32.mrb[192].mxu0 }
 0xf55   :  { %v7322_v61 = vpop.f32.mrb[193].mxu0 }
 0xf58   :  { %v4119_v37 = vpop.f32.mrb[194].mxu0 }
 0xf59   :  { %v7812_v41 = vpack.c.bf16 %v4119_v37, %v4114_v25  ;;  %v7325_v22 = vpop.f32.mrb[195].mxu0 }
 0xf5b   :  { %7813 = vmatpush3.bf16.msra.mxu1 %v7812_v41 }
 0xf5c   :  { %v4124_v47 = vpop.f32.mrb[196].mxu0  ;;  %7814 = vmatprep.subr.bf16.mxu1 %v8149_v3 }
 0xf5d   :  { %v7328_v8 = vpop.f32.mrb[197].mxu0 }
 0xf60   :  { %v4129_v39 = vpop.f32.mrb[198].mxu0 }
 0xf61   :  { %v7815_v58 = vpack.c.bf16 %v4129_v39, %v4124_v47  ;;  %v7331_v21 = vpop.f32.mrb[199].mxu0 }
 0xf63   :  { %7816 = vmatpush3.bf16.msra.mxu1 %v7815_v58 }
 0xf64   :  { %v4134_v1 = vpop.f32.mrb[200].mxu0  ;;  %7343 = vmatprep.subr.mxu1 %v8151_v7 }
 0xf65   :  { %v7334_v2 = vpop.f32.mrb[201].mxu0 }
 0xf66   :  { %v5830_v2 = vld [vmem:[%s9944_s12 + $0x78] sm:$0x3] }
 0xf67   :  { %7344 = vmatpush3.msk.msra.mxu1 %vm1408_vm13, %v4134_v1  ;;  %v5829_v1 = vld [vmem:[%s9944_s12 + $0x70] sm:$0xff] }
 0xf68   :  { %7346 = vmatmul.mubr.msk.f32.vlgmr.msra.gmra.mrb[206].mxu1 %vm3712_vm6, %v5784_v16  ;;  %7817 = vmatprep.subr.bf16.mxu1 %v8149_v3 }
 0xf69   :  { %7820 = vmatpush3.bf16.msk.msra.mxu1 %vm9533_vm2, %v7818_v5  ;;  %7352 = vmatprep.mubr.msk.f32.mxu1 %vm8150_vm0, %v8151_v7 }
 0xf6a   :  { %7831 = vmatprep.subr.bf16.mxu1 %v8149_v3 }
 0xf6c   :  { %7353 = vmatmul.mubr.msk.f32.vlgmr.msra.gmra.mrb[208].mxu1 %vm3423_vm3, %v9560_v50 }
 0xf6d   :  { %7355 = vmatprep.mubr.msk.f32.mxu1 %vm8150_vm0, %v8151_v7 }
 0xf70   :  { %7356 = vmatmul.mubr.msk.f32.gmra.mrb[210].mxu1 %vm3423_vm3, %v9568_v32 }
 0xf71   :  { %7358 = vmatprep.mubr.msk.f32.mxu1 %vm8150_vm0, %v8151_v7 }
 0xf74   :  { %7359 = vmatmul.mubr.msk.f32.gmra.mrb[212].mxu1 %vm3423_vm3, %v9575_v43 }
 0xf75   :  { %7361 = vmatprep.mubr.msk.f32.mxu1 %vm8150_vm0, %v8151_v7 }
 0xf78   :  { %7362 = vmatmul.mubr.msk.f32.gmra.mrb[214].mxu1 %vm3423_vm3, %v9581_v31 }
 0xf79   :  { %7364 = vmatprep.mubr.msk.f32.mxu1 %vm8150_vm0, %v8151_v7 }
 0xf7c   :  { %7365 = vmatmul.mubr.msk.f32.gmra.mrb[216].mxu1 %vm3423_vm3, %v9587_v48 }
 0xf7d   :  { %7409 = vmatprep.mubr.msk.f32.mxu1 %vm8150_vm0, %v8151_v7 }
0x103b   :  { %v4210_v6 = vpop.f32.mrb[206].mxu1 }
0x103c   :  { %v4214_v10 = vadd.f32 %v4210_v6, %v4039_v56  ;;  %v7347_v11 = vpop.f32.mrb[207].mxu1  ;;  %v7838_v56 = vpack.c.bf16 %v5819_v14, %v5818_v27  ;;  %v5817_v6 = vld [vmem:[%s9950_s22 + $0x18] sm:$0xf]  ;;  %v5850_v14 = vld [vmem:[%s9952_s26] ss:$0 sm:$0xff] }
0x103f   :  { %v4289_v34 = vpop.f32.mrb[208].mxu1 }
0x1040   :  { %v7354_v35 = vpop.f32.mrb[209].mxu1 }
0x1043   :  { %v4294_v33 = vpop.f32.mrb[210].mxu1 }
0x1044   :  { %v7822_v60 = vpack.c.bf16 %v4294_v33, %v4289_v34  ;;  %v7357_v17 = vpop.f32.mrb[211].mxu1 }
0x1046   :  { %7823 = vmatpush3.bf16.msra.mxu0 %v7822_v60 }
0x1047   :  { %v4299_v28 = vpop.f32.mrb[212].mxu1  ;;  %7824 = vmatprep.subr.bf16.mxu0 %v8149_v3 }
0x1048   :  { %v7360_v38 = vpop.f32.mrb[213].mxu1 }
0x104b   :  { %v4304_v40 = vpop.f32.mrb[214].mxu1 }
0x104c   :  { %v7825_v19 = vpack.c.bf16 %v4304_v40, %v4299_v28  ;;  %v7363_v24 = vpop.f32.mrb[215].mxu1 }
0x104e   :  { %7826 = vmatpush3.bf16.msra.mxu0 %v7825_v19 }
0x104f   :  { %v4309_v30 = vpop.f32.mrb[216].mxu1  ;;  %7375 = vmatprep.subr.mxu0 %v8151_v7 }
0x1050   :  { %v7366_v44 = vpop.f32.mrb[217].mxu1 }
0x1051   :  { %v5841_v44 = vld [vmem:[%s9944_s12 + $0x88] sm:$0x3] }
0x1052   :  { %7376 = vmatpush3.msk.msra.mxu0 %vm1408_vm13, %v4309_v30  ;;  %v5840_v30 = vld [vmem:[%s9944_s12 + $0x80] sm:$0xff] }
0x1053   :  { %7378 = vmatmul.mubr.msk.f32.vlgmr.msra.gmra.mrb[202].mxu0 %vm3712_vm6, %v5795_v45  ;;  %7827 = vmatprep.subr.bf16.mxu0 %v8149_v3 }
0x1054   :  { %7830 = vmatpush3.bf16.msk.msra.mxu0 %vm9533_vm2, %v7828_v51  ;;  %7384 = vmatprep.mubr.msk.f32.mxu0 %vm8150_vm0, %v8151_v7 }
0x1055   :  { %7841 = vmatprep.subr.bf16.mxu0 %v8149_v3 }
0x1057   :  { %7385 = vmatmul.mubr.msk.f32.vlgmr.msra.gmra.mrb[204].mxu0 %vm3423_vm3, %v9560_v50 }
0x1058   :  { %7387 = vmatprep.mubr.msk.f32.mxu0 %vm8150_vm0, %v8151_v7 }
0x105b   :  { %7388 = vmatmul.mubr.msk.f32.gmra.mrb[206].mxu0 %vm3423_vm3, %v9568_v32 }
0x105c   :  { %7390 = vmatprep.mubr.msk.f32.mxu0 %vm8150_vm0, %v8151_v7 }
0x105f   :  { %7391 = vmatmul.mubr.msk.f32.gmra.mrb[208].mxu0 %vm3423_vm3, %v9575_v43 }
0x1060   :  { %7393 = vmatprep.mubr.msk.f32.mxu0 %vm8150_vm0, %v8151_v7 }
0x1063   :  { %7394 = vmatmul.mubr.msk.f32.gmra.mrb[210].mxu0 %vm3423_vm3, %v9581_v31 }
0x1064   :  { %7396 = vmatprep.mubr.msk.f32.mxu0 %vm8150_vm0, %v8151_v7 }
0x1067   :  { %7397 = vmatmul.mubr.msk.f32.gmra.mrb[212].mxu0 %vm3423_vm3, %v9587_v48 }
0x1068   :  { %7441 = vmatprep.mubr.msk.f32.mxu0 %vm8150_vm0, %v8151_v7 }
0x1126   :  { %v4385_v53 = vpop.f32.mrb[202].mxu0 }
0x1127   :  { %v4389_v52 = vadd.f32 %v4385_v53, %v4214_v10  ;;  %v7379_v9 = vpop.f32.mrb[203].mxu0  ;;  %v7848_v10 = vpack.c.bf16 %v5830_v2, %v5829_v1  ;;  %v5828_v53 = vld [vmem:[%s9950_s22 + $0x1c] sm:$0xf] }
0x112a   :  { %v4464_v42 = vpop.f32.mrb[204].mxu0 }
0x112b   :  { %v7386_v46 = vpop.f32.mrb[205].mxu0 }
0x112e   :  { %v4469_v54 = vpop.f32.mrb[206].mxu0 }
0x112f   :  { %v7832_v57 = vpack.c.bf16 %v4469_v54, %v4464_v42  ;;  %v7389_v0 = vpop.f32.mrb[207].mxu0 }
0x1131   :  { %7833 = vmatpush3.bf16.msra.mxu1 %v7832_v57 }
0x1132   :  { %v4474_v4 = vpop.f32.mrb[208].mxu0  ;;  %7834 = vmatprep.subr.bf16.mxu1 %v8149_v3 }
0x1133   :  { %v7392_v13 = vpop.f32.mrb[209].mxu0 }
0x1136   :  { %v4479_v15 = vpop.f32.mrb[210].mxu0 }
0x1137   :  { %v7835_v55 = vpack.c.bf16 %v4479_v15, %v4474_v4  ;;  %v7395_v12 = vpop.f32.mrb[211].mxu0 }
0x1138   :  { %v5105_v12 = vld [vmem:[%s9951_s23] sm:$0xff] }
0x1139   :  { %7836 = vmatpush3.bf16.msra.mxu1 %v7835_v55  ;;  %v5839_v55 = vld [vmem:[%s9950_s22 + $0x20] sm:$0xf] }
0x113a   :  { %v4484_v29 = vpop.f32.mrb[212].mxu0  ;;  %7407 = vmatprep.subr.mxu1 %v8151_v7 }
0x113b   :  { %v7398_v18 = vpop.f32.mrb[213].mxu0 }
0x113d   :  { %7408 = vmatpush3.msk.msra.mxu1 %vm1408_vm13, %v4484_v29 }
0x113e   :  { %7410 = vmatmul.mubr.msk.f32.vlgmr.msra.gmra.mrb[218].mxu1 %vm3712_vm6, %v5806_v20  ;;  %7837 = vmatprep.subr.bf16.mxu1 %v8149_v3 }
0x113f   :  { %7840 = vmatpush3.bf16.msk.msra.mxu1 %vm9533_vm2, %v7838_v56  ;;  %7416 = vmatprep.mubr.msk.f32.mxu1 %vm8150_vm0, %v8151_v7 }
0x1140   :  { %7851 = vmatprep.subr.bf16.mxu1 %v8149_v3 }
0x1142   :  { %7417 = vmatmul.mubr.msk.f32.vlgmr.msra.gmra.mrb[220].mxu1 %vm3423_vm3, %v9560_v50 }
0x1143   :  { %7419 = vmatprep.mubr.msk.f32.mxu1 %vm8150_vm0, %v8151_v7 }
0x1146   :  { %7420 = vmatmul.mubr.msk.f32.gmra.mrb[222].mxu1 %vm3423_vm3, %v9568_v32 }
0x1147   :  { %7422 = vmatprep.mubr.msk.f32.mxu1 %vm8150_vm0, %v8151_v7 }
0x114a   :  { %7423 = vmatmul.mubr.msk.f32.gmra.mrb[224].mxu1 %vm3423_vm3, %v9575_v43 }
0x114b   :  { %7425 = vmatprep.mubr.msk.f32.mxu1 %vm8150_vm0, %v8151_v7 }
0x114e   :  { %7426 = vmatmul.mubr.msk.f32.gmra.mrb[226].mxu1 %vm3423_vm3, %v9581_v31 }
0x114f   :  { %7428 = vmatprep.mubr.msk.f32.mxu1 %vm8150_vm0, %v8151_v7 }
0x1152   :  { %7429 = vmatmul.mubr.msk.f32.gmra.mrb[228].mxu1 %vm3423_vm3, %v9587_v48 }
0x1153   :  { %7473 = vmatprep.mubr.msk.f32.mxu1 %vm8150_vm0, %v8151_v7 }
0x1211   :  { %v4560_v36 = vpop.f32.mrb[218].mxu1 }
0x1212   :  { %v4564_v25 = vadd.f32 %v4560_v36, %v4389_v52  ;;  %v7411_v61 = vpop.f32.mrb[219].mxu1  ;;  %v7858_v52 = vpack.c.bf16 %v5841_v44, %v5840_v30  ;;  %v5482_v36 = vmul.f32 -1.442695, %v8418_v23  ;;  %v5253_v23 = vld [vmem:[%s9954_s1] sm:$0xff] }
0x1215   :  { %v4639_v37 = vpop.f32.mrb[220].mxu1 }
0x1216   :  { %v7418_v41 = vpop.f32.mrb[221].mxu1 }
0x1219   :  { %v4644_v22 = vpop.f32.mrb[222].mxu1 }
0x121a   :  { %v7842_v47 = vpack.c.bf16 %v4644_v22, %v4639_v37  ;;  %v7421_v8 = vpop.f32.mrb[223].mxu1  ;;  %v5104_v22 = vld [vmem:[%s9953_s28] sm:$0xff] }
0x121b   :  { %v5254_v8 = vld [vmem:[%s9954_s1 + $0x8] sm:$0xff] }
0x121c   :  { %7843 = vmatpush3.bf16.msra.mxu0 %v7842_v47 }
0x121d   :  { %v4649_v39 = vpop.f32.mrb[224].mxu1  ;;  %7844 = vmatprep.subr.bf16.mxu0 %v8149_v3 }
0x121e   :  { %v7424_v58 = vpop.f32.mrb[225].mxu1 }
0x1221   :  { %v4654_v21 = vpop.f32.mrb[226].mxu1 }
0x1222   :  { %v7845_v62 = vpack.c.bf16 %v4654_v21, %v4649_v39  ;;  %v7427_v63 = vpop.f32.mrb[227].mxu1  ;;  %v7868_v39 = vpack.c.bf16 %v5254_v8, %v5253_v23 }
0x1224   :  { %7846 = vmatpush3.bf16.msra.mxu0 %v7845_v62 }
0x1225   :  { %v4659_v16 = vpop.f32.mrb[228].mxu1  ;;  %7439 = vmatprep.subr.mxu0 %v8151_v7 }
0x1226   :  { %v7430_v5 = vpop.f32.mrb[229].mxu1 }
0x1228   :  { %7440 = vmatpush3.msk.msra.mxu0 %vm1408_vm13, %v4659_v16 }
0x1229   :  { %7442 = vmatmul.mubr.msk.f32.vlgmr.msra.gmra.mrb[214].mxu0 %vm3712_vm6, %v5817_v6  ;;  %7847 = vmatprep.subr.bf16.mxu0 %v8149_v3 }
0x122a   :  { %7850 = vmatpush3.bf16.msk.msra.mxu0 %vm9533_vm2, %v7848_v10  ;;  %7448 = vmatprep.mubr.msk.f32.mxu0 %vm8150_vm0, %v8151_v7 }
0x122b   :  { %7861 = vmatprep.subr.bf16.mxu0 %v8149_v3 }
0x122d   :  { %7449 = vmatmul.mubr.msk.f32.vlgmr.msra.gmra.mrb[216].mxu0 %vm3423_vm3, %v9560_v50 }
0x122e   :  { %7451 = vmatprep.mubr.msk.f32.mxu0 %vm8150_vm0, %v8151_v7 }
0x1231   :  { %7452 = vmatmul.mubr.msk.f32.gmra.mrb[218].mxu0 %vm3423_vm3, %v9568_v32 }
0x1232   :  { %7454 = vmatprep.mubr.msk.f32.mxu0 %vm8150_vm0, %v8151_v7 }
0x1235   :  { %7455 = vmatmul.mubr.msk.f32.gmra.mrb[220].mxu0 %vm3423_vm3, %v9575_v43 }
0x1236   :  { %7457 = vmatprep.mubr.msk.f32.mxu0 %vm8150_vm0, %v8151_v7 }
0x1239   :  { %7458 = vmatmul.mubr.msk.f32.gmra.mrb[222].mxu0 %vm3423_vm3, %v9581_v31 }
0x123a   :  { %7460 = vmatprep.mubr.msk.f32.mxu0 %vm8150_vm0, %v8151_v7 }
0x123d   :  { %7461 = vmatmul.mubr.msk.f32.gmra.mrb[224].mxu0 %vm3423_vm3, %v9587_v48 }
0x123e   :  { %7505 = vmatprep.mubr.msk.f32.mxu0 %vm8150_vm0, %v8151_v7 }
0x12fc   :  { %v4735_v11 = vpop.f32.mrb[214].mxu0 }
0x12fd   :  { %v4739_v34 = vadd.f32 %v4735_v11, %v4564_v25  ;;  %v7443_v35 = vpop.f32.mrb[215].mxu0 }
0x1300   :  { %v4814_v33 = vpop.f32.mrb[216].mxu0 }
0x1301   :  { %v7450_v60 = vpop.f32.mrb[217].mxu0 }
0x1304   :  { %v4819_v17 = vpop.f32.mrb[218].mxu0 }
0x1305   :  { %v7852_v28 = vpack.c.bf16 %v4819_v17, %v4814_v33  ;;  %v7453_v38 = vpop.f32.mrb[219].mxu0 }
0x1307   :  { %7853 = vmatpush3.bf16.msra.mxu1 %v7852_v28 }
0x1308   :  { %v4824_v40 = vpop.f32.mrb[220].mxu0  ;;  %7854 = vmatprep.subr.bf16.mxu1 %v8149_v3 }
0x1309   :  { %v7456_v19 = vpop.f32.mrb[221].mxu0 }
0x130c   :  { %v4829_v24 = vpop.f32.mrb[222].mxu0 }
0x130d   :  { %v7855_v49 = vpack.c.bf16 %v4829_v24, %v4824_v40  ;;  %v7459_v59 = vpop.f32.mrb[223].mxu0 }
0x130f   :  { %7856 = vmatpush3.bf16.msra.mxu1 %v7855_v49 }
0x1310   :  { %v4834_v45 = vpop.f32.mrb[224].mxu0  ;;  %7471 = vmatprep.subr.mxu1 %v8151_v7 }
0x1311   :  { %v7462_v51 = vpop.f32.mrb[225].mxu0 }
0x1313   :  { %7472 = vmatpush3.msk.msra.mxu1 %vm1408_vm13, %v4834_v45 }
0x1314   :  { %7474 = vmatmul.mubr.msk.f32.vlgmr.msra.gmra.mrb[230].mxu1 %vm3712_vm6, %v5828_v53  ;;  %7857 = vmatprep.subr.bf16.mxu1 %v8149_v3 }
0x1315   :  { %7860 = vmatpush3.bf16.msk.msra.mxu1 %vm9533_vm2, %v7858_v52  ;;  %7480 = vmatprep.mubr.msk.f32.mxu1 %vm8150_vm0, %v8151_v7 }
0x1318   :  { %7481 = vmatmul.mubr.msk.f32.vlgmr.msra.gmra.mrb[232].mxu1 %vm3423_vm3, %v9560_v50 }
0x1319   :  { %7483 = vmatprep.mubr.msk.f32.mxu1 %vm8150_vm0, %v8151_v7 }
0x131c   :  { %7484 = vmatmul.mubr.msk.f32.gmra.mrb[234].mxu1 %vm3423_vm3, %v9568_v32 }
0x131d   :  { %7486 = vmatprep.mubr.msk.f32.mxu1 %vm8150_vm0, %v8151_v7 }
0x1320   :  { %7487 = vmatmul.mubr.msk.f32.gmra.mrb[236].mxu1 %vm3423_vm3, %v9575_v43 }
0x1321   :  { %7489 = vmatprep.mubr.msk.f32.mxu1 %vm8150_vm0, %v8151_v7 }
0x1324   :  { %7490 = vmatmul.mubr.msk.f32.gmra.mrb[238].mxu1 %vm3423_vm3, %v9581_v31 }
0x1325   :  { %7492 = vmatprep.mubr.msk.f32.mxu1 %vm8150_vm0, %v8151_v7 }
0x1328   :  { %7493 = vmatmul.mubr.msk.f32.gmra.mrb[240].mxu1 %vm3423_vm3, %v9587_v48 }
0x13e7   :  { %v4910_v26 = vpop.f32.mrb[230].mxu1 }
0x13e8   :  { %v4914_v50 = vadd.f32 %v4910_v26, %v4739_v34  ;;  %v7475_v32 = vpop.f32.mrb[231].mxu1 }
0x13eb   :  { %v4989_v9 = vpop.f32.mrb[232].mxu1 }
0x13ec   :  { %v7482_v42 = vpop.f32.mrb[233].mxu1 }
0x13ef   :  { %v4994_v46 = vpop.f32.mrb[234].mxu1 }
0x13f0   :  { %v7862_v43 = vpack.c.bf16 %v4994_v46, %v4989_v9  ;;  %v7485_v54 = vpop.f32.mrb[235].mxu1 }
0x13f2   :  { %7863 = vmatpush3.bf16.msra.mxu0 %v7862_v43 }
0x13f3   :  { %v4999_v57 = vpop.f32.mrb[236].mxu1  ;;  %7864 = vmatprep.subr.bf16.mxu0 %v8149_v3 }
0x13f4   :  { %v7488_v31 = vpop.f32.mrb[237].mxu1 }
0x13f7   :  { %v5004_v0 = vpop.f32.mrb[238].mxu1 }
0x13f8   :  { %v7865_v4 = vpack.c.bf16 %v5004_v0, %v4999_v57  ;;  %v7491_v13 = vpop.f32.mrb[239].mxu1 }
0x13fa   :  { %7866 = vmatpush3.bf16.msra.mxu0 %v7865_v4 }
0x13fb   :  { %v5009_v48 = vpop.f32.mrb[240].mxu1  ;;  %7503 = vmatprep.subr.mxu0 %v8151_v7 }
0x13fc   :  { %v7494_v15 = vpop.f32.mrb[241].mxu1 }
0x13fe   :  { %7504 = vmatpush3.msk.msra.mxu0 %vm1408_vm13, %v5009_v48 }
0x13ff   :  { %7506 = vmatmul.mubr.msk.f32.vlgmr.msra.gmra.mrb[226].mxu0 %vm3712_vm6, %v5839_v55  ;;  %7508 = vmatprep.subr.mxu0 %v8151_v7 }
0x1400   :  { %7510 = vmatprep.mubr.msk.f32.mxu0 %vm8150_vm0, %v8151_v7  ;;  %7509 = vmatpush3.msra.mxu0 %v5105_v12 }
0x1401   :  { %7513 = vmatprep.subr.mxu0 %v8151_v7 }
0x14d2   :  { %v5085_v27 = vpop.f32.mrb[226].mxu0 }
0x14d3   :  { %v5089_v29 = vadd.f32 %v5085_v27, %v4914_v50  ;;  %v7507_v18 = vpop.f32.mrb[227].mxu0 }
0x14d5   :  { %v5097_v20 = vadd.f32 %v5850_v14, %v5089_v29 }
0x14d7   :  { %v5851_v56 = vmul.f32 -1.442695, %v5097_v20 }
0x14d9   :  { %7941 = vpow2.f32 %v5851_v56 }
0x14da   :  { %7943 = vpow2.f32 %v5482_v36 }
0x14e3   :  { %v7942_v25 = vpop.eup %7941 }
0x14e4   :  { %v5101_v61 = vadd.f32 1.0, %v7942_v25  ;;  %v7944_v37 = vpop.eup %7943 }
0x14e5   :  { %v711_v41 = vadd.f32 1.0, %v7944_v37 }
0x14e6   :  { %7945 = vrcp.f32 %v5101_v61 }
0x14e7   :  { %7947 = vrcp.f32 %v711_v41 }
0x14f0   :  { %v7946_v47 = vpop.eup %7945 }
0x14f1   :  { %7511 = vmatmul.mubr.msk.f32.vlgmr.msra.gmra.mrb[228].mxu0 %vm609_vm7, %v7946_v47  ;;  %v7948_v58 = vpop.eup %7947 }
0x14f2   :  { %7514 = vmatpush3.msra.mxu0 %v5104_v22  ;;  %7515 = vmatprep.mubr.msk.f32.mxu0 %vm8150_vm0, %v8151_v7 }
0x14f3   :  { %7867 = vmatprep.subr.bf16.mxu0 %v8149_v3 }
0x14f9   :  { %7516 = vmatmul.mubr.msk.f32.vlgmr.msra.gmra.mrb[228].mxu0 %vm609_vm7, %v7948_v58 }
0x14fa   :  { %7869 = vmatpush3.bf16.msra.mxu0 %v7868_v39  ;;  %7522 = vmatprep.mubr.msk.f32.mxu0 %vm8150_vm0, %v8151_v7 }
0x15cc   :  { %v5248_v21 = vpop.f32.mrb[228].mxu0 }
0x15cd   :  { %v7517_v62 = vpop.f32.mrb[229].mxu0  ;;  %7523 = vmatmul.mubr.msk.f32.vlgmr.msra.gmra.mrb[230].mxu0 %vm170_vm1, %v5248_v21  ;;  %5252 = vst.msk [vmem:[#allocation7] sm:$0xf] %vm428_vm5, %v5248_v21 }
0x15ce   :  { %7960 = shalt.err (!%p7957_p4)
}
0x15cf   :  { %s9955_s5 = sld [smem:[#allocation36_spill]] }
0x15d5   :  { %s7961_s13 = scalar_lea.hbm %s9955_s5, 64 }
0x15d6   :  { %p7962_p5 = scmp.ne.s32.totalorder %s9955_s5, %s7961_s13  ;;  %p7965_p6 = scmp.lt.u32.totalorder %s7961_s13, %s9955_s5 }
0x15d8   :  { %p7967_p7 = pnand %p7965_p6, %p7962_p5 }
0x15da   :  { %7970 = shalt.err (!%p7967_p7)
}
0x15db   :  { %5356 = dma.vmem_to_hbm [thread:$0]  %s5354_s7, 64, %s9955_s5, [#allocation5]  }
0x15dc   :  { %s7971_s21 = scalar_lea.vmem %s5374_s11, 64  ;;  %p7976_p9 = scmp.lt.s32.totalorder %s5374_s11, %s5374_s11 }
0x15dd   :  { %p7972_p8 = scmp.ne.s32.totalorder %s5374_s11, %s7971_s21  ;;  %p7977_p10 = scmp.lt.s32.totalorder %s7971_s21, %s7971_s21 }
0x15df   :  { %p7978_p11 = por %p7977_p10, %p7976_p9 }
0x15e1   :  { %p7979_p12 = pnand %p7978_p11, %p7972_p8 }
0x15e3   :  { %7982 = shalt.err (!%p7979_p12)
}
0x15e4   :  { %s7983_s25 = scalar_lea.hbm %s8343_s20, 64 }
0x15e5   :  { %p7984_p13 = scmp.ne.s32.totalorder %s8343_s20, %s7983_s25  ;;  %p7987_p0 = scmp.lt.u32.totalorder %s7983_s25, %s8343_s20 }
0x15e7   :  { %p7989_p1 = pnand %p7987_p0, %p7984_p13 }
0x15e9   :  { %7992 = shalt.err (!%p7989_p1)
}
0x15ea   :  { %5376 = dma.vmem_to_hbm [thread:$0]  %s5374_s11, 64, %s8343_s20, [#allocation8]  }
0x15eb   :  { %s8155_s17 = smov [#allocation10]   ;;  %s8156_s3 = smov [#allocation2]  }
0x15ec   :  { %s5393_s29 = sshll.u32 %s8155_s17, 4  ;;  %s5343_s8 = sshll.u32 %s8156_s3, 4  ;;  %s5394_s29 = int_to_ptr.vmem [resolvable:$true] %s5393_s29  ;;  %s5344_s8 = int_to_ptr.vmem [resolvable:$true] %s5343_s8 }
0x15ed   :  { %s7993_s14 = scalar_lea.vmem %s5394_s29, 16  ;;  %s7997_s19 = scalar_lea.vmem %s5394_s29, 32 }
0x15ee   :  { %p7994_p2 = scmp.ne.s32.totalorder %s5394_s29, %s7993_s14  ;;  %p7998_p3 = scmp.lt.s32.totalorder %s5394_s29, %s5394_s29 }
0x15ef   :  { %p7999_p4 = scmp.lt.s32.totalorder %s7997_s19, %s7993_s14 }
0x15f1   :  { %p8000_p5 = por %p7999_p4, %p7998_p3 }
0x15f3   :  { %p8001_p6 = pnand %p8000_p5, %p7994_p2 }
0x15f5   :  { %8004 = shalt.err (!%p8001_p6)
}
0x15f6   :  { %s8005_s24 = scalar_lea.hbm %s8353_s4, 16 }
0x15f7   :  { %p8006_p7 = scmp.ne.s32.totalorder %s8353_s4, %s8005_s24  ;;  %p8009_p8 = scmp.lt.u32.totalorder %s8005_s24, %s8353_s4 }
0x15f9   :  { %p8011_p9 = pnand %p8009_p8, %p8006_p7 }
0x15fb   :  { %8014 = shalt.err (!%p8011_p9)
}
0x15fc   :  { %5396 = dma.vmem_to_hbm [thread:$0]  %s5394_s29, 16, %s8353_s4, [#allocation11]  }
0x15fd   :  { %s8015_s20 = scalar_lea.vmem %s5344_s8, 64  ;;  %p8020_p11 = scmp.lt.s32.totalorder %s5344_s8, %s5344_s8 }
0x15fe   :  { %p8016_p10 = scmp.ne.s32.totalorder %s5344_s8, %s8015_s20  ;;  %p8021_p12 = scmp.lt.s32.totalorder %s8015_s20, %s8015_s20 }
0x1600   :  { %p8022_p13 = por %p8021_p12, %p8020_p11 }
0x1602   :  { %p8023_p0 = pnand %p8022_p13, %p8016_p10 }
0x1604   :  { %8026 = shalt.err (!%p8023_p0)
}
0x1605   :  { %s9956_s30 = sld [smem:[#allocation35_spill]] }
0x160b   :  { %s8027_s6 = scalar_lea.hbm %s9956_s30, 64 }
0x160c   :  { %p8028_p1 = scmp.ne.s32.totalorder %s9956_s30, %s8027_s6  ;;  %p8031_p2 = scmp.lt.u32.totalorder %s8027_s6, %s9956_s30 }
0x160e   :  { %p8033_p3 = pnand %p8031_p2, %p8028_p1 }
0x1610   :  { %8036 = shalt.err (!%p8033_p3)
}
0x1611   :  { %5346 = dma.vmem_to_hbm [thread:$0]  %s5344_s8, 64, %s9956_s30, [#allocation3]  }
0x1612   :  { %s8157_s12 = smov [#allocation6]   ;;  %s8158_s4 = smov [#allocation9]  }
0x1613   :  { %s5363_s15 = sshll.u32 %s8157_s12, 4  ;;  %s5383_s16 = sshll.u32 %s8158_s4, 4  ;;  %s5364_s15 = int_to_ptr.vmem [resolvable:$true] %s5363_s15  ;;  %s5384_s16 = int_to_ptr.vmem [resolvable:$true] %s5383_s16 }
0x1614   :  { %s8037_s18 = scalar_lea.vmem %s5364_s15, 16  ;;  %s8041_s22 = scalar_lea.vmem %s5364_s15, 32 }
0x1615   :  { %p8038_p4 = scmp.ne.s32.totalorder %s5364_s15, %s8037_s18  ;;  %p8042_p5 = scmp.lt.s32.totalorder %s5364_s15, %s5364_s15 }
0x1616   :  { %p8043_p6 = scmp.lt.s32.totalorder %s8041_s22, %s8037_s18 }
0x1618   :  { %p8044_p7 = por %p8043_p6, %p8042_p5 }
0x161a   :  { %p8045_p8 = pnand %p8044_p7, %p8038_p4 }
0x161c   :  { %8048 = shalt.err (!%p8045_p8)
}
0x161d   :  { %s9957_s23 = sld [smem:[#allocation37_spill]] }
0x1623   :  { %s8049_s26 = scalar_lea.hbm %s9957_s23, 16 }
0x1624   :  { %p8050_p9 = scmp.ne.s32.totalorder %s9957_s23, %s8049_s26  ;;  %p8053_p10 = scmp.lt.u32.totalorder %s8049_s26, %s9957_s23 }
0x1626   :  { %p8055_p11 = pnand %p8053_p10, %p8050_p9 }
0x1628   :  { %8058 = shalt.err (!%p8055_p11)
}
0x1629   :  { %5366 = dma.vmem_to_hbm [thread:$0]  %s5364_s15, 16, %s9957_s23, [#allocation5]  }
0x162a   :  { %s8059_s28 = scalar_lea.vmem %s5384_s16, 64  ;;  %p8064_p13 = scmp.lt.s32.totalorder %s5384_s16, %s5384_s16 }
0x162b   :  { %p8060_p12 = scmp.ne.s32.totalorder %s5384_s16, %s8059_s28  ;;  %p8065_p0 = scmp.lt.s32.totalorder %s8059_s28, %s8059_s28 }
0x162d   :  { %p8066_p1 = por %p8065_p0, %p8064_p13 }
0x162f   :  { %p8067_p2 = pnand %p8066_p1, %p8060_p12 }
0x1631   :  { %8070 = shalt.err (!%p8067_p2)
}
0x1632   :  { %s8071_s1 = scalar_lea.hbm %s8348_s27, 64 }
0x1633   :  { %p8072_p3 = scmp.ne.s32.totalorder %s8348_s27, %s8071_s1  ;;  %p8075_p4 = scmp.lt.u32.totalorder %s8071_s1, %s8348_s27 }
0x1635   :  { %p8077_p5 = pnand %p8075_p4, %p8072_p3 }
0x1637   :  { %8080 = shalt.err (!%p8077_p5)
}
0x1638   :  { %s9958_s2 = sld [smem:[#allocation34_spill]]  ;;  %s8159_s7 = smov [#allocation12]   ;;  %vm5335_vm0 = vcmask 27648  }
0x1639   :  { %5386 = dma.vmem_to_hbm [thread:$0]  %s5384_s16, 64, %s8348_s27, [#allocation8]  }
0x163a   :  { %s5403_s10 = sshll.u32 %s8159_s7, 4  ;;  %s5404_s10 = int_to_ptr.vmem [resolvable:$true] %s5403_s10 }
0x163b   :  { %s8081_s11 = scalar_lea.vmem %s5404_s10, 64  ;;  %p8086_p7 = scmp.lt.s32.totalorder %s5404_s10, %s5404_s10 }
0x163c   :  { %p8082_p6 = scmp.ne.s32.totalorder %s5404_s10, %s8081_s11  ;;  %p8087_p8 = scmp.lt.s32.totalorder %s8081_s11, %s8081_s11 }
0x163e   :  { %v5854_v3 = vld [vmem:[%s9958_s2] ss:$0 sm:$0xff]  ;;  %p8088_p9 = por %p8087_p8, %p8086_p7 }
0x1640   :  { %p8089_p10 = pnand %p8088_p9, %p8082_p6 }
0x16a0   :  { %v5331_v7 = vpop.f32.mrb[230].mxu0 }
0x16a1   :  { %v5332_v63 = vadd.f32 %v5854_v3, %v5331_v7  ;;  %v7524_v1 = vpop.f32.mrb[231].mxu0 }
0x16a3   :  { %5336 = vst.msk [vmem:[#allocation12] sm:$0xf] %vm5335_vm0, %v5332_v63 }
0x16a4   :  { %8092 = shalt.err (!%p8089_p10)
}
0x16a5   :  { %s8093_s27 = scalar_lea.hbm %s8358_s9, 64 }
0x16a6   :  { %p8094_p11 = scmp.ne.s32.totalorder %s8358_s9, %s8093_s27  ;;  %p8097_p12 = scmp.lt.u32.totalorder %s8093_s27, %s8358_s9 }
0x16a8   :  { %p8099_p13 = pnand %p8097_p12, %p8094_p11 }
0x16aa   :  { %8102 = shalt.err (!%p8099_p13)
}
0x16ab   :  { %5406 = dma.vmem_to_hbm [thread:$0]  %s5404_s10, 64, %s8358_s9, [#allocation11]  }
0x16ac   :  { %8103 = dma.done.wait [#allocation3], 64  }
0x16ad   :  { %8104 = vsyncadd [#allocation3], 4294967232 }
0x16ae   :  { %8105 = dma.done.wait [#allocation5], 80  }
0x16af   :  { %8106 = vsyncadd [#allocation5], 4294967216 }
0x16b0   :  { %8107 = dma.done.wait [#allocation8], 128  }
0x16b1   :  { %8108 = vsyncadd [#allocation8], 4294967168 }
0x16b2   :  { %8109 = dma.done.wait [#allocation11], 80  }
0x16b3   :  { %8110 = vsyncadd [#allocation11], 4294967216 }
0x16b4   :  { %5428 = vsyncpa [#allocation3], 1 }
0x16b5   :  { %5429 = vsyncpa [#allocation5], 1 }
0x16b6   :  { %5430 = vsyncpa [#allocation8], 1 }
0x16b7   :  { %5431 = vsyncpa [#allocation11], 1 }

</bundles_post_ra>
